<compile_context>
chip_gen: v6e
topology: v6e:2x2x1
jax: 0.10.0
libtpu: 0.0.40
codegen_flags: <defaults>
</compile_context>

<pallas_src>
import functools
import math

import jax
import jax.numpy as jnp
from jax.experimental import pallas as pl
from jax.experimental.pallas import tpu as pltpu

F32 = jnp.float32
BF16 = jnp.bfloat16


# ------------------------- tiling / compiler helpers -------------------------

def _m_tiling(M):
    """Largest sublane-aligned row tile <= 512 that divides M (else whole M)."""
    for tm in range(512, 7, -8):
        if M % tm == 0:
            return tm, M // tm
    return M, 1


def _ff_tiling(ff):
    """Lane-aligned tile of the FFN hidden dim (else whole ff)."""
    for tf in (512, 384, 256, 128):
        if ff % tf == 0:
            return tf, ff // tf
    return ff, 1


def _kv_tiling(S):
    """Lane/sublane-aligned kv tile for flash attention (else whole S)."""
    for tk in (512, 256, 128):
        if S % tk == 0:
            return tk, S // tk
    return S, 1


def _cparams(sems, blocks):
    """CompilerParams with an explicit VMEM limit derived from the resident
    blocks (x2 for double buffering) plus headroom."""
    nbytes = sum(math.prod(s) * (2 if d == BF16 else 4) for s, d in blocks)
    limit = max(32 << 20, min(2 * nbytes + (8 << 20), 100 << 20))
    return pltpu.CompilerParams(dimension_semantics=sems,
                                vmem_limit_bytes=int(limit))


def _layernorm_math(x, alpha, bias, eps, d):
    # The module's custom LayerNorm: torch.std is the unbiased estimator
    # (divide by d-1) and eps is added to the std (not the variance).
    mean = jnp.mean(x, axis=-1, keepdims=True)
    xc = x - mean
    var = jnp.sum(xc * xc, axis=-1, keepdims=True) * (1.0 / (d - 1))
    std = jnp.sqrt(var)
    # divide -> EUP reciprocal + VALU multiply (EUP slot is otherwise idle here)
    return alpha * xc * pl.reciprocal(std + eps) + bias


# --------------------- Conv1d + BN(eval) + ReLU (fused) -----------------------

def _conv_bn_relu_kernel(xp_ref, w_ref, b_ref, o_ref, *, lout):
    # stride-2 conv = 3 shifted strided loads from one VMEM tile -> 3 matmuls.
    acc = jnp.dot(xp_ref[pl.ds(0, lout, stride=2), :].astype(BF16), w_ref[0],
                  preferred_element_type=F32)
    acc = acc + jnp.dot(xp_ref[pl.ds(1, lout, stride=2), :].astype(BF16), w_ref[1],
                        preferred_element_type=F32)
    acc = acc + jnp.dot(xp_ref[pl.ds(2, lout, stride=2), :].astype(BF16), w_ref[2],
                        preferred_element_type=F32)
    o_ref[...] = jnp.maximum(acc + b_ref[...], 0.0)


def conv_bn_relu(x_blc, w, gamma, beta, mean, var, eps=1e-5):
    """Conv1d(k=3, s=2, p=1, bias=False) + BatchNorm1d(eval) + ReLU, channels-last.

    x_blc: (B, L, Cin); w: (Cout, Cin, 3) in the PyTorch layout.  BatchNorm is
    folded into the (bf16) weights so conv+BN+ReLU is one Pallas kernel."""
    B, L, Cin = x_blc.shape
    Cout = w.shape[0]
    Lout = (L - 1) // 2 + 1
    Lp = L + 2
    xp = jnp.pad(x_blc, ((0, 0), (1, 1), (0, 0)))           # zero pad = conv padding
    scale = gamma / jnp.sqrt(var + eps)
    w3 = (jnp.transpose(w, (2, 1, 0)) * scale[None, None, :]).astype(BF16)  # (3,Cin,Cout)
    bias = (beta - mean * scale)[None, :]                                   # (1, Cout)
    # TODO(synk): tile Lout as well for very long pre-conv sequences.
    blocks = [((Lp, Cin), F32), ((3, Cin, Cout), BF16),
              ((1, Cout), F32), ((Lout, Cout), F32)]
    return pl.pallas_call(
        functools.partial(_conv_bn_relu_kernel, lout=Lout),
        out_shape=jax.ShapeDtypeStruct((B, Lout, Cout), F32),
        grid=(B,),
        in_specs=[
            pl.BlockSpec((None, Lp, Cin), lambda b: (b, 0, 0)),
            pl.BlockSpec((3, Cin, Cout), lambda b: (0, 0, 0)),
            pl.BlockSpec((1, Cout), lambda b: (0, 0)),
        ],
        out_specs=pl.BlockSpec((None, Lout, Cout), lambda b: (b, 0, 0)),
        compiler_params=_cparams(("parallel",), blocks),
    )(xp, w3, bias)


# -------------------- LayerNorm1 + Q/K/V projections (fused) ------------------

def _ln_qkv_kernel(x_ref, a_ref, b_ref, wq_ref, wk_ref, wv_ref,
                   bq_ref, bk_ref, bv_ref, q_ref, k_ref, v_ref, *, eps, d):
    xn = _layernorm_math(x_ref[...], a_ref[...], b_ref[...], eps, d).astype(BF16)
    q_ref[...] = (jnp.dot(xn, wq_ref[...], preferred_element_type=F32)
                  + bq_ref[...]).astype(BF16)
    k_ref[...] = (jnp.dot(xn, wk_ref[...], preferred_element_type=F32)
                  + bk_ref[...]).astype(BF16)
    v_ref[...] = (jnp.dot(xn, wv_ref[...], preferred_element_type=F32)
                  + bv_ref[...]).astype(BF16)


def ln_qkv(x, ln_a, ln_b, wq, wk, wv, bq, bk, bv, eps=1e-7):
    """Fused LayerNorm + Q/K/V projections.  x: (M, d) f32 -> three (M, d) bf16."""
    M, d = x.shape
    tm, gm = _m_tiling(M)
    mspec = pl.BlockSpec((tm, d), lambda i: (i, 0))
    wspec = pl.BlockSpec((d, d), lambda i: (0, 0))
    bspec = pl.BlockSpec((1, d), lambda i: (0, 0))
    out_sds = jax.ShapeDtypeStruct((M, d), BF16)
    blocks = ([((tm, d), F32)] + [((1, d), F32)] * 2 + [((d, d), BF16)] * 3
              + [((1, d), F32)] * 3 + [((tm, d), BF16)] * 3)
    return pl.pallas_call(
        functools.partial(_ln_qkv_kernel, eps=eps, d=d),
        out_shape=(out_sds, out_sds, out_sds),
        grid=(gm,),
        in_specs=[mspec, bspec, bspec, wspec, wspec, wspec, bspec, bspec, bspec],
        out_specs=(mspec, mspec, mspec),
        compiler_params=_cparams(("parallel",), blocks),
    )(x, ln_a, ln_b, wq, wk, wv, bq, bk, bv)


# --------------------------- flash-style attention ----------------------------

def _flash_attn_kernel(*refs, scale, has_bias):
    if has_bias:
        q_ref, k_ref, v_ref, bias_ref, o_ref, m_sc, l_sc, acc_sc = refs
    else:
        q_ref, k_ref, v_ref, o_ref, m_sc, l_sc, acc_sc = refs
        bias_ref = None
    kv = pl.program_id(1)

    @pl.when(kv == 0)
    def _():
        m_sc[...] = jnp.full_like(m_sc, -jnp.inf)
        l_sc[...] = jnp.zeros_like(l_sc)
        acc_sc[...] = jnp.zeros_like(acc_sc)

    s = jnp.einsum('hqd,hkd->hqk', q_ref[...], k_ref[...],
                   preferred_element_type=F32) * scale
    if has_bias:
        s = s + bias_ref[...][None]        # (S, tkv) bias, constant across heads

    m_new = jnp.maximum(m_sc[...], s.max(-1, keepdims=True))
    alpha = jnp.exp(m_sc[...] - m_new)
    p = jnp.exp(s - m_new)
    l_sc[...] = alpha * l_sc[...] + p.sum(-1, keepdims=True)
    acc_sc[...] = alpha * acc_sc[...] + jnp.einsum(
        'hqk,hkd->hqd', p.astype(BF16), v_ref[...], preferred_element_type=F32)
    m_sc[...] = m_new

    @pl.when(kv == pl.num_programs(1) - 1)
    def _():
        o_ref[...] = (acc_sc[...]
                      * pl.reciprocal(l_sc[...], approx=True)).astype(BF16)


def _head_block(BH, S, dh, tkv, n_heads, has_bias):
    if has_bias:
        # bias is (B, S, S): a head-block must cover exactly one batch so the
        # bias index_map addresses it by batch.
        # TODO(synk): at very long S also tile the query axis for this path.
        return n_heads
    per_head = 2 * (2 * S * dh + 2 * tkv * dh) * 2        # bf16 q,k,v,o, 2 buffers
    per_head += (S * dh + 2 * S) * 4                      # f32 acc/m/l scratch
    hb = max(1, min(BH, (8 << 20) // max(per_head, 1)))
    while BH % hb:
        hb -= 1
    if hb == BH and BH % 2 == 0:
        hb = BH // 2       # expose >= 2 "parallel" steps (megacore / v7x 2 TCs)
    return hb


def attention(q, k, v, bias, dh, n_heads):
    """q,k,v: (B*H, S, dh) bf16; bias: optional (B, S, S) f32 additive score bias."""
    BH, S, _ = q.shape
    scale = 1.0 / math.sqrt(dh)
    has_bias = bias is not None
    tkv, n_kv = _kv_tiling(S)
    hb = _head_block(BH, S, dh, tkv, n_heads, has_bias)
    gh = BH // hb

    qspec = pl.BlockSpec((hb, S, dh), lambda h, kv: (h, 0, 0))
    kvspec = pl.BlockSpec((hb, tkv, dh), lambda h, kv: (h, kv, 0))
    in_specs = [qspec, kvspec, kvspec]
    args = [q, k, v]
    blocks = [((hb, S, dh), BF16), ((hb, tkv, dh), BF16), ((hb, tkv, dh), BF16),
              ((hb, S, dh), BF16), ((hb, S, dh), F32), ((hb, S, 1), F32),
              ((hb, S, 1), F32)]
    if has_bias:
        in_specs.append(pl.BlockSpec((None, S, tkv), lambda h, kv: (h, 0, kv)))
        args.append(bias)
        blocks.append(((S, tkv), F32))

    # TODO(synk): dh=8 at this toy config leaves the 128-lane axis mostly
    # masked; real deployments should use dh >= 128 for lane-dense blocks.
    return pl.pallas_call(
        functools.partial(_flash_attn_kernel, scale=scale, has_bias=has_bias),
        out_shape=jax.ShapeDtypeStruct((BH, S, dh), BF16),
        grid=(gh, n_kv),
        in_specs=in_specs,
        out_specs=qspec,
        scratch_shapes=[pltpu.VMEM((hb, S, 1), F32),
                        pltpu.VMEM((hb, S, 1), F32),
                        pltpu.VMEM((hb, S, dh), F32)],
        compiler_params=_cparams(("parallel", "arbitrary"), blocks),
    )(*args)


# ------- out-projection + residual + LN2 + FFN + residual (+ final LN) --------

def _attn_out_ffn_kernel(*refs, eps, d, final_ln):
    if final_ln:
        (attn_ref, xres_ref, wo_ref, bo_ref, a2_ref, b2_ref, w1_ref, fb1_ref,
         w2_ref, fb2_ref, fa_ref, fbb_ref, o_ref, x_sc, xn_sc, acc_sc) = refs
    else:
        (attn_ref, xres_ref, wo_ref, bo_ref, a2_ref, b2_ref, w1_ref, fb1_ref,
         w2_ref, fb2_ref, o_ref, x_sc, xn_sc, acc_sc) = refs
        fa_ref = fbb_ref = None
    f = pl.program_id(1)

    @pl.when(f == 0)
    def _():
        y = jnp.dot(attn_ref[...], wo_ref[...],
                    preferred_element_type=F32) + bo_ref[...]
        x = xres_ref[...] + y                       # attention out-proj + residual 1
        x_sc[...] = x
        xn_sc[...] = _layernorm_math(x, a2_ref[...], b2_ref[...],
                                     eps, d).astype(BF16)
        acc_sc[...] = jnp.zeros_like(acc_sc)

    # one FFN-hidden tile per grid step, accumulated in f32 VMEM scratch
    h = jnp.maximum(
        jnp.dot(xn_sc[...], w1_ref[...], preferred_element_type=F32) + fb1_ref[...],
        0.0)
    acc_sc[...] += jnp.dot(h.astype(BF16), w2_ref[...],
                           preferred_element_type=F32)

    @pl.when(f == pl.num_programs(1) - 1)
    def _():
        out = x_sc[...] + acc_sc[...] + fb2_ref[...]   # fc2 bias once + residual 2
        if final_ln:
            out = _layernorm_math(out, fa_ref[...], fbb_ref[...], eps, d)
        o_ref[...] = out


def attn_out_ffn(attn, xres, wo, bo, ln2_a, ln2_b, w1, fb1, w2, fb2,
                 final_ln_params=None, eps=1e-7):
    M, d = xres.shape
    ff = w1.shape[1]
    tm, gm = _m_tiling(M)
    tf, gf = _ff_tiling(ff)
    final_ln = final_ln_params is not None

    mspec = pl.BlockSpec((tm, d), lambda i, f: (i, 0))
    dspec = pl.BlockSpec((1, d), lambda i, f: (0, 0))
    in_specs = [mspec, mspec,
                pl.BlockSpec((d, d), lambda i, f: (0, 0)), dspec,
                dspec, dspec,
                pl.BlockSpec((d, tf), lambda i, f: (0, f)),
                pl.BlockSpec((1, tf), lambda i, f: (0, f)),
                pl.BlockSpec((tf, d), lambda i, f: (f, 0)),
                dspec]
    args = [attn, xres, wo, bo, ln2_a, ln2_b, w1, fb1, w2, fb2]
    blocks = [((tm, d), BF16), ((tm, d), F32), ((d, d), BF16), ((1, d), F32),
              ((1, d), F32), ((1, d), F32), ((d, tf), BF16), ((1, tf), F32),
              ((tf, d), BF16), ((1, d), F32), ((tm, d), F32),
              ((tm, d), F32), ((tm, d), BF16), ((tm, d), F32)]
    if final_ln:
        in_specs += [dspec, dspec]
        args += list(final_ln_params)
        blocks += [((1, d), F32)] * 2

    return pl.pallas_call(
        functools.partial(_attn_out_ffn_kernel, eps=eps, d=d, final_ln=final_ln),
        out_shape=jax.ShapeDtypeStruct((M, d), F32),
        grid=(gm, gf),
        in_specs=in_specs,
        out_specs=mspec,
        scratch_shapes=[pltpu.VMEM((tm, d), F32),     # x (post residual 1)
                        pltpu.VMEM((tm, d), BF16),    # LayerNorm2 output
                        pltpu.VMEM((tm, d), F32)],    # FFN accumulator
        compiler_params=_cparams(("parallel", "arbitrary"), blocks),
    )(*args)


# ---------------------- standalone LayerNorm (num == 0 only) ------------------

def _layernorm_kernel(x_ref, a_ref, b_ref, o_ref, *, eps, d):
    o_ref[...] = _layernorm_math(x_ref[...], a_ref[...], b_ref[...], eps, d)


def layernorm(x, alpha, bias, eps=1e-7):
    M, D = x.shape
    tm, gm = _m_tiling(M)
    blocks = [((tm, D), F32), ((1, D), F32), ((1, D), F32), ((tm, D), F32)]
    return pl.pallas_call(
        functools.partial(_layernorm_kernel, eps=eps, d=D),
        out_shape=jax.ShapeDtypeStruct((M, D), F32),
        grid=(gm,),
        in_specs=[pl.BlockSpec((tm, D), lambda i: (i, 0)),
                  pl.BlockSpec((1, D), lambda i: (0, 0)),
                  pl.BlockSpec((1, D), lambda i: (0, 0))],
        out_specs=pl.BlockSpec((tm, D), lambda i: (i, 0)),
        compiler_params=_cparams(("parallel",), blocks),
    )(x, alpha, bias)


# -------------------------------- JAX glue ------------------------------------

def _build_bias(mask, g_mask, B, S):
    """Per-batch (B, S, S) additive score bias; never expanded over heads."""
    if mask is None and g_mask is None:
        return None
    bias = jnp.zeros((B, S, S), F32)
    if mask is not None:   # mask.unsqueeze(1); masked_fill(mask == 0, -50000.)
        bias = bias + jnp.where(jnp.broadcast_to(mask, (B, S, S)) == 0,
                                -50000.0, 0.0)
    if g_mask is not None:
        # TODO(synk): a per-head g_mask is not representable in this compact form.
        bias = bias + jnp.broadcast_to(g_mask.astype(F32), (B, S, S))
    return bias


def encoder_layer(x2, lp, B, S, d_model, n_heads, bias, final_ln_params):
    dh = d_model // n_heads
    q, k, v = ln_qkv(x2, lp['ln1_a'], lp['ln1_b'],
                     lp['wq'], lp['wk'], lp['wv'], lp['bq'], lp['bk'], lp['bv'])
    # PyTorch's q.view(B, n_heads, -1, dh) on a (B, S, d) tensor is a flat
    # row-major reshape (no transpose); (B*S, d) -> (B*n_heads, S, dh) is the
    # same bytes, so these reshapes are free bitcasts (no HBM copy).
    q = q.reshape(B * n_heads, S, dh)
    k = k.reshape(B * n_heads, S, dh)
    v = v.reshape(B * n_heads, S, dh)
    attn = attention(q, k, v, bias, dh, n_heads)       # (B*H, S, dh) bf16
    attn = attn.reshape(B * S, d_model)                # scores.reshape(B,-1,d)
    return attn_out_ffn(attn, x2, lp['wo'], lp['bo'], lp['ln2_a'], lp['ln2_b'],
                        lp['w1'], lp['b1'], lp['w2'], lp['b2'],
                        final_ln_params=final_ln_params)


def make_pe(max_len, d):
    # Split-half sin/cos layout with exponent 2*i/d — exactly the reference loop.
    pos = jnp.arange(max_len, dtype=F32)[:, None]
    i = jnp.arange(d, dtype=F32)[None, :]
    angle = pos / jnp.power(10000.0, 2.0 * i / d)
    return jnp.where(i < d / 2, jnp.sin(angle), jnp.cos(angle))    # (max_len, d)


def make_params(key, vocab, d, ff, num):
    keys = iter(jax.random.split(key, 256))

    def nrm(shape, scale=0.05, dtype=F32):
        return (jax.random.normal(next(keys), shape, F32) * scale).astype(dtype)

    p = {'embed': nrm((vocab, d), 1.0)}
    for i in (1, 2, 3):
        p[f'conv{i}_w'] = nrm((d, d, 3))
        p[f'bn{i}_gamma'] = 1.0 + nrm((d,))
        p[f'bn{i}_beta'] = nrm((d,))
        p[f'bn{i}_mean'] = nrm((d,))
        p[f'bn{i}_var'] = 1.0 + jnp.abs(nrm((d,)))
    p['layers'] = []
    for _ in range(num):
        p['layers'].append({
            'ln1_a': 1.0 + nrm((1, d)), 'ln1_b': nrm((1, d)),
            'wq': nrm((d, d), dtype=BF16), 'bq': nrm((1, d)),
            'wk': nrm((d, d), dtype=BF16), 'bk': nrm((1, d)),
            'wv': nrm((d, d), dtype=BF16), 'bv': nrm((1, d)),
            'wo': nrm((d, d), dtype=BF16), 'bo': nrm((1, d)),
            'ln2_a': 1.0 + nrm((1, d)), 'ln2_b': nrm((1, d)),
            'w1': nrm((d, ff), dtype=BF16), 'b1': nrm((1, ff)),
            'w2': nrm((ff, d), dtype=BF16), 'b2': nrm((1, d)),
        })
    p['lnf_a'] = 1.0 + nrm((1, d))
    p['lnf_b'] = nrm((1, d))
    return p


def encoder_block_forward(params, src, mask=None, g_mask=None, *,
                          d_model, n_heads, num):
    B, L = src.shape
    # TODO(synk): embedding gather stays in XLA (no rectangular BlockSpec form).
    x = params['embed'][src]                       # (B, L, d)
    x = x + params['pe'][:L][None]                 # positional encoding
    # Conv1dBlock: the two permutes in the PyTorch code are absorbed by the
    # channels-last layout; dropout layers are identity in inference mode.
    for i in (1, 2, 3):
        x = conv_bn_relu(x, params[f'conv{i}_w'], params[f'bn{i}_gamma'],
                         params[f'bn{i}_beta'], params[f'bn{i}_mean'],
                         params[f'bn{i}_var'])
    B, S, d = x.shape
    bias = _build_bias(mask, g_mask, B, S)
    lnf = (params['lnf_a'], params['lnf_b'])
    x2 = x.reshape(B * S, d)
    for layer in range(num):
        is_last = layer == num - 1
        x2 = encoder_layer(x2, params['layers'][layer], B, S, d_model, n_heads,
                           bias, lnf if is_last else None)
    if num == 0:                                   # final LN not fused anywhere
        x2 = layernorm(x2, *lnf)
    return x2.reshape(B, S, d)


if __name__ == "__main__":
    vocab_size, d_model, ff_dim, num, n_heads, max_len = 100, 32, 64, 2, 4, 128
    B, L = 2, 64

    key = jax.random.PRNGKey(0)
    kp, ks = jax.random.split(key)
    params = make_params(kp, vocab_size, d_model, ff_dim, num)
    params['pe'] = make_pe(max_len, d_model)

    src = jax.random.randint(ks, (B, L), 0, vocab_size)

    fwd = jax.jit(functools.partial(encoder_block_forward,
                                    d_model=d_model, n_heads=n_heads, num=num))
    out = fwd(params, src)
    jax.block_until_ready(out)
    assert out.shape == (B, L // 8, d_model)   # three stride-2 convs: 64 -> 8
    assert bool(jnp.all(jnp.isfinite(out)))
    print("KERNEL_OK")
</pallas_src>

<mosaic_0001>
module attributes {stable_mosaic.version = 11 : i64} {
  func.func @_conv_bn_relu_kernel(%arg0: i32, %arg1: memref<1x66x32xf32, #tpu.memory_space<vmem>>, %arg2: memref<3x32x32xbf16, #tpu.memory_space<vmem>>, %arg3: memref<1x32xf32, #tpu.memory_space<vmem>>, %arg4: memref<1x32x32xf32, #tpu.memory_space<vmem>>) attributes {dimension_semantics = [#tpu.dimension_semantics<parallel>], iteration_bounds = array<i64: 2>, scalar_prefetch = 0 : i64, scratch_operands = 0 : i64, tpu.core_type = #tpu.core_type<tc>, window_params = [{transform_indices = @transform_0, window_bounds = array<i64: 1, 66, 32>}, {pipeline_mode = #tpu.pipeline_mode<synchronous>, transform_indices = @transform_1, window_bounds = array<i64: 3, 32, 32>}, {pipeline_mode = #tpu.pipeline_mode<synchronous>, transform_indices = @transform_2, window_bounds = array<i64: 1, 32>}, {transform_indices = @transform_3, window_bounds = array<i64: 1, 32, 32>}]} {
    %c0 = arith.constant 0 : index
    %c0_0 = arith.constant 0 : index
    %c0_1 = arith.constant 0 : index
    %0 = tpu.strided_load %arg1[%c0, %c0_0, %c0_1] {strides = array<i32: 1, 2, 1>} : memref<1x66x32xf32, #tpu.memory_space<vmem>>, vector<1x32x32xf32>
    %1 = vector.shape_cast %0 : vector<1x32x32xf32> to vector<32x32xf32>
    %2 = arith.truncf %1 : vector<32x32xf32> to vector<32x32xbf16>
    %c0_2 = arith.constant 0 : index
    %c0_3 = arith.constant 0 : index
    %c0_4 = arith.constant 0 : index
    %3 = vector.load %arg2[%c0_2, %c0_3, %c0_4] : memref<3x32x32xbf16, #tpu.memory_space<vmem>>, vector<1x32x32xbf16>
    %4 = vector.shape_cast %3 : vector<1x32x32xbf16> to vector<32x32xbf16>
    %cst = arith.constant dense<0.000000e+00> : vector<32x32xf32>
    %5 = tpu.matmul %2, %4, %cst {dimension_numbers = #tpu.dot_dimension_numbers<[1], [0], [0], [1], [0, 0, 1, 1], [], []>} : vector<32x32xbf16>, vector<32x32xbf16>, vector<32x32xf32> -> vector<32x32xf32>
    %c0_5 = arith.constant 0 : index
    %c1 = arith.constant 1 : index
    %c0_6 = arith.constant 0 : index
    %6 = tpu.strided_load %arg1[%c0_5, %c1, %c0_6] {strides = array<i32: 1, 2, 1>} : memref<1x66x32xf32, #tpu.memory_space<vmem>>, vector<1x32x32xf32>
    %7 = vector.shape_cast %6 : vector<1x32x32xf32> to vector<32x32xf32>
    %8 = arith.truncf %7 : vector<32x32xf32> to vector<32x32xbf16>
    %c1_7 = arith.constant 1 : index
    %c0_8 = arith.constant 0 : index
    %c0_9 = arith.constant 0 : index
    %9 = vector.load %arg2[%c1_7, %c0_8, %c0_9] : memref<3x32x32xbf16, #tpu.memory_space<vmem>>, vector<1x32x32xbf16>
    %10 = vector.shape_cast %9 : vector<1x32x32xbf16> to vector<32x32xbf16>
    %cst_10 = arith.constant dense<0.000000e+00> : vector<32x32xf32>
    %11 = tpu.matmul %8, %10, %cst_10 {dimension_numbers = #tpu.dot_dimension_numbers<[1], [0], [0], [1], [0, 0, 1, 1], [], []>} : vector<32x32xbf16>, vector<32x32xbf16>, vector<32x32xf32> -> vector<32x32xf32>
    %12 = arith.addf %5, %11 : vector<32x32xf32>
    %c0_11 = arith.constant 0 : index
    %c2 = arith.constant 2 : index
    %c0_12 = arith.constant 0 : index
    %13 = tpu.strided_load %arg1[%c0_11, %c2, %c0_12] {strides = array<i32: 1, 2, 1>} : memref<1x66x32xf32, #tpu.memory_space<vmem>>, vector<1x32x32xf32>
    %14 = vector.shape_cast %13 : vector<1x32x32xf32> to vector<32x32xf32>
    %15 = arith.truncf %14 : vector<32x32xf32> to vector<32x32xbf16>
    %c2_13 = arith.constant 2 : index
    %c0_14 = arith.constant 0 : index
    %c0_15 = arith.constant 0 : index
    %16 = vector.load %arg2[%c2_13, %c0_14, %c0_15] : memref<3x32x32xbf16, #tpu.memory_space<vmem>>, vector<1x32x32xbf16>
    %17 = vector.shape_cast %16 : vector<1x32x32xbf16> to vector<32x32xbf16>
    %cst_16 = arith.constant dense<0.000000e+00> : vector<32x32xf32>
    %18 = tpu.matmul %15, %17, %cst_16 {dimension_numbers = #tpu.dot_dimension_numbers<[1], [0], [0], [1], [0, 0, 1, 1], [], []>} : vector<32x32xbf16>, vector<32x32xbf16>, vector<32x32xf32> -> vector<32x32xf32>
    %19 = arith.addf %12, %18 : vector<32x32xf32>
    %c0_17 = arith.constant 0 : index
    %c0_18 = arith.constant 0 : index
    %20 = vector.load %arg3[%c0_17, %c0_18] : memref<1x32xf32, #tpu.memory_space<vmem>>, vector<1x32xf32>
    %21 = vector.broadcast %20 : vector<1x32xf32> to vector<32x32xf32>
    %22 = arith.addf %19, %21 : vector<32x32xf32>
    %cst_19 = arith.constant 0.000000e+00 : f32
    %23 = vector.broadcast %cst_19 : f32 to vector<32x32xf32>
    %24 = arith.maximumf %22, %23 : vector<32x32xf32>
    %c0_20 = arith.constant 0 : index
    %c0_21 = arith.constant 0 : index
    %c0_22 = arith.constant 0 : index
    %25 = vector.load %arg4[%c0_20, %c0_21, %c0_22] : memref<1x32x32xf32, #tpu.memory_space<vmem>>, vector<1x32x32xf32>
    %26 = vector.shape_cast %25 : vector<1x32x32xf32> to vector<32x32xf32>
    %27 = vector.shape_cast %24 : vector<32x32xf32> to vector<1x32x32xf32>
    tpu.vector_store %arg4[%c0_20, %c0_21, %c0_22], %27 {strides = array<i32>} : memref<1x32x32xf32, #tpu.memory_space<vmem>>, vector<1x32x32xf32>,
    return
  }
  func.func @transform_0(%arg0: i32) -> (i32, i32, i32) {
    %c0_i32 = arith.constant 0 : i32
    %c0_i32_0 = arith.constant 0 : i32
    %c0_i32_1 = arith.constant 0 : i32
    return %arg0, %c0_i32, %c0_i32_0 : i32, i32, i32
  }
  func.func @transform_1(%arg0: i32) -> (i32, i32, i32) {
    %c0_i32 = arith.constant 0 : i32
    %c0_i32_0 = arith.constant 0 : i32
    %c0_i32_1 = arith.constant 0 : i32
    %c0_i32_2 = arith.constant 0 : i32
    return %c0_i32, %c0_i32_0, %c0_i32_1 : i32, i32, i32
  }
  func.func @transform_2(%arg0: i32) -> (i32, i32) {
    %c0_i32 = arith.constant 0 : i32
    %c0_i32_0 = arith.constant 0 : i32
    %c0_i32_1 = arith.constant 0 : i32
    return %c0_i32, %c0_i32_0 : i32, i32
  }
  func.func @transform_3(%arg0: i32) -> (i32, i32, i32) {
    %c0_i32 = arith.constant 0 : i32
    %c0_i32_0 = arith.constant 0 : i32
    %c0_i32_1 = arith.constant 0 : i32
    return %arg0, %c0_i32, %c0_i32_0 : i32, i32, i32
  }
}

module attributes {stable_mosaic.version = 11 : i64} {
  func.func @_conv_bn_relu_kernel(%arg0: i32, %arg1: memref<1x34x32xf32, #tpu.memory_space<vmem>>, %arg2: memref<3x32x32xbf16, #tpu.memory_space<vmem>>, %arg3: memref<1x32xf32, #tpu.memory_space<vmem>>, %arg4: memref<1x16x32xf32, #tpu.memory_space<vmem>>) attributes {dimension_semantics = [#tpu.dimension_semantics<parallel>], iteration_bounds = array<i64: 2>, scalar_prefetch = 0 : i64, scratch_operands = 0 : i64, tpu.core_type = #tpu.core_type<tc>, window_params = [{transform_indices = @transform_0, window_bounds = array<i64: 1, 34, 32>}, {pipeline_mode = #tpu.pipeline_mode<synchronous>, transform_indices = @transform_1, window_bounds = array<i64: 3, 32, 32>}, {pipeline_mode = #tpu.pipeline_mode<synchronous>, transform_indices = @transform_2, window_bounds = array<i64: 1, 32>}, {transform_indices = @transform_3, window_bounds = array<i64: 1, 16, 32>}]} {
    %c0 = arith.constant 0 : index
    %c0_0 = arith.constant 0 : index
    %c0_1 = arith.constant 0 : index
    %0 = tpu.strided_load %arg1[%c0, %c0_0, %c0_1] {strides = array<i32: 1, 2, 1>} : memref<1x34x32xf32, #tpu.memory_space<vmem>>, vector<1x16x32xf32>
    %1 = vector.shape_cast %0 : vector<1x16x32xf32> to vector<16x32xf32>
    %2 = arith.truncf %1 : vector<16x32xf32> to vector<16x32xbf16>
    %c0_2 = arith.constant 0 : index
    %c0_3 = arith.constant 0 : index
    %c0_4 = arith.constant 0 : index
    %3 = vector.load %arg2[%c0_2, %c0_3, %c0_4] : memref<3x32x32xbf16, #tpu.memory_space<vmem>>, vector<1x32x32xbf16>
    %4 = vector.shape_cast %3 : vector<1x32x32xbf16> to vector<32x32xbf16>
    %cst = arith.constant dense<0.000000e+00> : vector<16x32xf32>
    %5 = tpu.matmul %2, %4, %cst {dimension_numbers = #tpu.dot_dimension_numbers<[1], [0], [0], [1], [0, 0, 1, 1], [], []>} : vector<16x32xbf16>, vector<32x32xbf16>, vector<16x32xf32> -> vector<16x32xf32>
    %c0_5 = arith.constant 0 : index
    %c1 = arith.constant 1 : index
    %c0_6 = arith.constant 0 : index
    %6 = tpu.strided_load %arg1[%c0_5, %c1, %c0_6] {strides = array<i32: 1, 2, 1>} : memref<1x34x32xf32, #tpu.memory_space<vmem>>, vector<1x16x32xf32>
    %7 = vector.shape_cast %6 : vector<1x16x32xf32> to vector<16x32xf32>
    %8 = arith.truncf %7 : vector<16x32xf32> to vector<16x32xbf16>
    %c1_7 = arith.constant 1 : index
    %c0_8 = arith.constant 0 : index
    %c0_9 = arith.constant 0 : index
    %9 = vector.load %arg2[%c1_7, %c0_8, %c0_9] : memref<3x32x32xbf16, #tpu.memory_space<vmem>>, vector<1x32x32xbf16>
    %10 = vector.shape_cast %9 : vector<1x32x32xbf16> to vector<32x32xbf16>
    %cst_10 = arith.constant dense<0.000000e+00> : vector<16x32xf32>
    %11 = tpu.matmul %8, %10, %cst_10 {dimension_numbers = #tpu.dot_dimension_numbers<[1], [0], [0], [1], [0, 0, 1, 1], [], []>} : vector<16x32xbf16>, vector<32x32xbf16>, vector<16x32xf32> -> vector<16x32xf32>
    %12 = arith.addf %5, %11 : vector<16x32xf32>
    %c0_11 = arith.constant 0 : index
    %c2 = arith.constant 2 : index
    %c0_12 = arith.constant 0 : index
    %13 = tpu.strided_load %arg1[%c0_11, %c2, %c0_12] {strides = array<i32: 1, 2, 1>} : memref<1x34x32xf32, #tpu.memory_space<vmem>>, vector<1x16x32xf32>
    %14 = vector.shape_cast %13 : vector<1x16x32xf32> to vector<16x32xf32>
    %15 = arith.truncf %14 : vector<16x32xf32> to vector<16x32xbf16>
    %c2_13 = arith.constant 2 : index
    %c0_14 = arith.constant 0 : index
    %c0_15 = arith.constant 0 : index
    %16 = vector.load %arg2[%c2_13, %c0_14, %c0_15] : memref<3x32x32xbf16, #tpu.memory_space<vmem>>, vector<1x32x32xbf16>
    %17 = vector.shape_cast %16 : vector<1x32x32xbf16> to vector<32x32xbf16>
    %cst_16 = arith.constant dense<0.000000e+00> : vector<16x32xf32>
    %18 = tpu.matmul %15, %17, %cst_16 {dimension_numbers = #tpu.dot_dimension_numbers<[1], [0], [0], [1], [0, 0, 1, 1], [], []>} : vector<16x32xbf16>, vector<32x32xbf16>, vector<16x32xf32> -> vector<16x32xf32>
    %19 = arith.addf %12, %18 : vector<16x32xf32>
    %c0_17 = arith.constant 0 : index
    %c0_18 = arith.constant 0 : index
    %20 = vector.load %arg3[%c0_17, %c0_18] : memref<1x32xf32, #tpu.memory_space<vmem>>, vector<1x32xf32>
    %21 = vector.broadcast %20 : vector<1x32xf32> to vector<16x32xf32>
    %22 = arith.addf %19, %21 : vector<16x32xf32>
    %cst_19 = arith.constant 0.000000e+00 : f32
    %23 = vector.broadcast %cst_19 : f32 to vector<16x32xf32>
    %24 = arith.maximumf %22, %23 : vector<16x32xf32>
    %c0_20 = arith.constant 0 : index
    %c0_21 = arith.constant 0 : index
    %c0_22 = arith.constant 0 : index
    %25 = vector.load %arg4[%c0_20, %c0_21, %c0_22] : memref<1x16x32xf32, #tpu.memory_space<vmem>>, vector<1x16x32xf32>
    %26 = vector.shape_cast %25 : vector<1x16x32xf32> to vector<16x32xf32>
    %27 = vector.shape_cast %24 : vector<16x32xf32> to vector<1x16x32xf32>
    tpu.vector_store %arg4[%c0_20, %c0_21, %c0_22], %27 {strides = array<i32>} : memref<1x16x32xf32, #tpu.memory_space<vmem>>, vector<1x16x32xf32>,
    return
  }
  func.func @transform_0(%arg0: i32) -> (i32, i32, i32) {
    %c0_i32 = arith.constant 0 : i32
    %c0_i32_0 = arith.constant 0 : i32
    %c0_i32_1 = arith.constant 0 : i32
    return %arg0, %c0_i32, %c0_i32_0 : i32, i32, i32
  }
  func.func @transform_1(%arg0: i32) -> (i32, i32, i32) {
    %c0_i32 = arith.constant 0 : i32
    %c0_i32_0 = arith.constant 0 : i32
    %c0_i32_1 = arith.constant 0 : i32
    %c0_i32_2 = arith.constant 0 : i32
    return %c0_i32, %c0_i32_0, %c0_i32_1 : i32, i32, i32
  }
  func.func @transform_2(%arg0: i32) -> (i32, i32) {
    %c0_i32 = arith.constant 0 : i32
    %c0_i32_0 = arith.constant 0 : i32
    %c0_i32_1 = arith.constant 0 : i32
    return %c0_i32, %c0_i32_0 : i32, i32
  }
  func.func @transform_3(%arg0: i32) -> (i32, i32, i32) {
    %c0_i32 = arith.constant 0 : i32
    %c0_i32_0 = arith.constant 0 : i32
    %c0_i32_1 = arith.constant 0 : i32
    return %arg0, %c0_i32, %c0_i32_0 : i32, i32, i32
  }
}

module attributes {stable_mosaic.version = 11 : i64} {
  func.func @_conv_bn_relu_kernel(%arg0: i32, %arg1: memref<1x18x32xf32, #tpu.memory_space<vmem>>, %arg2: memref<3x32x32xbf16, #tpu.memory_space<vmem>>, %arg3: memref<1x32xf32, #tpu.memory_space<vmem>>, %arg4: memref<1x8x32xf32, #tpu.memory_space<vmem>>) attributes {dimension_semantics = [#tpu.dimension_semantics<parallel>], iteration_bounds = array<i64: 2>, scalar_prefetch = 0 : i64, scratch_operands = 0 : i64, tpu.core_type = #tpu.core_type<tc>, window_params = [{transform_indices = @transform_0, window_bounds = array<i64: 1, 18, 32>}, {pipeline_mode = #tpu.pipeline_mode<synchronous>, transform_indices = @transform_1, window_bounds = array<i64: 3, 32, 32>}, {pipeline_mode = #tpu.pipeline_mode<synchronous>, transform_indices = @transform_2, window_bounds = array<i64: 1, 32>}, {transform_indices = @transform_3, window_bounds = array<i64: 1, 8, 32>}]} {
    %c0 = arith.constant 0 : index
    %c0_0 = arith.constant 0 : index
    %c0_1 = arith.constant 0 : index
    %0 = tpu.strided_load %arg1[%c0, %c0_0, %c0_1] {strides = array<i32: 1, 2, 1>} : memref<1x18x32xf32, #tpu.memory_space<vmem>>, vector<1x8x32xf32>
    %1 = vector.shape_cast %0 : vector<1x8x32xf32> to vector<8x32xf32>
    %2 = arith.truncf %1 : vector<8x32xf32> to vector<8x32xbf16>
    %c0_2 = arith.constant 0 : index
    %c0_3 = arith.constant 0 : index
    %c0_4 = arith.constant 0 : index
    %3 = vector.load %arg2[%c0_2, %c0_3, %c0_4] : memref<3x32x32xbf16, #tpu.memory_space<vmem>>, vector<1x32x32xbf16>
    %4 = vector.shape_cast %3 : vector<1x32x32xbf16> to vector<32x32xbf16>
    %cst = arith.constant dense<0.000000e+00> : vector<8x32xf32>
    %5 = tpu.matmul %2, %4, %cst {dimension_numbers = #tpu.dot_dimension_numbers<[1], [0], [0], [1], [0, 0, 1, 1], [], []>} : vector<8x32xbf16>, vector<32x32xbf16>, vector<8x32xf32> -> vector<8x32xf32>
    %c0_5 = arith.constant 0 : index
    %c1 = arith.constant 1 : index
    %c0_6 = arith.constant 0 : index
    %6 = tpu.strided_load %arg1[%c0_5, %c1, %c0_6] {strides = array<i32: 1, 2, 1>} : memref<1x18x32xf32, #tpu.memory_space<vmem>>, vector<1x8x32xf32>
    %7 = vector.shape_cast %6 : vector<1x8x32xf32> to vector<8x32xf32>
    %8 = arith.truncf %7 : vector<8x32xf32> to vector<8x32xbf16>
    %c1_7 = arith.constant 1 : index
    %c0_8 = arith.constant 0 : index
    %c0_9 = arith.constant 0 : index
    %9 = vector.load %arg2[%c1_7, %c0_8, %c0_9] : memref<3x32x32xbf16, #tpu.memory_space<vmem>>, vector<1x32x32xbf16>
    %10 = vector.shape_cast %9 : vector<1x32x32xbf16> to vector<32x32xbf16>
    %cst_10 = arith.constant dense<0.000000e+00> : vector<8x32xf32>
    %11 = tpu.matmul %8, %10, %cst_10 {dimension_numbers = #tpu.dot_dimension_numbers<[1], [0], [0], [1], [0, 0, 1, 1], [], []>} : vector<8x32xbf16>, vector<32x32xbf16>, vector<8x32xf32> -> vector<8x32xf32>
    %12 = arith.addf %5, %11 : vector<8x32xf32>
    %c0_11 = arith.constant 0 : index
    %c2 = arith.constant 2 : index
    %c0_12 = arith.constant 0 : index
    %13 = tpu.strided_load %arg1[%c0_11, %c2, %c0_12] {strides = array<i32: 1, 2, 1>} : memref<1x18x32xf32, #tpu.memory_space<vmem>>, vector<1x8x32xf32>
    %14 = vector.shape_cast %13 : vector<1x8x32xf32> to vector<8x32xf32>
    %15 = arith.truncf %14 : vector<8x32xf32> to vector<8x32xbf16>
    %c2_13 = arith.constant 2 : index
    %c0_14 = arith.constant 0 : index
    %c0_15 = arith.constant 0 : index
    %16 = vector.load %arg2[%c2_13, %c0_14, %c0_15] : memref<3x32x32xbf16, #tpu.memory_space<vmem>>, vector<1x32x32xbf16>
    %17 = vector.shape_cast %16 : vector<1x32x32xbf16> to vector<32x32xbf16>
    %cst_16 = arith.constant dense<0.000000e+00> : vector<8x32xf32>
    %18 = tpu.matmul %15, %17, %cst_16 {dimension_numbers = #tpu.dot_dimension_numbers<[1], [0], [0], [1], [0, 0, 1, 1], [], []>} : vector<8x32xbf16>, vector<32x32xbf16>, vector<8x32xf32> -> vector<8x32xf32>
    %19 = arith.addf %12, %18 : vector<8x32xf32>
    %c0_17 = arith.constant 0 : index
    %c0_18 = arith.constant 0 : index
    %20 = vector.load %arg3[%c0_17, %c0_18] : memref<1x32xf32, #tpu.memory_space<vmem>>, vector<1x32xf32>
    %21 = vector.broadcast %20 : vector<1x32xf32> to vector<8x32xf32>
    %22 = arith.addf %19, %21 : vector<8x32xf32>
    %cst_19 = arith.constant 0.000000e+00 : f32
    %23 = vector.broadcast %cst_19 : f32 to vector<8x32xf32>
    %24 = arith.maximumf %22, %23 : vector<8x32xf32>
    %c0_20 = arith.constant 0 : index
    %c0_21 = arith.constant 0 : index
    %c0_22 = arith.constant 0 : index
    %25 = vector.load %arg4[%c0_20, %c0_21, %c0_22] : memref<1x8x32xf32, #tpu.memory_space<vmem>>, vector<1x8x32xf32>
    %26 = vector.shape_cast %25 : vector<1x8x32xf32> to vector<8x32xf32>
    %27 = vector.shape_cast %24 : vector<8x32xf32> to vector<1x8x32xf32>
    tpu.vector_store %arg4[%c0_20, %c0_21, %c0_22], %27 {strides = array<i32>} : memref<1x8x32xf32, #tpu.memory_space<vmem>>, vector<1x8x32xf32>,
    return
  }
  func.func @transform_0(%arg0: i32) -> (i32, i32, i32) {
    %c0_i32 = arith.constant 0 : i32
    %c0_i32_0 = arith.constant 0 : i32
    %c0_i32_1 = arith.constant 0 : i32
    return %arg0, %c0_i32, %c0_i32_0 : i32, i32, i32
  }
  func.func @transform_1(%arg0: i32) -> (i32, i32, i32) {
    %c0_i32 = arith.constant 0 : i32
    %c0_i32_0 = arith.constant 0 : i32
    %c0_i32_1 = arith.constant 0 : i32
    %c0_i32_2 = arith.constant 0 : i32
    return %c0_i32, %c0_i32_0, %c0_i32_1 : i32, i32, i32
  }
  func.func @transform_2(%arg0: i32) -> (i32, i32) {
    %c0_i32 = arith.constant 0 : i32
    %c0_i32_0 = arith.constant 0 : i32
    %c0_i32_1 = arith.constant 0 : i32
    return %c0_i32, %c0_i32_0 : i32, i32
  }
  func.func @transform_3(%arg0: i32) -> (i32, i32, i32) {
    %c0_i32 = arith.constant 0 : i32
    %c0_i32_0 = arith.constant 0 : i32
    %c0_i32_1 = arith.constant 0 : i32
    return %arg0, %c0_i32, %c0_i32_0 : i32, i32, i32
  }
}

module attributes {stable_mosaic.version = 11 : i64} {
  func.func @_ln_qkv_kernel(%arg0: i32, %arg1: memref<16x32xf32, #tpu.memory_space<vmem>>, %arg2: memref<1x32xf32, #tpu.memory_space<vmem>>, %arg3: memref<1x32xf32, #tpu.memory_space<vmem>>, %arg4: memref<32x32xbf16, #tpu.memory_space<vmem>>, %arg5: memref<32x32xbf16, #tpu.memory_space<vmem>>, %arg6: memref<32x32xbf16, #tpu.memory_space<vmem>>, %arg7: memref<1x32xf32, #tpu.memory_space<vmem>>, %arg8: memref<1x32xf32, #tpu.memory_space<vmem>>, %arg9: memref<1x32xf32, #tpu.memory_space<vmem>>, %arg10: memref<16x32xbf16, #tpu.memory_space<vmem>>, %arg11: memref<16x32xbf16, #tpu.memory_space<vmem>>, %arg12: memref<16x32xbf16, #tpu.memory_space<vmem>>) attributes {dimension_semantics = [#tpu.dimension_semantics<parallel>], iteration_bounds = array<i64: 1>, scalar_prefetch = 0 : i64, scratch_operands = 0 : i64, tpu.core_type = #tpu.core_type<tc>, window_params = [{transform_indices = @transform_0, window_bounds = array<i64: 16, 32>}, {pipeline_mode = #tpu.pipeline_mode<synchronous>, transform_indices = @transform_1, window_bounds = array<i64: 1, 32>}, {pipeline_mode = #tpu.pipeline_mode<synchronous>, transform_indices = @transform_2, window_bounds = array<i64: 1, 32>}, {pipeline_mode = #tpu.pipeline_mode<synchronous>, transform_indices = @transform_3, window_bounds = array<i64: 32, 32>}, {pipeline_mode = #tpu.pipeline_mode<synchronous>, transform_indices = @transform_4, window_bounds = array<i64: 32, 32>}, {pipeline_mode = #tpu.pipeline_mode<synchronous>, transform_indices = @transform_5, window_bounds = array<i64: 32, 32>}, {pipeline_mode = #tpu.pipeline_mode<synchronous>, transform_indices = @transform_6, window_bounds = array<i64: 1, 32>}, {pipeline_mode = #tpu.pipeline_mode<synchronous>, transform_indices = @transform_7, window_bounds = array<i64: 1, 32>}, {pipeline_mode = #tpu.pipeline_mode<synchronous>, transform_indices = @transform_8, window_bounds = array<i64: 1, 32>}, {transform_indices = @transform_9, window_bounds = array<i64: 16, 32>}, {transform_indices = @transform_10, window_bounds = array<i64: 16, 32>}, {transform_indices = @transform_11, window_bounds = array<i64: 16, 32>}]} {
    %c0 = arith.constant 0 : index
    %c0_0 = arith.constant 0 : index
    %0 = vector.load %arg1[%c0, %c0_0] : memref<16x32xf32, #tpu.memory_space<vmem>>, vector<16x32xf32>
    %c0_1 = arith.constant 0 : index
    %c0_2 = arith.constant 0 : index
    %1 = vector.load %arg2[%c0_1, %c0_2] : memref<1x32xf32, #tpu.memory_space<vmem>>, vector<1x32xf32>
    %c0_3 = arith.constant 0 : index
    %c0_4 = arith.constant 0 : index
    %2 = vector.load %arg3[%c0_3, %c0_4] : memref<1x32xf32, #tpu.memory_space<vmem>>, vector<1x32xf32>
    %cst = arith.constant dense<0.000000e+00> : vector<16xf32>
    %3 = vector.multi_reduction <add>, %0, %cst [1] : vector<16x32xf32> to vector<16xf32>
    %4 = vector.shape_cast %3 : vector<16xf32> to vector<16x1xf32>
    %cst_5 = arith.constant 3.200000e+01 : f32
    %5 = vector.broadcast %cst_5 : f32 to vector<16x1xf32>
    %6 = arith.divf %4, %5 : vector<16x1xf32>
    %7 = vector.broadcast %6 : vector<16x1xf32> to vector<16x32xf32>
    %8 = arith.subf %0, %7 : vector<16x32xf32>
    %9 = arith.mulf %8, %8 : vector<16x32xf32>
    %cst_6 = arith.constant dense<0.000000e+00> : vector<16xf32>
    %10 = vector.multi_reduction <add>, %9, %cst_6 [1] : vector<16x32xf32> to vector<16xf32>
    %11 = vector.shape_cast %10 : vector<16xf32> to vector<16x1xf32>
    %cst_7 = arith.constant 0.0322580636 : f32
    %12 = vector.broadcast %cst_7 : f32 to vector<16x1xf32>
    %13 = arith.mulf %11, %12 : vector<16x1xf32>
    %14 = math.sqrt %13 : vector<16x1xf32>
    %15 = vector.broadcast %1 : vector<1x32xf32> to vector<16x32xf32>
    %16 = arith.mulf %15, %8 : vector<16x32xf32>
    %cst_8 = arith.constant 1.000000e-07 : f32
    %17 = vector.broadcast %cst_8 : f32 to vector<16x1xf32>
    %18 = arith.addf %14, %17 : vector<16x1xf32>
    %19 = tpu.reciprocal %18 : vector<16x1xf32> -> vector<16x1xf32>
    %20 = vector.broadcast %19 : vector<16x1xf32> to vector<16x32xf32>
    %21 = arith.mulf %16, %20 : vector<16x32xf32>
    %22 = vector.broadcast %2 : vector<1x32xf32> to vector<16x32xf32>
    %23 = arith.addf %21, %22 : vector<16x32xf32>
    %24 = arith.truncf %23 : vector<16x32xf32> to vector<16x32xbf16>
    %c0_9 = arith.constant 0 : index
    %c0_10 = arith.constant 0 : index
    %25 = vector.load %arg4[%c0_9, %c0_10] : memref<32x32xbf16, #tpu.memory_space<vmem>>, vector<32x32xbf16>
    %cst_11 = arith.constant dense<0.000000e+00> : vector<16x32xf32>
    %26 = tpu.matmul %24, %25, %cst_11 {dimension_numbers = #tpu.dot_dimension_numbers<[1], [0], [0], [1], [0, 0, 1, 1], [], []>} : vector<16x32xbf16>, vector<32x32xbf16>, vector<16x32xf32> -> vector<16x32xf32>
    %c0_12 = arith.constant 0 : index
    %c0_13 = arith.constant 0 : index
    %27 = vector.load %arg7[%c0_12, %c0_13] : memref<1x32xf32, #tpu.memory_space<vmem>>, vector<1x32xf32>
    %28 = vector.broadcast %27 : vector<1x32xf32> to vector<16x32xf32>
    %29 = arith.addf %26, %28 : vector<16x32xf32>
    %30 = arith.truncf %29 : vector<16x32xf32> to vector<16x32xbf16>
    %c0_14 = arith.constant 0 : index
    %c0_15 = arith.constant 0 : index
    %31 = vector.load %arg10[%c0_14, %c0_15] : memref<16x32xbf16, #tpu.memory_space<vmem>>, vector<16x32xbf16>
    tpu.vector_store %arg10[%c0_14, %c0_15], %30 {strides = array<i32>} : memref<16x32xbf16, #tpu.memory_space<vmem>>, vector<16x32xbf16>,
    %c0_16 = arith.constant 0 : index
    %c0_17 = arith.constant 0 : index
    %32 = vector.load %arg5[%c0_16, %c0_17] : memref<32x32xbf16, #tpu.memory_space<vmem>>, vector<32x32xbf16>
    %cst_18 = arith.constant dense<0.000000e+00> : vector<16x32xf32>
    %33 = tpu.matmul %24, %32, %cst_18 {dimension_numbers = #tpu.dot_dimension_numbers<[1], [0], [0], [1], [0, 0, 1, 1], [], []>} : vector<16x32xbf16>, vector<32x32xbf16>, vector<16x32xf32> -> vector<16x32xf32>
    %c0_19 = arith.constant 0 : index
    %c0_20 = arith.constant 0 : index
    %34 = vector.load %arg8[%c0_19, %c0_20] : memref<1x32xf32, #tpu.memory_space<vmem>>, vector<1x32xf32>
    %35 = vector.broadcast %34 : vector<1x32xf32> to vector<16x32xf32>
    %36 = arith.addf %33, %35 : vector<16x32xf32>
    %37 = arith.truncf %36 : vector<16x32xf32> to vector<16x32xbf16>
    %c0_21 = arith.constant 0 : index
    %c0_22 = arith.constant 0 : index
    %38 = vector.load %arg11[%c0_21, %c0_22] : memref<16x32xbf16, #tpu.memory_space<vmem>>, vector<16x32xbf16>
    tpu.vector_store %arg11[%c0_21, %c0_22], %37 {strides = array<i32>} : memref<16x32xbf16, #tpu.memory_space<vmem>>, vector<16x32xbf16>,
    %c0_23 = arith.constant 0 : index
    %c0_24 = arith.constant 0 : index
    %39 = vector.load %arg6[%c0_23, %c0_24] : memref<32x32xbf16, #tpu.memory_space<vmem>>, vector<32x32xbf16>
    %cst_25 = arith.constant dense<0.000000e+00> : vector<16x32xf32>
    %40 = tpu.matmul %24, %39, %cst_25 {dimension_numbers = #tpu.dot_dimension_numbers<[1], [0], [0], [1], [0, 0, 1, 1], [], []>} : vector<16x32xbf16>, vector<32x32xbf16>, vector<16x32xf32> -> vector<16x32xf32>
    %c0_26 = arith.constant 0 : index
    %c0_27 = arith.constant 0 : index
    %41 = vector.load %arg9[%c0_26, %c0_27] : memref<1x32xf32, #tpu.memory_space<vmem>>, vector<1x32xf32>
    %42 = vector.broadcast %41 : vector<1x32xf32> to vector<16x32xf32>
    %43 = arith.addf %40, %42 : vector<16x32xf32>
    %44 = arith.truncf %43 : vector<16x32xf32> to vector<16x32xbf16>
    %c0_28 = arith.constant 0 : index
    %c0_29 = arith.constant 0 : index
    %45 = vector.load %arg12[%c0_28, %c0_29] : memref<16x32xbf16, #tpu.memory_space<vmem>>, vector<16x32xbf16>
    tpu.vector_store %arg12[%c0_28, %c0_29], %44 {strides = array<i32>} : memref<16x32xbf16, #tpu.memory_space<vmem>>, vector<16x32xbf16>,
    return
  }
  func.func @transform_0(%arg0: i32) -> (i32, i32) {
    %c0_i32 = arith.constant 0 : i32
    %c0_i32_0 = arith.constant 0 : i32
    return %arg0, %c0_i32 : i32, i32
  }
  func.func @transform_1(%arg0: i32) -> (i32, i32) {
    %c0_i32 = arith.constant 0 : i32
    %c0_i32_0 = arith.constant 0 : i32
    %c0_i32_1 = arith.constant 0 : i32
    return %c0_i32, %c0_i32_0 : i32, i32
  }
  func.func @transform_2(%arg0: i32) -> (i32, i32) {
    %c0_i32 = arith.constant 0 : i32
    %c0_i32_0 = arith.constant 0 : i32
    %c0_i32_1 = arith.constant 0 : i32
    return %c0_i32, %c0_i32_0 : i32, i32
  }
  func.func @transform_3(%arg0: i32) -> (i32, i32) {
    %c0_i32 = arith.constant 0 : i32
    %c0_i32_0 = arith.constant 0 : i32
    %c0_i32_1 = arith.constant 0 : i32
    return %c0_i32, %c0_i32_0 : i32, i32
  }
  func.func @transform_4(%arg0: i32) -> (i32, i32) {
    %c0_i32 = arith.constant 0 : i32
    %c0_i32_0 = arith.constant 0 : i32
    %c0_i32_1 = arith.constant 0 : i32
    return %c0_i32, %c0_i32_0 : i32, i32
  }
  func.func @transform_5(%arg0: i32) -> (i32, i32) {
    %c0_i32 = arith.constant 0 : i32
    %c0_i32_0 = arith.constant 0 : i32
    %c0_i32_1 = arith.constant 0 : i32
    return %c0_i32, %c0_i32_0 : i32, i32
  }
  func.func @transform_6(%arg0: i32) -> (i32, i32) {
    %c0_i32 = arith.constant 0 : i32
    %c0_i32_0 = arith.constant 0 : i32
    %c0_i32_1 = arith.constant 0 : i32
    return %c0_i32, %c0_i32_0 : i32, i32
  }
  func.func @transform_7(%arg0: i32) -> (i32, i32) {
    %c0_i32 = arith.constant 0 : i32
    %c0_i32_0 = arith.constant 0 : i32
    %c0_i32_1 = arith.constant 0 : i32
    return %c0_i32, %c0_i32_0 : i32, i32
  }
  func.func @transform_8(%arg0: i32) -> (i32, i32) {
    %c0_i32 = arith.constant 0 : i32
    %c0_i32_0 = arith.constant 0 : i32
    %c0_i32_1 = arith.constant 0 : i32
    return %c0_i32, %c0_i32_0 : i32, i32
  }
  func.func @transform_9(%arg0: i32) -> (i32, i32) {
    %c0_i32 = arith.constant 0 : i32
    %c0_i32_0 = arith.constant 0 : i32
    return %arg0, %c0_i32 : i32, i32
  }
  func.func @transform_10(%arg0: i32) -> (i32, i32) {
    %c0_i32 = arith.constant 0 : i32
    %c0_i32_0 = arith.constant 0 : i32
    return %arg0, %c0_i32 : i32, i32
  }
  func.func @transform_11(%arg0: i32) -> (i32, i32) {
    %c0_i32 = arith.constant 0 : i32
    %c0_i32_0 = arith.constant 0 : i32
    return %arg0, %c0_i32 : i32, i32
  }
}

module attributes {stable_mosaic.version = 11 : i64} {
  func.func @_flash_attn_kernel(%arg0: i32, %arg1: i32, %arg2: memref<4x8x8xbf16, #tpu.memory_space<vmem>>, %arg3: memref<4x8x8xbf16, #tpu.memory_space<vmem>>, %arg4: memref<4x8x8xbf16, #tpu.memory_space<vmem>>, %arg5: memref<4x8x8xbf16, #tpu.memory_space<vmem>>, %arg6: memref<4x8x1xf32, #tpu.memory_space<vmem>>, %arg7: memref<4x8x1xf32, #tpu.memory_space<vmem>>, %arg8: memref<4x8x8xf32, #tpu.memory_space<vmem>>) attributes {dimension_semantics = [#tpu.dimension_semantics<parallel>, #tpu.dimension_semantics<arbitrary>], iteration_bounds = array<i64: 2, 1>, scalar_prefetch = 0 : i64, scratch_operands = 3 : i64, tpu.core_type = #tpu.core_type<tc>, window_params = [{transform_indices = @transform_0, window_bounds = array<i64: 4, 8, 8>}, {transform_indices = @transform_1, window_bounds = array<i64: 4, 8, 8>}, {transform_indices = @transform_2, window_bounds = array<i64: 4, 8, 8>}, {transform_indices = @transform_3, window_bounds = array<i64: 4, 8, 8>}]} {
    %c0_i32 = arith.constant 0 : i32
    %0 = arith.cmpi eq, %arg1, %c0_i32 : i32
    %1 = arith.extui %0 : i1 to i32
    %c0_i32_0 = arith.constant 0 : i32
    %2 = arith.cmpi ne, %1, %c0_i32_0 : i32
    scf.if %2 {
      %cst_36 = arith.constant 0xFF800000 : f32
      %36 = vector.broadcast %cst_36 : f32 to vector<4x8x1xf32>
      %c0_37 = arith.constant 0 : index
      %c0_38 = arith.constant 0 : index
      %c0_39 = arith.constant 0 : index
      %37 = vector.load %arg6[%c0_37, %c0_38, %c0_39] : memref<4x8x1xf32, #tpu.memory_space<vmem>>, vector<4x8x1xf32>
      tpu.vector_store %arg6[%c0_37, %c0_38, %c0_39], %36 {strides = array<i32>} : memref<4x8x1xf32, #tpu.memory_space<vmem>>, vector<4x8x1xf32>,
      %cst_40 = arith.constant 0.000000e+00 : f32
      %38 = vector.broadcast %cst_40 : f32 to vector<4x8x1xf32>
      %c0_41 = arith.constant 0 : index
      %c0_42 = arith.constant 0 : index
      %c0_43 = arith.constant 0 : index
      %39 = vector.load %arg7[%c0_41, %c0_42, %c0_43] : memref<4x8x1xf32, #tpu.memory_space<vmem>>, vector<4x8x1xf32>
      tpu.vector_store %arg7[%c0_41, %c0_42, %c0_43], %38 {strides = array<i32>} : memref<4x8x1xf32, #tpu.memory_space<vmem>>, vector<4x8x1xf32>,
      %cst_44 = arith.constant 0.000000e+00 : f32
      %40 = vector.broadcast %cst_44 : f32 to vector<4x8x8xf32>
      %c0_45 = arith.constant 0 : index
      %c0_46 = arith.constant 0 : index
      %c0_47 = arith.constant 0 : index
      %41 = vector.load %arg8[%c0_45, %c0_46, %c0_47] : memref<4x8x8xf32, #tpu.memory_space<vmem>>, vector<4x8x8xf32>
      tpu.vector_store %arg8[%c0_45, %c0_46, %c0_47], %40 {strides = array<i32>} : memref<4x8x8xf32, #tpu.memory_space<vmem>>, vector<4x8x8xf32>,
    } else {
    }
    %c0 = arith.constant 0 : index
    %c0_1 = arith.constant 0 : index
    %c0_2 = arith.constant 0 : index
    %3 = vector.load %arg2[%c0, %c0_1, %c0_2] : memref<4x8x8xbf16, #tpu.memory_space<vmem>>, vector<4x8x8xbf16>
    %c0_3 = arith.constant 0 : index
    %c0_4 = arith.constant 0 : index
    %c0_5 = arith.constant 0 : index
    %4 = vector.load %arg3[%c0_3, %c0_4, %c0_5] : memref<4x8x8xbf16, #tpu.memory_space<vmem>>, vector<4x8x8xbf16>
    "tpu.trace_start"() <{level = 10 : i32, message = "hqd,hkd->hqk"}> : () -> ()
    %cst = arith.constant dense<0.000000e+00> : vector<4x8x8xf32>
    %5 = tpu.matmul %3, %4, %cst {dimension_numbers = #tpu.dot_dimension_numbers<[2], [2], [1], [1], [0, 0, 0, 1, 1, 1], [0], [0]>} : vector<4x8x8xbf16>, vector<4x8x8xbf16>, vector<4x8x8xf32> -> vector<4x8x8xf32>
    "tpu.trace_stop"() : () -> ()
    %cst_6 = arith.constant 0.353553385 : f32
    %6 = vector.broadcast %cst_6 : f32 to vector<4x8x8xf32>
    %7 = arith.mulf %5, %6 : vector<4x8x8xf32>
    %c0_7 = arith.constant 0 : index
    %c0_8 = arith.constant 0 : index
    %c0_9 = arith.constant 0 : index
    %8 = vector.load %arg6[%c0_7, %c0_8, %c0_9] : memref<4x8x1xf32, #tpu.memory_space<vmem>>, vector<4x8x1xf32>
    %cst_10 = arith.constant dense<0xFF800000> : vector<4x8xf32>
    %9 = vector.multi_reduction <maximumf>, %7, %cst_10 [2] : vector<4x8x8xf32> to vector<4x8xf32>
    %10 = vector.shape_cast %9 : vector<4x8xf32> to vector<4x8x1xf32>
    %11 = arith.maximumf %8, %10 : vector<4x8x1xf32>
    %c0_11 = arith.constant 0 : index
    %c0_12 = arith.constant 0 : index
    %c0_13 = arith.constant 0 : index
    %12 = vector.load %arg6[%c0_11, %c0_12, %c0_13] : memref<4x8x1xf32, #tpu.memory_space<vmem>>, vector<4x8x1xf32>
    %13 = arith.subf %12, %11 : vector<4x8x1xf32>
    %14 = math.exp %13 : vector<4x8x1xf32>
    %15 = vector.broadcast %11 : vector<4x8x1xf32> to vector<4x8x8xf32>
    %16 = arith.subf %7, %15 : vector<4x8x8xf32>
    %17 = math.exp %16 : vector<4x8x8xf32>
    %c0_14 = arith.constant 0 : index
    %c0_15 = arith.constant 0 : index
    %c0_16 = arith.constant 0 : index
    %18 = vector.load %arg7[%c0_14, %c0_15, %c0_16] : memref<4x8x1xf32, #tpu.memory_space<vmem>>, vector<4x8x1xf32>
    %19 = arith.mulf %14, %18 : vector<4x8x1xf32>
    %cst_17 = arith.constant dense<0.000000e+00> : vector<4x8xf32>
    %20 = vector.multi_reduction <add>, %17, %cst_17 [2] : vector<4x8x8xf32> to vector<4x8xf32>
    %21 = vector.shape_cast %20 : vector<4x8xf32> to vector<4x8x1xf32>
    %22 = arith.addf %19, %21 : vector<4x8x1xf32>
    %c0_18 = arith.constant 0 : index
    %c0_19 = arith.constant 0 : index
    %c0_20 = arith.constant 0 : index
    %23 = vector.load %arg7[%c0_18, %c0_19, %c0_20] : memref<4x8x1xf32, #tpu.memory_space<vmem>>, vector<4x8x1xf32>
    tpu.vector_store %arg7[%c0_18, %c0_19, %c0_20], %22 {strides = array<i32>} : memref<4x8x1xf32, #tpu.memory_space<vmem>>, vector<4x8x1xf32>,
    %c0_21 = arith.constant 0 : index
    %c0_22 = arith.constant 0 : index
    %c0_23 = arith.constant 0 : index
    %24 = vector.load %arg8[%c0_21, %c0_22, %c0_23] : memref<4x8x8xf32, #tpu.memory_space<vmem>>, vector<4x8x8xf32>
    %25 = vector.broadcast %14 : vector<4x8x1xf32> to vector<4x8x8xf32>
    %26 = arith.mulf %25, %24 : vector<4x8x8xf32>
    %27 = arith.truncf %17 : vector<4x8x8xf32> to vector<4x8x8xbf16>
    %c0_24 = arith.constant 0 : index
    %c0_25 = arith.constant 0 : index
    %c0_26 = arith.constant 0 : index
    %28 = vector.load %arg4[%c0_24, %c0_25, %c0_26] : memref<4x8x8xbf16, #tpu.memory_space<vmem>>, vector<4x8x8xbf16>
    "tpu.trace_start"() <{level = 10 : i32, message = "hqk,hkd->hqd"}> : () -> ()
    %cst_27 = arith.constant dense<0.000000e+00> : vector<4x8x8xf32>
    %29 = tpu.matmul %27, %28, %cst_27 {dimension_numbers = #tpu.dot_dimension_numbers<[2], [1], [1], [2], [0, 0, 0, 1, 1, 2], [0], [0]>} : vector<4x8x8xbf16>, vector<4x8x8xbf16>, vector<4x8x8xf32> -> vector<4x8x8xf32>
    "tpu.trace_stop"() : () -> ()
    %30 = arith.addf %26, %29 : vector<4x8x8xf32>
    %c0_28 = arith.constant 0 : index
    %c0_29 = arith.constant 0 : index
    %c0_30 = arith.constant 0 : index
    %31 = vector.load %arg8[%c0_28, %c0_29, %c0_30] : memref<4x8x8xf32, #tpu.memory_space<vmem>>, vector<4x8x8xf32>
    tpu.vector_store %arg8[%c0_28, %c0_29, %c0_30], %30 {strides = array<i32>} : memref<4x8x8xf32, #tpu.memory_space<vmem>>, vector<4x8x8xf32>,
    %c0_31 = arith.constant 0 : index
    %c0_32 = arith.constant 0 : index
    %c0_33 = arith.constant 0 : index
    %32 = vector.load %arg6[%c0_31, %c0_32, %c0_33] : memref<4x8x1xf32, #tpu.memory_space<vmem>>, vector<4x8x1xf32>
    tpu.vector_store %arg6[%c0_31, %c0_32, %c0_33], %11 {strides = array<i32>} : memref<4x8x1xf32, #tpu.memory_space<vmem>>, vector<4x8x1xf32>,
    %c0_i32_34 = arith.constant 0 : i32
    %33 = arith.cmpi eq, %arg1, %c0_i32_34 : i32
    %34 = arith.extui %33 : i1 to i32
    %c0_i32_35 = arith.constant 0 : i32
    %35 = arith.cmpi ne, %34, %c0_i32_35 : i32
    scf.if %35 {
      %c0_36 = arith.constant 0 : index
      %c0_37 = arith.constant 0 : index
      %c0_38 = arith.constant 0 : index
      %36 = vector.load %arg8[%c0_36, %c0_37, %c0_38] : memref<4x8x8xf32, #tpu.memory_space<vmem>>, vector<4x8x8xf32>
      %c0_39 = arith.constant 0 : index
      %c0_40 = arith.constant 0 : index
      %c0_41 = arith.constant 0 : index
      %37 = vector.load %arg7[%c0_39, %c0_40, %c0_41] : memref<4x8x1xf32, #tpu.memory_space<vmem>>, vector<4x8x1xf32>
      %38 = tpu.reciprocal %37 {approx = true} : vector<4x8x1xf32> -> vector<4x8x1xf32>
      %39 = vector.broadcast %38 : vector<4x8x1xf32> to vector<4x8x8xf32>
      %40 = arith.mulf %36, %39 : vector<4x8x8xf32>
      %41 = arith.truncf %40 : vector<4x8x8xf32> to vector<4x8x8xbf16>
      %c0_42 = arith.constant 0 : index
      %c0_43 = arith.constant 0 : index
      %c0_44 = arith.constant 0 : index
      %42 = vector.load %arg5[%c0_42, %c0_43, %c0_44] : memref<4x8x8xbf16, #tpu.memory_space<vmem>>, vector<4x8x8xbf16>
      tpu.vector_store %arg5[%c0_42, %c0_43, %c0_44], %41 {strides = array<i32>} : memref<4x8x8xbf16, #tpu.memory_space<vmem>>, vector<4x8x8xbf16>,
    } else {
    }
    return
  }
  func.func @transform_0(%arg0: i32, %arg1: i32) -> (i32, i32, i32) {
    %c0_i32 = arith.constant 0 : i32
    %c0_i32_0 = arith.constant 0 : i32
    %c0_i32_1 = arith.constant 0 : i32
    return %arg0, %c0_i32, %c0_i32_0 : i32, i32, i32
  }
  func.func @transform_1(%arg0: i32, %arg1: i32) -> (i32, i32, i32) {
    %c0_i32 = arith.constant 0 : i32
    %c0_i32_0 = arith.constant 0 : i32
    return %arg0, %arg1, %c0_i32 : i32, i32, i32
  }
  func.func @transform_2(%arg0: i32, %arg1: i32) -> (i32, i32, i32) {
    %c0_i32 = arith.constant 0 : i32
    %c0_i32_0 = arith.constant 0 : i32
    return %arg0, %arg1, %c0_i32 : i32, i32, i32
  }
  func.func @transform_3(%arg0: i32, %arg1: i32) -> (i32, i32, i32) {
    %c0_i32 = arith.constant 0 : i32
    %c0_i32_0 = arith.constant 0 : i32
    %c0_i32_1 = arith.constant 0 : i32
    return %arg0, %c0_i32, %c0_i32_0 : i32, i32, i32
  }
}

module attributes {stable_mosaic.version = 11 : i64} {
  func.func @_attn_out_ffn_kernel(%arg0: i32, %arg1: i32, %arg2: memref<16x32xbf16, #tpu.memory_space<vmem>>, %arg3: memref<16x32xf32, #tpu.memory_space<vmem>>, %arg4: memref<32x32xbf16, #tpu.memory_space<vmem>>, %arg5: memref<1x32xf32, #tpu.memory_space<vmem>>, %arg6: memref<1x32xf32, #tpu.memory_space<vmem>>, %arg7: memref<1x32xf32, #tpu.memory_space<vmem>>, %arg8: memref<32x64xbf16, #tpu.memory_space<vmem>>, %arg9: memref<1x64xf32, #tpu.memory_space<vmem>>, %arg10: memref<64x32xbf16, #tpu.memory_space<vmem>>, %arg11: memref<1x32xf32, #tpu.memory_space<vmem>>, %arg12: memref<16x32xf32, #tpu.memory_space<vmem>>, %arg13: memref<16x32xf32, #tpu.memory_space<vmem>>, %arg14: memref<16x32xbf16, #tpu.memory_space<vmem>>, %arg15: memref<16x32xf32, #tpu.memory_space<vmem>>) attributes {dimension_semantics = [#tpu.dimension_semantics<parallel>, #tpu.dimension_semantics<arbitrary>], iteration_bounds = array<i64: 1, 1>, scalar_prefetch = 0 : i64, scratch_operands = 3 : i64, tpu.core_type = #tpu.core_type<tc>, window_params = [{transform_indices = @transform_0, window_bounds = array<i64: 16, 32>}, {transform_indices = @transform_1, window_bounds = array<i64: 16, 32>}, {pipeline_mode = #tpu.pipeline_mode<synchronous>, transform_indices = @transform_2, window_bounds = array<i64: 32, 32>}, {pipeline_mode = #tpu.pipeline_mode<synchronous>, transform_indices = @transform_3, window_bounds = array<i64: 1, 32>}, {pipeline_mode = #tpu.pipeline_mode<synchronous>, transform_indices = @transform_4, window_bounds = array<i64: 1, 32>}, {pipeline_mode = #tpu.pipeline_mode<synchronous>, transform_indices = @transform_5, window_bounds = array<i64: 1, 32>}, {transform_indices = @transform_6, window_bounds = array<i64: 32, 64>}, {transform_indices = @transform_7, window_bounds = array<i64: 1, 64>}, {transform_indices = @transform_8, window_bounds = array<i64: 64, 32>}, {pipeline_mode = #tpu.pipeline_mode<synchronous>, transform_indices = @transform_9, window_bounds = array<i64: 1, 32>}, {transform_indices = @transform_10, window_bounds = array<i64: 16, 32>}]} {
    %c0_i32 = arith.constant 0 : i32
    %0 = arith.cmpi eq, %arg1, %c0_i32 : i32
    %1 = arith.extui %0 : i1 to i32
    %c0_i32_0 = arith.constant 0 : i32
    %2 = arith.cmpi ne, %1, %c0_i32_0 : i32
    scf.if %2 {
      %c0_16 = arith.constant 0 : index
      %c0_17 = arith.constant 0 : index
      %20 = vector.load %arg2[%c0_16, %c0_17] : memref<16x32xbf16, #tpu.memory_space<vmem>>, vector<16x32xbf16>
      %c0_18 = arith.constant 0 : index
      %c0_19 = arith.constant 0 : index
      %21 = vector.load %arg4[%c0_18, %c0_19] : memref<32x32xbf16, #tpu.memory_space<vmem>>, vector<32x32xbf16>
      %cst_20 = arith.constant dense<0.000000e+00> : vector<16x32xf32>
      %22 = tpu.matmul %20, %21, %cst_20 {dimension_numbers = #tpu.dot_dimension_numbers<[1], [0], [0], [1], [0, 0, 1, 1], [], []>} : vector<16x32xbf16>, vector<32x32xbf16>, vector<16x32xf32> -> vector<16x32xf32>
      %c0_21 = arith.constant 0 : index
      %c0_22 = arith.constant 0 : index
      %23 = vector.load %arg5[%c0_21, %c0_22] : memref<1x32xf32, #tpu.memory_space<vmem>>, vector<1x32xf32>
      %24 = vector.broadcast %23 : vector<1x32xf32> to vector<16x32xf32>
      %25 = arith.addf %22, %24 : vector<16x32xf32>
      %c0_23 = arith.constant 0 : index
      %c0_24 = arith.constant 0 : index
      %26 = vector.load %arg3[%c0_23, %c0_24] : memref<16x32xf32, #tpu.memory_space<vmem>>, vector<16x32xf32>
      %27 = arith.addf %26, %25 : vector<16x32xf32>
      %c0_25 = arith.constant 0 : index
      %c0_26 = arith.constant 0 : index
      %28 = vector.load %arg13[%c0_25, %c0_26] : memref<16x32xf32, #tpu.memory_space<vmem>>, vector<16x32xf32>
      tpu.vector_store %arg13[%c0_25, %c0_26], %27 {strides = array<i32>} : memref<16x32xf32, #tpu.memory_space<vmem>>, vector<16x32xf32>,
      %c0_27 = arith.constant 0 : index
      %c0_28 = arith.constant 0 : index
      %29 = vector.load %arg6[%c0_27, %c0_28] : memref<1x32xf32, #tpu.memory_space<vmem>>, vector<1x32xf32>
      %c0_29 = arith.constant 0 : index
      %c0_30 = arith.constant 0 : index
      %30 = vector.load %arg7[%c0_29, %c0_30] : memref<1x32xf32, #tpu.memory_space<vmem>>, vector<1x32xf32>
      %cst_31 = arith.constant dense<0.000000e+00> : vector<16xf32>
      %31 = vector.multi_reduction <add>, %27, %cst_31 [1] : vector<16x32xf32> to vector<16xf32>
      %32 = vector.shape_cast %31 : vector<16xf32> to vector<16x1xf32>
      %cst_32 = arith.constant 3.200000e+01 : f32
      %33 = vector.broadcast %cst_32 : f32 to vector<16x1xf32>
      %34 = arith.divf %32, %33 : vector<16x1xf32>
      %35 = vector.broadcast %34 : vector<16x1xf32> to vector<16x32xf32>
      %36 = arith.subf %27, %35 : vector<16x32xf32>
      %37 = arith.mulf %36, %36 : vector<16x32xf32>
      %cst_33 = arith.constant dense<0.000000e+00> : vector<16xf32>
      %38 = vector.multi_reduction <add>, %37, %cst_33 [1] : vector<16x32xf32> to vector<16xf32>
      %39 = vector.shape_cast %38 : vector<16xf32> to vector<16x1xf32>
      %cst_34 = arith.constant 0.0322580636 : f32
      %40 = vector.broadcast %cst_34 : f32 to vector<16x1xf32>
      %41 = arith.mulf %39, %40 : vector<16x1xf32>
      %42 = math.sqrt %41 : vector<16x1xf32>
      %43 = vector.broadcast %29 : vector<1x32xf32> to vector<16x32xf32>
      %44 = arith.mulf %43, %36 : vector<16x32xf32>
      %cst_35 = arith.constant 1.000000e-07 : f32
      %45 = vector.broadcast %cst_35 : f32 to vector<16x1xf32>
      %46 = arith.addf %42, %45 : vector<16x1xf32>
      %47 = tpu.reciprocal %46 : vector<16x1xf32> -> vector<16x1xf32>
      %48 = vector.broadcast %47 : vector<16x1xf32> to vector<16x32xf32>
      %49 = arith.mulf %44, %48 : vector<16x32xf32>
      %50 = vector.broadcast %30 : vector<1x32xf32> to vector<16x32xf32>
      %51 = arith.addf %49, %50 : vector<16x32xf32>
      %52 = arith.truncf %51 : vector<16x32xf32> to vector<16x32xbf16>
      %c0_36 = arith.constant 0 : index
      %c0_37 = arith.constant 0 : index
      %53 = vector.load %arg14[%c0_36, %c0_37] : memref<16x32xbf16, #tpu.memory_space<vmem>>, vector<16x32xbf16>
      tpu.vector_store %arg14[%c0_36, %c0_37], %52 {strides = array<i32>} : memref<16x32xbf16, #tpu.memory_space<vmem>>, vector<16x32xbf16>,
      %cst_38 = arith.constant 0.000000e+00 : f32
      %54 = vector.broadcast %cst_38 : f32 to vector<16x32xf32>
      %c0_39 = arith.constant 0 : index
      %c0_40 = arith.constant 0 : index
      %55 = vector.load %arg15[%c0_39, %c0_40] : memref<16x32xf32, #tpu.memory_space<vmem>>, vector<16x32xf32>
      tpu.vector_store %arg15[%c0_39, %c0_40], %54 {strides = array<i32>} : memref<16x32xf32, #tpu.memory_space<vmem>>, vector<16x32xf32>,
    } else {
    }
    %c0 = arith.constant 0 : index
    %c0_1 = arith.constant 0 : index
    %3 = vector.load %arg14[%c0, %c0_1] : memref<16x32xbf16, #tpu.memory_space<vmem>>, vector<16x32xbf16>
    %c0_2 = arith.constant 0 : index
    %c0_3 = arith.constant 0 : index
    %4 = vector.load %arg8[%c0_2, %c0_3] : memref<32x64xbf16, #tpu.memory_space<vmem>>, vector<32x64xbf16>
    %cst = arith.constant dense<0.000000e+00> : vector<16x64xf32>
    %5 = tpu.matmul %3, %4, %cst {dimension_numbers = #tpu.dot_dimension_numbers<[1], [0], [0], [1], [0, 0, 1, 1], [], []>} : vector<16x32xbf16>, vector<32x64xbf16>, vector<16x64xf32> -> vector<16x64xf32>
    %c0_4 = arith.constant 0 : index
    %c0_5 = arith.constant 0 : index
    %6 = vector.load %arg9[%c0_4, %c0_5] : memref<1x64xf32, #tpu.memory_space<vmem>>, vector<1x64xf32>
    %7 = vector.broadcast %6 : vector<1x64xf32> to vector<16x64xf32>
    %8 = arith.addf %5, %7 : vector<16x64xf32>
    %cst_6 = arith.constant 0.000000e+00 : f32
    %9 = vector.broadcast %cst_6 : f32 to vector<16x64xf32>
    %10 = arith.maximumf %8, %9 : vector<16x64xf32>
    %c0_7 = arith.constant 0 : index
    %c0_8 = arith.constant 0 : index
    %11 = vector.load %arg15[%c0_7, %c0_8] : memref<16x32xf32, #tpu.memory_space<vmem>>, vector<16x32xf32>
    %12 = arith.truncf %10 : vector<16x64xf32> to vector<16x64xbf16>
    %c0_9 = arith.constant 0 : index
    %c0_10 = arith.constant 0 : index
    %13 = vector.load %arg10[%c0_9, %c0_10] : memref<64x32xbf16, #tpu.memory_space<vmem>>, vector<64x32xbf16>
    %cst_11 = arith.constant dense<0.000000e+00> : vector<16x32xf32>
    %14 = tpu.matmul %12, %13, %cst_11 {dimension_numbers = #tpu.dot_dimension_numbers<[1], [0], [0], [1], [0, 0, 1, 1], [], []>} : vector<16x64xbf16>, vector<64x32xbf16>, vector<16x32xf32> -> vector<16x32xf32>
    %15 = arith.addf %11, %14 : vector<16x32xf32>
    %c0_12 = arith.constant 0 : index
    %c0_13 = arith.constant 0 : index
    %16 = vector.load %arg15[%c0_12, %c0_13] : memref<16x32xf32, #tpu.memory_space<vmem>>, vector<16x32xf32>
    tpu.vector_store %arg15[%c0_12, %c0_13], %15 {strides = array<i32>} : memref<16x32xf32, #tpu.memory_space<vmem>>, vector<16x32xf32>,
    %c0_i32_14 = arith.constant 0 : i32
    %17 = arith.cmpi eq, %arg1, %c0_i32_14 : i32
    %18 = arith.extui %17 : i1 to i32
    %c0_i32_15 = arith.constant 0 : i32
    %19 = arith.cmpi ne, %18, %c0_i32_15 : i32
    scf.if %19 {
      %c0_16 = arith.constant 0 : index
      %c0_17 = arith.constant 0 : index
      %20 = vector.load %arg13[%c0_16, %c0_17] : memref<16x32xf32, #tpu.memory_space<vmem>>, vector<16x32xf32>
      %c0_18 = arith.constant 0 : index
      %c0_19 = arith.constant 0 : index
      %21 = vector.load %arg15[%c0_18, %c0_19] : memref<16x32xf32, #tpu.memory_space<vmem>>, vector<16x32xf32>
      %22 = arith.addf %20, %21 : vector<16x32xf32>
      %c0_20 = arith.constant 0 : index
      %c0_21 = arith.constant 0 : index
      %23 = vector.load %arg11[%c0_20, %c0_21] : memref<1x32xf32, #tpu.memory_space<vmem>>, vector<1x32xf32>
      %24 = vector.broadcast %23 : vector<1x32xf32> to vector<16x32xf32>
      %25 = arith.addf %22, %24 : vector<16x32xf32>
      %c0_22 = arith.constant 0 : index
      %c0_23 = arith.constant 0 : index
      %26 = vector.load %arg12[%c0_22, %c0_23] : memref<16x32xf32, #tpu.memory_space<vmem>>, vector<16x32xf32>
      tpu.vector_store %arg12[%c0_22, %c0_23], %25 {strides = array<i32>} : memref<16x32xf32, #tpu.memory_space<vmem>>, vector<16x32xf32>,
    } else {
    }
    return
  }
  func.func @transform_0(%arg0: i32, %arg1: i32) -> (i32, i32) {
    %c0_i32 = arith.constant 0 : i32
    %c0_i32_0 = arith.constant 0 : i32
    return %arg0, %c0_i32 : i32, i32
  }
  func.func @transform_1(%arg0: i32, %arg1: i32) -> (i32, i32) {
    %c0_i32 = arith.constant 0 : i32
    %c0_i32_0 = arith.constant 0 : i32
    return %arg0, %c0_i32 : i32, i32
  }
  func.func @transform_2(%arg0: i32, %arg1: i32) -> (i32, i32) {
    %c0_i32 = arith.constant 0 : i32
    %c0_i32_0 = arith.constant 0 : i32
    %c0_i32_1 = arith.constant 0 : i32
    return %c0_i32, %c0_i32_0 : i32, i32
  }
  func.func @transform_3(%arg0: i32, %arg1: i32) -> (i32, i32) {
    %c0_i32 = arith.constant 0 : i32
    %c0_i32_0 = arith.constant 0 : i32
    %c0_i32_1 = arith.constant 0 : i32
    return %c0_i32, %c0_i32_0 : i32, i32
  }
  func.func @transform_4(%arg0: i32, %arg1: i32) -> (i32, i32) {
    %c0_i32 = arith.constant 0 : i32
    %c0_i32_0 = arith.constant 0 : i32
    %c0_i32_1 = arith.constant 0 : i32
    return %c0_i32, %c0_i32_0 : i32, i32
  }
  func.func @transform_5(%arg0: i32, %arg1: i32) -> (i32, i32) {
    %c0_i32 = arith.constant 0 : i32
    %c0_i32_0 = arith.constant 0 : i32
    %c0_i32_1 = arith.constant 0 : i32
    return %c0_i32, %c0_i32_0 : i32, i32
  }
  func.func @transform_6(%arg0: i32, %arg1: i32) -> (i32, i32) {
    %c0_i32 = arith.constant 0 : i32
    %c0_i32_0 = arith.constant 0 : i32
    return %c0_i32, %arg1 : i32, i32
  }
  func.func @transform_7(%arg0: i32, %arg1: i32) -> (i32, i32) {
    %c0_i32 = arith.constant 0 : i32
    %c0_i32_0 = arith.constant 0 : i32
    return %c0_i32, %arg1 : i32, i32
  }
  func.func @transform_8(%arg0: i32, %arg1: i32) -> (i32, i32) {
    %c0_i32 = arith.constant 0 : i32
    %c0_i32_0 = arith.constant 0 : i32
    return %arg1, %c0_i32 : i32, i32
  }
  func.func @transform_9(%arg0: i32, %arg1: i32) -> (i32, i32) {
    %c0_i32 = arith.constant 0 : i32
    %c0_i32_0 = arith.constant 0 : i32
    %c0_i32_1 = arith.constant 0 : i32
    return %c0_i32, %c0_i32_0 : i32, i32
  }
  func.func @transform_10(%arg0: i32, %arg1: i32) -> (i32, i32) {
    %c0_i32 = arith.constant 0 : i32
    %c0_i32_0 = arith.constant 0 : i32
    return %arg0, %c0_i32 : i32, i32
  }
}

module attributes {stable_mosaic.version = 11 : i64} {
  func.func @_attn_out_ffn_kernel(%arg0: i32, %arg1: i32, %arg2: memref<16x32xbf16, #tpu.memory_space<vmem>>, %arg3: memref<16x32xf32, #tpu.memory_space<vmem>>, %arg4: memref<32x32xbf16, #tpu.memory_space<vmem>>, %arg5: memref<1x32xf32, #tpu.memory_space<vmem>>, %arg6: memref<1x32xf32, #tpu.memory_space<vmem>>, %arg7: memref<1x32xf32, #tpu.memory_space<vmem>>, %arg8: memref<32x64xbf16, #tpu.memory_space<vmem>>, %arg9: memref<1x64xf32, #tpu.memory_space<vmem>>, %arg10: memref<64x32xbf16, #tpu.memory_space<vmem>>, %arg11: memref<1x32xf32, #tpu.memory_space<vmem>>, %arg12: memref<1x32xf32, #tpu.memory_space<vmem>>, %arg13: memref<1x32xf32, #tpu.memory_space<vmem>>, %arg14: memref<16x32xf32, #tpu.memory_space<vmem>>, %arg15: memref<16x32xf32, #tpu.memory_space<vmem>>, %arg16: memref<16x32xbf16, #tpu.memory_space<vmem>>, %arg17: memref<16x32xf32, #tpu.memory_space<vmem>>) attributes {dimension_semantics = [#tpu.dimension_semantics<parallel>, #tpu.dimension_semantics<arbitrary>], iteration_bounds = array<i64: 1, 1>, scalar_prefetch = 0 : i64, scratch_operands = 3 : i64, tpu.core_type = #tpu.core_type<tc>, window_params = [{transform_indices = @transform_0, window_bounds = array<i64: 16, 32>}, {transform_indices = @transform_1, window_bounds = array<i64: 16, 32>}, {pipeline_mode = #tpu.pipeline_mode<synchronous>, transform_indices = @transform_2, window_bounds = array<i64: 32, 32>}, {pipeline_mode = #tpu.pipeline_mode<synchronous>, transform_indices = @transform_3, window_bounds = array<i64: 1, 32>}, {pipeline_mode = #tpu.pipeline_mode<synchronous>, transform_indices = @transform_4, window_bounds = array<i64: 1, 32>}, {pipeline_mode = #tpu.pipeline_mode<synchronous>, transform_indices = @transform_5, window_bounds = array<i64: 1, 32>}, {transform_indices = @transform_6, window_bounds = array<i64: 32, 64>}, {transform_indices = @transform_7, window_bounds = array<i64: 1, 64>}, {transform_indices = @transform_8, window_bounds = array<i64: 64, 32>}, {pipeline_mode = #tpu.pipeline_mode<synchronous>, transform_indices = @transform_9, window_bounds = array<i64: 1, 32>}, {pipeline_mode = #tpu.pipeline_mode<synchronous>, transform_indices = @transform_10, window_bounds = array<i64: 1, 32>}, {pipeline_mode = #tpu.pipeline_mode<synchronous>, transform_indices = @transform_11, window_bounds = array<i64: 1, 32>}, {transform_indices = @transform_12, window_bounds = array<i64: 16, 32>}]} {
    %c0_i32 = arith.constant 0 : i32
    %0 = arith.cmpi eq, %arg1, %c0_i32 : i32
    %1 = arith.extui %0 : i1 to i32
    %c0_i32_0 = arith.constant 0 : i32
    %2 = arith.cmpi ne, %1, %c0_i32_0 : i32
    scf.if %2 {
      %c0_16 = arith.constant 0 : index
      %c0_17 = arith.constant 0 : index
      %20 = vector.load %arg2[%c0_16, %c0_17] : memref<16x32xbf16, #tpu.memory_space<vmem>>, vector<16x32xbf16>
      %c0_18 = arith.constant 0 : index
      %c0_19 = arith.constant 0 : index
      %21 = vector.load %arg4[%c0_18, %c0_19] : memref<32x32xbf16, #tpu.memory_space<vmem>>, vector<32x32xbf16>
      %cst_20 = arith.constant dense<0.000000e+00> : vector<16x32xf32>
      %22 = tpu.matmul %20, %21, %cst_20 {dimension_numbers = #tpu.dot_dimension_numbers<[1], [0], [0], [1], [0, 0, 1, 1], [], []>} : vector<16x32xbf16>, vector<32x32xbf16>, vector<16x32xf32> -> vector<16x32xf32>
      %c0_21 = arith.constant 0 : index
      %c0_22 = arith.constant 0 : index
      %23 = vector.load %arg5[%c0_21, %c0_22] : memref<1x32xf32, #tpu.memory_space<vmem>>, vector<1x32xf32>
      %24 = vector.broadcast %23 : vector<1x32xf32> to vector<16x32xf32>
      %25 = arith.addf %22, %24 : vector<16x32xf32>
      %c0_23 = arith.constant 0 : index
      %c0_24 = arith.constant 0 : index
      %26 = vector.load %arg3[%c0_23, %c0_24] : memref<16x32xf32, #tpu.memory_space<vmem>>, vector<16x32xf32>
      %27 = arith.addf %26, %25 : vector<16x32xf32>
      %c0_25 = arith.constant 0 : index
      %c0_26 = arith.constant 0 : index
      %28 = vector.load %arg15[%c0_25, %c0_26] : memref<16x32xf32, #tpu.memory_space<vmem>>, vector<16x32xf32>
      tpu.vector_store %arg15[%c0_25, %c0_26], %27 {strides = array<i32>} : memref<16x32xf32, #tpu.memory_space<vmem>>, vector<16x32xf32>,
      %c0_27 = arith.constant 0 : index
      %c0_28 = arith.constant 0 : index
      %29 = vector.load %arg6[%c0_27, %c0_28] : memref<1x32xf32, #tpu.memory_space<vmem>>, vector<1x32xf32>
      %c0_29 = arith.constant 0 : index
      %c0_30 = arith.constant 0 : index
      %30 = vector.load %arg7[%c0_29, %c0_30] : memref<1x32xf32, #tpu.memory_space<vmem>>, vector<1x32xf32>
      %cst_31 = arith.constant dense<0.000000e+00> : vector<16xf32>
      %31 = vector.multi_reduction <add>, %27, %cst_31 [1] : vector<16x32xf32> to vector<16xf32>
      %32 = vector.shape_cast %31 : vector<16xf32> to vector<16x1xf32>
      %cst_32 = arith.constant 3.200000e+01 : f32
      %33 = vector.broadcast %cst_32 : f32 to vector<16x1xf32>
      %34 = arith.divf %32, %33 : vector<16x1xf32>
      %35 = vector.broadcast %34 : vector<16x1xf32> to vector<16x32xf32>
      %36 = arith.subf %27, %35 : vector<16x32xf32>
      %37 = arith.mulf %36, %36 : vector<16x32xf32>
      %cst_33 = arith.constant dense<0.000000e+00> : vector<16xf32>
      %38 = vector.multi_reduction <add>, %37, %cst_33 [1] : vector<16x32xf32> to vector<16xf32>
      %39 = vector.shape_cast %38 : vector<16xf32> to vector<16x1xf32>
      %cst_34 = arith.constant 0.0322580636 : f32
      %40 = vector.broadcast %cst_34 : f32 to vector<16x1xf32>
      %41 = arith.mulf %39, %40 : vector<16x1xf32>
      %42 = math.sqrt %41 : vector<16x1xf32>
      %43 = vector.broadcast %29 : vector<1x32xf32> to vector<16x32xf32>
      %44 = arith.mulf %43, %36 : vector<16x32xf32>
      %cst_35 = arith.constant 1.000000e-07 : f32
      %45 = vector.broadcast %cst_35 : f32 to vector<16x1xf32>
      %46 = arith.addf %42, %45 : vector<16x1xf32>
      %47 = tpu.reciprocal %46 : vector<16x1xf32> -> vector<16x1xf32>
      %48 = vector.broadcast %47 : vector<16x1xf32> to vector<16x32xf32>
      %49 = arith.mulf %44, %48 : vector<16x32xf32>
      %50 = vector.broadcast %30 : vector<1x32xf32> to vector<16x32xf32>
      %51 = arith.addf %49, %50 : vector<16x32xf32>
      %52 = arith.truncf %51 : vector<16x32xf32> to vector<16x32xbf16>
      %c0_36 = arith.constant 0 : index
      %c0_37 = arith.constant 0 : index
      %53 = vector.load %arg16[%c0_36, %c0_37] : memref<16x32xbf16, #tpu.memory_space<vmem>>, vector<16x32xbf16>
      tpu.vector_store %arg16[%c0_36, %c0_37], %52 {strides = array<i32>} : memref<16x32xbf16, #tpu.memory_space<vmem>>, vector<16x32xbf16>,
      %cst_38 = arith.constant 0.000000e+00 : f32
      %54 = vector.broadcast %cst_38 : f32 to vector<16x32xf32>
      %c0_39 = arith.constant 0 : index
      %c0_40 = arith.constant 0 : index
      %55 = vector.load %arg17[%c0_39, %c0_40] : memref<16x32xf32, #tpu.memory_space<vmem>>, vector<16x32xf32>
      tpu.vector_store %arg17[%c0_39, %c0_40], %54 {strides = array<i32>} : memref<16x32xf32, #tpu.memory_space<vmem>>, vector<16x32xf32>,
    } else {
    }
    %c0 = arith.constant 0 : index
    %c0_1 = arith.constant 0 : index
    %3 = vector.load %arg16[%c0, %c0_1] : memref<16x32xbf16, #tpu.memory_space<vmem>>, vector<16x32xbf16>
    %c0_2 = arith.constant 0 : index
    %c0_3 = arith.constant 0 : index
    %4 = vector.load %arg8[%c0_2, %c0_3] : memref<32x64xbf16, #tpu.memory_space<vmem>>, vector<32x64xbf16>
    %cst = arith.constant dense<0.000000e+00> : vector<16x64xf32>
    %5 = tpu.matmul %3, %4, %cst {dimension_numbers = #tpu.dot_dimension_numbers<[1], [0], [0], [1], [0, 0, 1, 1], [], []>} : vector<16x32xbf16>, vector<32x64xbf16>, vector<16x64xf32> -> vector<16x64xf32>
    %c0_4 = arith.constant 0 : index
    %c0_5 = arith.constant 0 : index
    %6 = vector.load %arg9[%c0_4, %c0_5] : memref<1x64xf32, #tpu.memory_space<vmem>>, vector<1x64xf32>
    %7 = vector.broadcast %6 : vector<1x64xf32> to vector<16x64xf32>
    %8 = arith.addf %5, %7 : vector<16x64xf32>
    %cst_6 = arith.constant 0.000000e+00 : f32
    %9 = vector.broadcast %cst_6 : f32 to vector<16x64xf32>
    %10 = arith.maximumf %8, %9 : vector<16x64xf32>
    %c0_7 = arith.constant 0 : index
    %c0_8 = arith.constant 0 : index
    %11 = vector.load %arg17[%c0_7, %c0_8] : memref<16x32xf32, #tpu.memory_space<vmem>>, vector<16x32xf32>
    %12 = arith.truncf %10 : vector<16x64xf32> to vector<16x64xbf16>
    %c0_9 = arith.constant 0 : index
    %c0_10 = arith.constant 0 : index
    %13 = vector.load %arg10[%c0_9, %c0_10] : memref<64x32xbf16, #tpu.memory_space<vmem>>, vector<64x32xbf16>
    %cst_11 = arith.constant dense<0.000000e+00> : vector<16x32xf32>
    %14 = tpu.matmul %12, %13, %cst_11 {dimension_numbers = #tpu.dot_dimension_numbers<[1], [0], [0], [1], [0, 0, 1, 1], [], []>} : vector<16x64xbf16>, vector<64x32xbf16>, vector<16x32xf32> -> vector<16x32xf32>
    %15 = arith.addf %11, %14 : vector<16x32xf32>
    %c0_12 = arith.constant 0 : index
    %c0_13 = arith.constant 0 : index
    %16 = vector.load %arg17[%c0_12, %c0_13] : memref<16x32xf32, #tpu.memory_space<vmem>>, vector<16x32xf32>
    tpu.vector_store %arg17[%c0_12, %c0_13], %15 {strides = array<i32>} : memref<16x32xf32, #tpu.memory_space<vmem>>, vector<16x32xf32>,
    %c0_i32_14 = arith.constant 0 : i32
    %17 = arith.cmpi eq, %arg1, %c0_i32_14 : i32
    %18 = arith.extui %17 : i1 to i32
    %c0_i32_15 = arith.constant 0 : i32
    %19 = arith.cmpi ne, %18, %c0_i32_15 : i32
    scf.if %19 {
      %c0_16 = arith.constant 0 : index
      %c0_17 = arith.constant 0 : index
      %20 = vector.load %arg15[%c0_16, %c0_17] : memref<16x32xf32, #tpu.memory_space<vmem>>, vector<16x32xf32>
      %c0_18 = arith.constant 0 : index
      %c0_19 = arith.constant 0 : index
      %21 = vector.load %arg17[%c0_18, %c0_19] : memref<16x32xf32, #tpu.memory_space<vmem>>, vector<16x32xf32>
      %22 = arith.addf %20, %21 : vector<16x32xf32>
      %c0_20 = arith.constant 0 : index
      %c0_21 = arith.constant 0 : index
      %23 = vector.load %arg11[%c0_20, %c0_21] : memref<1x32xf32, #tpu.memory_space<vmem>>, vector<1x32xf32>
      %24 = vector.broadcast %23 : vector<1x32xf32> to vector<16x32xf32>
      %25 = arith.addf %22, %24 : vector<16x32xf32>
      %c0_22 = arith.constant 0 : index
      %c0_23 = arith.constant 0 : index
      %26 = vector.load %arg12[%c0_22, %c0_23] : memref<1x32xf32, #tpu.memory_space<vmem>>, vector<1x32xf32>
      %c0_24 = arith.constant 0 : index
      %c0_25 = arith.constant 0 : index
      %27 = vector.load %arg13[%c0_24, %c0_25] : memref<1x32xf32, #tpu.memory_space<vmem>>, vector<1x32xf32>
      %cst_26 = arith.constant dense<0.000000e+00> : vector<16xf32>
      %28 = vector.multi_reduction <add>, %25, %cst_26 [1] : vector<16x32xf32> to vector<16xf32>
      %29 = vector.shape_cast %28 : vector<16xf32> to vector<16x1xf32>
      %cst_27 = arith.constant 3.200000e+01 : f32
      %30 = vector.broadcast %cst_27 : f32 to vector<16x1xf32>
      %31 = arith.divf %29, %30 : vector<16x1xf32>
      %32 = vector.broadcast %31 : vector<16x1xf32> to vector<16x32xf32>
      %33 = arith.subf %25, %32 : vector<16x32xf32>
      %34 = arith.mulf %33, %33 : vector<16x32xf32>
      %cst_28 = arith.constant dense<0.000000e+00> : vector<16xf32>
      %35 = vector.multi_reduction <add>, %34, %cst_28 [1] : vector<16x32xf32> to vector<16xf32>
      %36 = vector.shape_cast %35 : vector<16xf32> to vector<16x1xf32>
      %cst_29 = arith.constant 0.0322580636 : f32
      %37 = vector.broadcast %cst_29 : f32 to vector<16x1xf32>
      %38 = arith.mulf %36, %37 : vector<16x1xf32>
      %39 = math.sqrt %38 : vector<16x1xf32>
      %40 = vector.broadcast %26 : vector<1x32xf32> to vector<16x32xf32>
      %41 = arith.mulf %40, %33 : vector<16x32xf32>
      %cst_30 = arith.constant 1.000000e-07 : f32
      %42 = vector.broadcast %cst_30 : f32 to vector<16x1xf32>
      %43 = arith.addf %39, %42 : vector<16x1xf32>
      %44 = tpu.reciprocal %43 : vector<16x1xf32> -> vector<16x1xf32>
      %45 = vector.broadcast %44 : vector<16x1xf32> to vector<16x32xf32>
      %46 = arith.mulf %41, %45 : vector<16x32xf32>
      %47 = vector.broadcast %27 : vector<1x32xf32> to vector<16x32xf32>
      %48 = arith.addf %46, %47 : vector<16x32xf32>
      %c0_31 = arith.constant 0 : index
      %c0_32 = arith.constant 0 : index
      %49 = vector.load %arg14[%c0_31, %c0_32] : memref<16x32xf32, #tpu.memory_space<vmem>>, vector<16x32xf32>
      tpu.vector_store %arg14[%c0_31, %c0_32], %48 {strides = array<i32>} : memref<16x32xf32, #tpu.memory_space<vmem>>, vector<16x32xf32>,
    } else {
    }
    return
  }
  func.func @transform_0(%arg0: i32, %arg1: i32) -> (i32, i32) {
    %c0_i32 = arith.constant 0 : i32
    %c0_i32_0 = arith.constant 0 : i32
    return %arg0, %c0_i32 : i32, i32
  }
  func.func @transform_1(%arg0: i32, %arg1: i32) -> (i32, i32) {
    %c0_i32 = arith.constant 0 : i32
    %c0_i32_0 = arith.constant 0 : i32
    return %arg0, %c0_i32 : i32, i32
  }
  func.func @transform_2(%arg0: i32, %arg1: i32) -> (i32, i32) {
    %c0_i32 = arith.constant 0 : i32
    %c0_i32_0 = arith.constant 0 : i32
    %c0_i32_1 = arith.constant 0 : i32
    return %c0_i32, %c0_i32_0 : i32, i32
  }
  func.func @transform_3(%arg0: i32, %arg1: i32) -> (i32, i32) {
    %c0_i32 = arith.constant 0 : i32
    %c0_i32_0 = arith.constant 0 : i32
    %c0_i32_1 = arith.constant 0 : i32
    return %c0_i32, %c0_i32_0 : i32, i32
  }
  func.func @transform_4(%arg0: i32, %arg1: i32) -> (i32, i32) {
    %c0_i32 = arith.constant 0 : i32
    %c0_i32_0 = arith.constant 0 : i32
    %c0_i32_1 = arith.constant 0 : i32
    return %c0_i32, %c0_i32_0 : i32, i32
  }
  func.func @transform_5(%arg0: i32, %arg1: i32) -> (i32, i32) {
    %c0_i32 = arith.constant 0 : i32
    %c0_i32_0 = arith.constant 0 : i32
    %c0_i32_1 = arith.constant 0 : i32
    return %c0_i32, %c0_i32_0 : i32, i32
  }
  func.func @transform_6(%arg0: i32, %arg1: i32) -> (i32, i32) {
    %c0_i32 = arith.constant 0 : i32
    %c0_i32_0 = arith.constant 0 : i32
    return %c0_i32, %arg1 : i32, i32
  }
  func.func @transform_7(%arg0: i32, %arg1: i32) -> (i32, i32) {
    %c0_i32 = arith.constant 0 : i32
    %c0_i32_0 = arith.constant 0 : i32
    return %c0_i32, %arg1 : i32, i32
  }
  func.func @transform_8(%arg0: i32, %arg1: i32) -> (i32, i32) {
    %c0_i32 = arith.constant 0 : i32
    %c0_i32_0 = arith.constant 0 : i32
    return %arg1, %c0_i32 : i32, i32
  }
  func.func @transform_9(%arg0: i32, %arg1: i32) -> (i32, i32) {
    %c0_i32 = arith.constant 0 : i32
    %c0_i32_0 = arith.constant 0 : i32
    %c0_i32_1 = arith.constant 0 : i32
    return %c0_i32, %c0_i32_0 : i32, i32
  }
  func.func @transform_10(%arg0: i32, %arg1: i32) -> (i32, i32) {
    %c0_i32 = arith.constant 0 : i32
    %c0_i32_0 = arith.constant 0 : i32
    %c0_i32_1 = arith.constant 0 : i32
    return %c0_i32, %c0_i32_0 : i32, i32
  }
  func.func @transform_11(%arg0: i32, %arg1: i32) -> (i32, i32) {
    %c0_i32 = arith.constant 0 : i32
    %c0_i32_0 = arith.constant 0 : i32
    %c0_i32_1 = arith.constant 0 : i32
    return %c0_i32, %c0_i32_0 : i32, i32
  }
  func.func @transform_12(%arg0: i32, %arg1: i32) -> (i32, i32) {
    %c0_i32 = arith.constant 0 : i32
    %c0_i32_0 = arith.constant 0 : i32
    return %arg0, %c0_i32 : i32, i32
  }
}

</mosaic_0001>

<bundles_post_ra>
// kernel: encoder_block_forward.10
= control target key start
LH: loop header
LB: loop body
LE: loop exit
PB: predicated region body
PF: predicated region fallthrough
CT: control target
= control target key end

     0   :  { %s553_s12 = smov 0   ;;  %s603_s0 = inlined_call_operand.vmem [shape: f32[2,34,32], index: 0, kind: input, shape index: {}]   ;;  %s604_s1 = inlined_call_operand.vmem [shape: bf16[3,32,32], index: 1, kind: input, shape index: {}]   ;;  %s605_s2 = inlined_call_operand.vmem [shape: f32[1,32], index: 2, kind: input, shape index: {}]   ;;  %s606_s3 = inlined_call_operand.vmem [shape: f32[2,16,32], index: 3, kind: output, shape index: {}]  }
   0x1 LB: > { %s439_s13 = sadd.s32 4294967295, %s529_s12   ;;  %p443_p0 = scmp.ge.s32.totalorder %s529_s12, 1  ;;  %s529_s12 = sphi %s553_s12, %s13_s12  }
   0x2   : > { %p137_p1 = scmp.lt.s32.totalorder %s529_s12, 3 }
   0x4   : > { %p138_p2 = pnand %p443_p0, %p137_p1 }
   0x5   : > { %p161_p3 = scmp.lt.s32.totalorder (!%p138_p2), %s439_s13, 1 }
   0x6   : > { %141 = sbr.rel (%p138_p2) target bundleno = 232 (0xe8), region = 32 }
   0xb   : > { %v517_v0 = vld [vmem:[%s604_s1 + $0x18] sm:$0xff]   ;;  %v531_v1 = vmov 0.0   ;;  %v518_v2 = vld [vmem:[%s604_s1 + $0x8] sm:$0xff]   ;;  %v519_v3 = vld [vmem:[%s604_s1 + $0x10] sm:$0xff]   ;;  %vm532_vm0 = vmmov 0   ;;  %s608_s13 = smov (!%p161_p3, %s439_s13), 1 }
   0xc   : > { %482 = vmatprep.subr.bf16.mxu0 %v531_v1  ;;  %490 = vmatprep.subr.bf16.mxu1 %v531_v1  ;;  %v520_v4 = vld [vmem:[%s604_s1] sm:$0xff]   ;;  %s506_s22 = smul.u32 40, %s608_s13  ;;  %vm202_vm1 = vcmask 261120   ;;  %v521_v5 = vld [vmem:[%s604_s1 + $0x28] sm:$0xff]   ;;  %s472_s5 = sshll.u32 %s608_s13, 4 }
   0xd   : > { %483 = vmatpush3.bf16.msra.mxu0 %v517_v0  ;;  %486 = vmatprep.mubr.msk.bf16.mxu0 %vm532_vm0, %v531_v1  ;;  %v522_v12 = vld [vmem:[%s604_s1 + $0x20] sm:$0xff]   ;;  %s170_s8 = scalar_lea.vmem %s606_s3, %s472_s5 }
   0xe   : > { %491 = vmatpush3.bf16.msra.mxu1 %v518_v2  ;;  %484 = vmatprep.subr.bf16.mxu0 %v531_v1  ;;  %s165_s25 = scalar_lea.vmem %s603_s0, %s506_s22  ;;  %v469_v26 = vld [vmem:[%s605_s2] ss:$0 sm:$0xff] }
   0xf   : > { %492 = vmatprep.subr.bf16.mxu1 %v531_v1  ;;  %494 = vmatprep.mubr.msk.bf16.mxu1 %vm532_vm0, %v531_v1  ;;  %v448_v6 = vld [vmem:[%s165_s25 + $0x1] ss:$2 sm:$0xff]  ;;  %v449_v7 = vld [vmem:[%s165_s25 + $0x11] ss:$2 sm:$0xff]  ;;  %v172_v8 = vld [vmem:[%s165_s25] ss:$2 sm:$0xff] }
  0x10   : > { %v184_v9 = vpack.c.bf16 %v449_v7, %v448_v6  ;;  %v447_v10 = vld [vmem:[%s165_s25 + $0x10] ss:$2 sm:$0xff] }
  0x11   : > { %485 = vmatpush3.bf16.msra.mxu0 %v519_v3  ;;  %v175_v11 = vpack.c.bf16 %v447_v10, %v172_v8  ;;  %v460_v13 = vld [vmem:[%s165_s25 + $0x2] ss:$2 sm:$0xff]  ;;  %v461_v14 = vld [vmem:[%s165_s25 + $0x12] ss:$2 sm:$0xff] }
  0x12   : > { %493 = vmatpush3.bf16.msra.mxu1 %v520_v4  ;;  %498 = vmatprep.subr.bf16.mxu0 %v531_v1  ;;  %v307_v15 = vpack.c.bf16 %v461_v14, %v460_v13 }
  0x14   : > { %487 = vmatmul.mubr.msk.bf16.vlgmr.msra.gmra.mxu0 %vm202_vm1, %v184_v9 }
  0x15   : > { %495 = vmatmul.mubr.msk.bf16.vlgmr.msra.gmra.mxu1 %vm202_vm1, %v175_v11  ;;  %499 = vmatpush3.bf16.msra.mxu0 %v521_v5 }
  0x16   : > { %500 = vmatprep.subr.bf16.mxu0 %v531_v1  ;;  %502 = vmatprep.mubr.msk.bf16.mxu0 %vm532_vm0, %v531_v1 }
  0x19   : > { %501 = vmatpush3.bf16.msra.mxu0 %v522_v12 }
  0x1c   : > { %503 = vmatmul.mubr.msk.bf16.vlgmr.msra.gmra.mxu0 %vm202_vm1, %v307_v15 }
  0xd4   : > { %v240_v16 = vpop.f32.mrf.mxu0 }
  0xd5   : > { %v296_v17 = vpop.f32.mrf.mxu1 }
  0xd6   : > { %v488_v18 = vpop.f32.mrf.mxu0  ;;  %v297_v23 = vadd.f32 %v296_v17, %v240_v16 }
  0xd7   : > { %v496_v19 = vpop.f32.mrf.mxu1 }
  0xd8   : > { %v243_v20 = vpop.f32.mrf.mxu0 }
  0xd9   : > { %v299_v21 = vpop.f32.mrf.mxu1 }
  0xda   : > { %v489_v22 = vpop.f32.mrf.mxu0  ;;  %v300_v29 = vadd.f32 %v299_v21, %v243_v20 }
  0xdb   : > { %v497_v24 = vpop.f32.mrf.mxu1 }
  0xdc   : > { %v362_v25 = vpop.f32.mrf.mxu0 }
  0xdd   : > { %v369_v27 = vadd.f32 %v362_v25, %v297_v23 }
  0xde   : > { %v504_v28 = vpop.f32.mrf.mxu0 }
  0xdf   : > { %v378_v30 = vadd.f32 %v469_v26, %v369_v27 }
  0xe0   : > { %v365_v31 = vpop.f32.mrf.mxu0 }
  0xe1   : > { %v380_v32 = vmax.f32 %v378_v30, 0.0  ;;  %v370_v33 = vadd.f32 %v365_v31, %v300_v29 }
  0xe2   : > { %v505_v34 = vpop.f32.mrf.mxu0 }
  0xe3   : > { %382 = vst.msk [vmem:[%s170_s8] sm:$0xff] %vm202_vm1, %v380_v32  ;;  %v379_v35 = vadd.f32 %v469_v26, %v370_v33 }
  0xe5   : > { %v381_v36 = vmax.f32 %v379_v35, 0.0 }
  0xe7   : > { %383 = vst.msk [vmem:[%s170_s8 + $0x8] sm:$0xff] %vm202_vm1, %v381_v36 }
  0xe8 PF: > { %s13_s12 = sadd.s32 1, %s529_s12  }
  0xe9   : > { %p10_p4 = scmp.ge.s32.totalorder %s13_s12, 4  }
  0xeb   :  { %12 = sbr.rel (!%p10_p4) target bundleno = 1 (0x1), region = 69 }

// kernel: encoder_block_forward.9
= control target key start
LH: loop header
LB: loop body
LE: loop exit
PB: predicated region body
PF: predicated region fallthrough
CT: control target
= control target key end

     0   :  { %s617_s12 = smov 0   ;;  %s669_s0 = inlined_call_operand.vmem [shape: f32[2,66,32], index: 0, kind: input, shape index: {}]   ;;  %s670_s1 = inlined_call_operand.vmem [shape: bf16[3,32,32], index: 1, kind: input, shape index: {}]   ;;  %s671_s2 = inlined_call_operand.vmem [shape: f32[1,32], index: 2, kind: input, shape index: {}]   ;;  %s672_s3 = inlined_call_operand.vmem [shape: f32[2,32,32], index: 3, kind: output, shape index: {}]  }
   0x1 LB: > { %s495_s13 = sadd.s32 4294967295, %s595_s12   ;;  %p499_p0 = scmp.ge.s32.totalorder %s595_s12, 1  ;;  %s595_s12 = sphi %s617_s12, %s13_s12  }
   0x2   : > { %p137_p1 = scmp.lt.s32.totalorder %s595_s12, 3 }
   0x4   : > { %p138_p2 = pnand %p499_p0, %p137_p1 }
   0x5   : > { %p161_p3 = scmp.lt.s32.totalorder (!%p138_p2), %s495_s13, 1 }
   0x6   : > { %141 = sbr.rel (%p138_p2) target bundleno = 234 (0xea), region = 32 }
   0xb   : > { %v583_v0 = vld [vmem:[%s670_s1 + $0x18] sm:$0xff]   ;;  %v584_v1 = vld [vmem:[%s670_s1 + $0x8] sm:$0xff]   ;;  %v585_v2 = vld [vmem:[%s670_s1 + $0x10] sm:$0xff]   ;;  %s674_s13 = smov (!%p161_p3, %s495_s13), 1  ;;  %vm212_vm0 = vcmask 261120  }
   0xc   : > { %550 = vmatprep.subr.bf16.mxu0 %v583_v0  ;;  %558 = vmatprep.subr.bf16.mxu1 %v584_v1  ;;  %v586_v3 = vld [vmem:[%s670_s1] sm:$0xff]   ;;  %s574_s22 = smul.u32 72, %s674_s13  ;;  %v587_v4 = vld [vmem:[%s670_s1 + $0x28] sm:$0xff]   ;;  %s537_s5 = sshll.u32 %s674_s13, 5 }
   0xd   : > { %551 = vmatpush3.bf16.msra.mxu0 %v583_v0  ;;  %559 = vmatpush3.bf16.msra.mxu1 %v584_v1  ;;  %v588_v8 = vld [vmem:[%s670_s1 + $0x20] sm:$0xff]   ;;  %s170_s8 = scalar_lea.vmem %s672_s3, %s537_s5 }
   0xe   : > { %552 = vmatprep.subr.bf16.mxu0 %v585_v2  ;;  %560 = vmatprep.subr.bf16.mxu1 %v586_v3  ;;  %s165_s27 = scalar_lea.vmem %s669_s0, %s574_s22  ;;  %v534_v33 = vld [vmem:[%s671_s2] ss:$0 sm:$0xff] }
   0xf   : > { %v506_v5 = vld [vmem:[%s165_s27 + $0x1] ss:$2 sm:$0xff]  ;;  %v507_v6 = vld [vmem:[%s165_s27 + $0x11] ss:$2 sm:$0xff]  ;;  %v172_v7 = vld [vmem:[%s165_s27] ss:$2 sm:$0xff] }
  0x10   : > { %v193_v9 = vpack.c.bf16 %v507_v6, %v506_v5  ;;  %v503_v10 = vld [vmem:[%s165_s27 + $0x10] ss:$2 sm:$0xff]  ;;  %v508_v11 = vld [vmem:[%s165_s27 + $0x21] ss:$2 sm:$0xff]  ;;  %v509_v12 = vld [vmem:[%s165_s27 + $0x31] ss:$2 sm:$0xff] }
  0x11   : > { %553 = vmatpush3.bf16.msra.mxu0 %v585_v2  ;;  %561 = vmatpush3.bf16.msra.mxu1 %v586_v3  ;;  %v179_v13 = vpack.c.bf16 %v503_v10, %v172_v7  ;;  %v194_v14 = vpack.c.bf16 %v509_v12, %v508_v11  ;;  %v504_v15 = vld [vmem:[%s165_s27 + $0x20] ss:$2 sm:$0xff]  ;;  %v505_v16 = vld [vmem:[%s165_s27 + $0x30] ss:$2 sm:$0xff] }
  0x12   : > { %566 = vmatprep.subr.bf16.mxu0 %v587_v4  ;;  %v522_v17 = vld [vmem:[%s165_s27 + $0x2] ss:$2 sm:$0xff]  ;;  %554 = vmatprep.mubr.msk.bf16.mxu0 %vm212_vm0, %v193_v9  ;;  %v180_v18 = vpack.c.bf16 %v505_v16, %v504_v15  ;;  %v523_v19 = vld [vmem:[%s165_s27 + $0x12] ss:$2 sm:$0xff] }
  0x13   : > { %562 = vmatprep.mubr.msk.bf16.mxu1 %vm212_vm0, %v179_v13  ;;  %v343_v20 = vpack.c.bf16 %v523_v19, %v522_v17  ;;  %v524_v21 = vld [vmem:[%s165_s27 + $0x22] ss:$2 sm:$0xff]  ;;  %v525_v22 = vld [vmem:[%s165_s27 + $0x32] ss:$2 sm:$0xff] }
  0x14   : > { %555 = vmatmul.mubr.msk.bf16.vlgmr.msra.gmra.mxu0 %vm212_vm0, %v194_v14  ;;  %563 = vmatmul.mubr.msk.bf16.vlgmr.msra.gmra.mxu1 %vm212_vm0, %v180_v18  ;;  %v344_v23 = vpack.c.bf16 %v525_v22, %v524_v21 }
  0x15   : > { %567 = vmatpush3.bf16.msra.mxu0 %v587_v4  ;;  %570 = vmatprep.mubr.msk.bf16.mxu0 %vm212_vm0, %v343_v20 }
  0x16   : > { %568 = vmatprep.subr.bf16.mxu0 %v588_v8 }
  0x19   : > { %569 = vmatpush3.bf16.msra.mxu0 %v588_v8 }
  0x1c   : > { %571 = vmatmul.mubr.msk.bf16.vlgmr.msra.gmra.mxu0 %vm212_vm0, %v344_v23 }
  0xd4   : > { %v556_v24 = vpop.f32.mrf.mxu0  ;;  %v564_v25 = vpop.f32.mrf.mxu1 }
  0xd5   : > { %v329_v31 = vadd.f32 %v564_v25, %v556_v24 }
  0xd6   : > { %v253_v26 = vpop.f32.mrf.mxu0  ;;  %v320_v27 = vpop.f32.mrf.mxu1 }
  0xd7   : > { %v321_v34 = vadd.f32 %v320_v27, %v253_v26 }
  0xd8   : > { %v557_v28 = vpop.f32.mrf.mxu0  ;;  %v565_v29 = vpop.f32.mrf.mxu1 }
  0xd9   : > { %v332_v38 = vadd.f32 %v565_v29, %v557_v28 }
  0xda   : > { %v256_v30 = vpop.f32.mrf.mxu0  ;;  %v323_v36 = vpop.f32.mrf.mxu1 }
  0xdb   : > { %v324_v42 = vadd.f32 %v323_v36, %v256_v30 }
  0xdc   : > { %v572_v32 = vpop.f32.mrf.mxu0 }
  0xdd   : > { %v419_v35 = vadd.f32 %v572_v32, %v329_v31 }
  0xde   : > { %v402_v37 = vpop.f32.mrf.mxu0 }
  0xdf   : > { %v430_v39 = vadd.f32 %v534_v33, %v419_v35  ;;  %v417_v40 = vadd.f32 %v402_v37, %v321_v34 }
  0xe0   : > { %v573_v41 = vpop.f32.mrf.mxu0 }
  0xe1   : > { %v434_v43 = vmax.f32 %v430_v39, 0.0  ;;  %v428_v44 = vadd.f32 %v534_v33, %v417_v40  ;;  %v420_v45 = vadd.f32 %v573_v41, %v332_v38 }
  0xe2   : > { %v405_v46 = vpop.f32.mrf.mxu0 }
  0xe3   : > { %438 = vst.msk [vmem:[%s170_s8 + $0x10] sm:$0xff] %vm212_vm0, %v434_v43  ;;  %v432_v47 = vmax.f32 %v428_v44, 0.0  ;;  %v431_v48 = vadd.f32 %v534_v33, %v420_v45  ;;  %v418_v49 = vadd.f32 %v405_v46, %v324_v42 }
  0xe5   : > { %436 = vst.msk [vmem:[%s170_s8] sm:$0xff] %vm212_vm0, %v432_v47  ;;  %v435_v50 = vmax.f32 %v431_v48, 0.0  ;;  %v429_v51 = vadd.f32 %v534_v33, %v418_v49 }
  0xe7   : > { %439 = vst.msk [vmem:[%s170_s8 + $0x18] sm:$0xff] %vm212_vm0, %v435_v50  ;;  %v433_v52 = vmax.f32 %v429_v51, 0.0 }
  0xe9   : > { %437 = vst.msk [vmem:[%s170_s8 + $0x8] sm:$0xff] %vm212_vm0, %v433_v52 }
  0xea PF: > { %s13_s12 = sadd.s32 1, %s595_s12  }
  0xeb   : > { %p10_p4 = scmp.ge.s32.totalorder %s13_s12, 4  }
  0xed   :  { %12 = sbr.rel (!%p10_p4) target bundleno = 1 (0x1), region = 75 }

// kernel: encoder_block_forward.11
= control target key start
LH: loop header
LB: loop body
LE: loop exit
PB: predicated region body
PF: predicated region fallthrough
CT: control target
= control target key end

     0   :  { %s531_s12 = smov 0   ;;  %s580_s0 = inlined_call_operand.vmem [shape: f32[2,18,32], index: 0, kind: input, shape index: {}]   ;;  %s581_s1 = inlined_call_operand.vmem [shape: bf16[3,32,32], index: 1, kind: input, shape index: {}]   ;;  %s582_s2 = inlined_call_operand.vmem [shape: f32[1,32], index: 2, kind: input, shape index: {}]   ;;  %s583_s3 = inlined_call_operand.vmem [shape: f32[2,8,32], index: 3, kind: output, shape index: {}]  }
   0x1 LB: > { %s422_s13 = sadd.s32 4294967295, %s507_s12   ;;  %p426_p0 = scmp.ge.s32.totalorder %s507_s12, 1  ;;  %s507_s12 = sphi %s531_s12, %s13_s12  }
   0x2   : > { %p137_p1 = scmp.lt.s32.totalorder %s507_s12, 3 }
   0x4   : > { %p138_p2 = pnand %p426_p0, %p137_p1 }
   0x5   : > { %p160_p3 = scmp.lt.s32.totalorder (!%p138_p2), %s422_s13, 1 }
   0x6   : > { %141 = sbr.rel (%p138_p2) target bundleno = 228 (0xe4), region = 32 }
   0xb   : > { %v495_v0 = vld [vmem:[%s581_s1 + $0x18] sm:$0xff]   ;;  %v509_v1 = vmov 0.0   ;;  %v496_v2 = vld [vmem:[%s581_s1 + $0x8] sm:$0xff]   ;;  %v497_v3 = vld [vmem:[%s581_s1 + $0x10] sm:$0xff]   ;;  %vm510_vm0 = vmmov 0   ;;  %s585_s13 = smov (!%p160_p3, %s422_s13), 1 }
   0xc   : > { %460 = vmatprep.subr.bf16.mxu0 %v509_v1  ;;  %468 = vmatprep.subr.bf16.mxu1 %v509_v1  ;;  %v498_v4 = vld [vmem:[%s581_s1] sm:$0xff]   ;;  %s484_s22 = smul.u32 24, %s585_s13  ;;  %vm196_vm1 = vcmask 261120   ;;  %v499_v7 = vld [vmem:[%s581_s1 + $0x28] sm:$0xff]   ;;  %s428_s5 = sshll.u32 %s585_s13, 3 }
   0xd   : > { %461 = vmatpush3.bf16.msra.mxu0 %v495_v0  ;;  %464 = vmatprep.mubr.msk.bf16.mxu0 %vm510_vm0, %v509_v1  ;;  %v500_v10 = vld [vmem:[%s581_s1 + $0x20] sm:$0xff]   ;;  %s168_s8 = scalar_lea.vmem %s583_s3, %s428_s5 }
   0xe   : > { %469 = vmatpush3.bf16.msra.mxu1 %v496_v2  ;;  %462 = vmatprep.subr.bf16.mxu0 %v509_v1  ;;  %s164_s25 = scalar_lea.vmem %s580_s0, %s484_s22  ;;  %v448_v23 = vld [vmem:[%s582_s2] ss:$0 sm:$0xff] }
   0xf   : > { %470 = vmatprep.subr.bf16.mxu1 %v509_v1  ;;  %472 = vmatprep.mubr.msk.bf16.mxu1 %vm510_vm0, %v509_v1  ;;  %v429_v5 = vld [vmem:[%s164_s25 + $0x1] ss:$2 sm:$0xff]  ;;  %v170_v6 = vld [vmem:[%s164_s25] ss:$2 sm:$0xff] }
  0x10   : > { %v178_v8 = vpack.c.bf16 %v429_v5, %v429_v5  ;;  %v171_v9 = vpack.c.bf16 %v170_v6, %v170_v6  ;;  %v440_v11 = vld [vmem:[%s164_s25 + $0x2] ss:$2 sm:$0xff] }
  0x11   : > { %463 = vmatpush3.bf16.msra.mxu0 %v497_v3  ;;  %v297_v12 = vpack.c.bf16 %v440_v11, %v440_v11 }
  0x12   : > { %471 = vmatpush3.bf16.msra.mxu1 %v498_v4  ;;  %476 = vmatprep.subr.bf16.mxu0 %v509_v1 }
  0x14   : > { %465 = vmatmul.mubr.msk.bf16.vlgmr.msra.gmra.mxu0 %vm196_vm1, %v178_v8 }
  0x15   : > { %473 = vmatmul.mubr.msk.bf16.vlgmr.msra.gmra.mxu1 %vm196_vm1, %v171_v9  ;;  %477 = vmatpush3.bf16.msra.mxu0 %v499_v7 }
  0x16   : > { %480 = vmatprep.mubr.msk.bf16.mxu0 %vm510_vm0, %v509_v1  ;;  %478 = vmatprep.subr.bf16.mxu0 %v509_v1 }
  0x19   : > { %479 = vmatpush3.bf16.msra.mxu0 %v500_v10 }
  0x1c   : > { %481 = vmatmul.mubr.msk.bf16.vlgmr.msra.gmra.mxu0 %vm196_vm1, %v297_v12 }
  0xd4   : > { %v234_v13 = vpop.f32.mrf.mxu0 }
  0xd5   : > { %v289_v14 = vpop.f32.mrf.mxu1 }
  0xd6   : > { %v466_v15 = vpop.f32.mrf.mxu0  ;;  %v290_v21 = vadd.f32 %v289_v14, %v234_v13 }
  0xd7   : > { %v474_v16 = vpop.f32.mrf.mxu1 }
  0xd8   : > { %v237_v17 = vpop.f32.mrf.mxu0 }
  0xd9   : > { %v292_v18 = vpop.f32.mrf.mxu1 }
  0xda   : > { %v467_v19 = vpop.f32.mrf.mxu0 }
  0xdb   : > { %v475_v20 = vpop.f32.mrf.mxu1 }
  0xdc   : > { %v352_v22 = vpop.f32.mrf.mxu0 }
  0xdd   : > { %v358_v24 = vadd.f32 %v352_v22, %v290_v21 }
  0xde   : > { %v482_v25 = vpop.f32.mrf.mxu0 }
  0xdf   : > { %v366_v26 = vadd.f32 %v448_v23, %v358_v24 }
  0xe0   : > { %v355_v27 = vpop.f32.mrf.mxu0 }
  0xe1   : > { %v367_v28 = vmax.f32 %v366_v26, 0.0 }
  0xe2   : > { %v483_v29 = vpop.f32.mrf.mxu0 }
  0xe3   : > { %368 = vst.msk [vmem:[%s168_s8] sm:$0xff] %vm196_vm1, %v367_v28 }
  0xe4 PF: > { %s13_s12 = sadd.s32 1, %s507_s12  }
  0xe5   : > { %p10_p4 = scmp.ge.s32.totalorder %s13_s12, 4  }
  0xe7   :  { %12 = sbr.rel (!%p10_p4) target bundleno = 1 (0x1), region = 66 }

// kernel: encoder_block_forward.12
= control target key start
LH: loop header
LB: loop body
LE: loop exit
PB: predicated region body
PF: predicated region fallthrough
CT: control target
= control target key end

     0   :  { %vm40_vm0 = vcmask 261120   ;;  %v412_v14 = vmov 0.0   ;;  %vm413_vm1 = vmmov 0   ;;  %vm174_vm6 = vcmask 257024   ;;  %s547_s0 = inlined_call_operand.vmem [shape: f32[16,32], index: 0, kind: input, shape index: {}]   ;;  %s548_s3 = inlined_call_operand.vmem [shape: bf16[32,32], index: 3, kind: input, shape index: {}]   ;;  %s549_s4 = inlined_call_operand.vmem [shape: bf16[32,32], index: 4, kind: input, shape index: {}]   ;;  %s550_s5 = inlined_call_operand.vmem [shape: bf16[32,32], index: 5, kind: input, shape index: {}]   ;;  %s551_s1 = inlined_call_operand.vmem [shape: f32[1,32], index: 1, kind: input, shape index: {}]   ;;  %s552_s2 = inlined_call_operand.vmem [shape: f32[1,32], index: 2, kind: input, shape index: {}]   ;;  %s553_s6 = inlined_call_operand.vmem [shape: f32[1,32], index: 6, kind: input, shape index: {}]   ;;  %s554_s7 = inlined_call_operand.vmem [shape: f32[1,32], index: 7, kind: input, shape index: {}]   ;;  %s555_s9 = inlined_call_operand.vmem [shape: bf16[16,32], index: 9, kind: output, shape index: {0}]   ;;  %s556_s10 = inlined_call_operand.vmem [shape: bf16[16,32], index: 10, kind: output, shape index: {1}]   ;;  %s557_s8 = inlined_call_operand.vmem [shape: f32[1,32], index: 8, kind: input, shape index: {}]   ;;  %s558_s11 = inlined_call_operand.vmem [shape: bf16[16,32], index: 11, kind: output, shape index: {2}]  }
   0x1   :  { %v36_v0 = vld [vmem:[%s547_s0] sm:$0xff]  ;;  %v37_v1 = vld [vmem:[%s547_s0 + $0x8] sm:$0xff]  ;;  %372 = vmatprep.subr.bf16.mxu0 %v412_v14  ;;  %380 = vmatprep.subr.bf16.mxu1 %v412_v14 }
   0x2   :  { %v41_v2 = vsel %vm40_vm0, %v36_v0, 0.0  ;;  %v44_v3 = vsel %vm40_vm0, %v37_v1, 0.0  ;;  %v398_v15 = vld [vmem:[%s548_s3 + $0x8] sm:$0xff]   ;;  %376 = vmatprep.mubr.msk.bf16.mxu0 %vm413_vm1, %v412_v14  ;;  %384 = vmatprep.mubr.msk.bf16.mxu1 %vm413_vm1, %v412_v14  ;;  %v400_v17 = vld [vmem:[%s548_s3] sm:$0xff]  }
   0x3   :  { %42 = vadd.xlane.f32.xlu0 %v41_v2  ;;  %v399_v16 = vld [vmem:[%s549_s4 + $0x8] sm:$0xff]   ;;  %373 = vmatpush3.bf16.msra.mxu0 %v398_v15  ;;  %v401_v18 = vld [vmem:[%s549_s4] sm:$0xff]  }
   0x4   :  { %381 = vmatpush3.bf16.msra.mxu1 %v399_v16  ;;  %374 = vmatprep.subr.bf16.mxu0 %v412_v14  ;;  %v337_v35 = vld [vmem:[%s551_s1] ss:$0 sm:$0xff]  ;;  %v402_v45 = vld [vmem:[%s550_s5 + $0x8] sm:$0xff]  }
   0x5   :  { %382 = vmatprep.subr.bf16.mxu1 %v412_v14  ;;  %v338_v41 = vld [vmem:[%s552_s2] ss:$0 sm:$0xff] }
   0x6   :  { %v403_v47 = vld [vmem:[%s550_s5] sm:$0xff]  }
   0x7   :  { %45 = vadd.xlane.f32.xlu0 %v44_v3  ;;  %375 = vmatpush3.bf16.msra.mxu0 %v400_v17  ;;  %v339_v48 = vld [vmem:[%s553_s6] ss:$0 sm:$0xff] }
   0x8   :  { %383 = vmatpush3.bf16.msra.mxu1 %v401_v18  ;;  %388 = vmatprep.subr.bf16.mxu0 %v412_v14  ;;  %v345_v49 = vld [vmem:[%s554_s7] ss:$0 sm:$0xff] }
  0x8c   :  { %v43_v4 = vpop.xlane.xlu0 %42 }
  0x8d   :  { %v48_v5 = vmul.f32 0.03125, %v43_v4 }
  0x8f   :  { %v50_v6 = vsub.f32 %v36_v0, %v48_v5  ;;  %v351_v0 = vld [vmem:[%s557_s8] ss:$0 sm:$0xff] }
  0x90   :  { %v46_v7 = vpop.xlane.xlu0 %45 }
  0x91   :  { %v49_v8 = vmul.f32 0.03125, %v46_v7  ;;  %v52_v9 = vmul.f32 %v50_v6, %v50_v6  ;;  %v82_v37 = vmul.f32 %v337_v35, %v50_v6 }
  0x93   :  { %v51_v10 = vsub.f32 %v37_v1, %v49_v8  ;;  %v54_v11 = vsel %vm40_vm0, %v52_v9, 0.0 }
  0x94   :  { %55 = vadd.xlane.f32.xlu1 %v54_v11 }
  0x95   :  { %v53_v12 = vmul.f32 %v51_v10, %v51_v10  ;;  %v83_v38 = vmul.f32 %v337_v35, %v51_v10 }
  0x97   :  { %v57_v13 = vsel %vm40_vm0, %v53_v12, 0.0 }
  0x98   :  { %58 = vadd.xlane.f32.xlu1 %v57_v13 }
 0x11d   :  { %v56_v19 = vpop.xlane.xlu1 %55 }
 0x11e   :  { %v60_v20 = vmul.f32 0.032258064, %v56_v19 }
 0x120   :  { %404 = vrsqrt.f32 %v60_v20  ;;  %vm64_vm2 = vcmp.eq.f32.partialorder %v60_v20, inf  ;;  %v67_v25 = vand.u32 2147483648, %v60_v20  ;;  %vm66_vm3 = vcmp.eq.f32.partialorder %v60_v20, 0.0 }
 0x121   :  { %v59_v21 = vpop.xlane.xlu1 %58 }
 0x122   :  { %v61_v22 = vmul.f32 0.032258064, %v59_v21 }
 0x124   :  { %406 = vrsqrt.f32 %v61_v22  ;;  %vm71_vm4 = vcmp.eq.f32.partialorder %v61_v22, inf  ;;  %v74_v31 = vand.u32 2147483648, %v61_v22  ;;  %vm73_vm5 = vcmp.eq.f32.partialorder %v61_v22, 0.0 }
 0x12d   :  { %v405_v23 = vpop.eup %404 }
 0x12e   :  { %v63_v24 = vmul.f32 %v405_v23, %v60_v20 }
 0x130   :  { %v65_v26 = vsel %vm64_vm2, %v60_v20, %v63_v24 }
 0x131   :  { %v407_v27 = vpop.eup %406  ;;  %v68_v28 = vsel %vm66_vm3, %v67_v25, %v65_v26 }
 0x132   :  { %v84_v29 = vadd.f32 1e-07, %v68_v28  ;;  %v70_v30 = vmul.f32 %v407_v27, %v61_v22 }
 0x134   :  { %408 = vrcp.f32 %v84_v29  ;;  %v72_v32 = vsel %vm71_vm4, %v61_v22, %v70_v30 }
 0x135   :  { %v75_v33 = vsel %vm73_vm5, %v74_v31, %v72_v32 }
 0x136   :  { %v85_v34 = vadd.f32 1e-07, %v75_v33 }
 0x138   :  { %410 = vrcp.f32 %v85_v34 }
 0x141   :  { %v409_v36 = vpop.eup %408 }
 0x142   :  { %v88_v39 = vmul.f32 %v409_v36, %v82_v37 }
 0x144   :  { %v96_v43 = vadd.f32 %v338_v41, %v88_v39 }
 0x145   :  { %v411_v40 = vpop.eup %410 }
 0x146   :  { %v89_v42 = vmul.f32 %v411_v40, %v83_v38 }
 0x148   :  { %v97_v44 = vadd.f32 %v338_v41, %v89_v42 }
 0x14a   :  { %v98_v46 = vpack.c.bf16 %v97_v44, %v96_v43 }
 0x14c   :  { %377 = vmatmul.mubr.msk.bf16.vlgmr.msra.gmra.mxu0 %vm40_vm0, %v98_v46  ;;  %385 = vmatmul.mubr.msk.bf16.vlgmr.msra.gmra.mxu1 %vm40_vm0, %v98_v46 }
 0x14d   :  { %389 = vmatpush3.bf16.msra.mxu0 %v402_v45  ;;  %392 = vmatprep.mubr.msk.bf16.mxu0 %vm413_vm1, %v412_v14 }
 0x14e   :  { %390 = vmatprep.subr.bf16.mxu0 %v412_v14 }
 0x151   :  { %391 = vmatpush3.bf16.msra.mxu0 %v403_v47 }
 0x154   :  { %393 = vmatmul.mubr.msk.bf16.vlgmr.msra.gmra.mxu0 %vm40_vm0, %v98_v46 }
 0x20c   :  { %v159_v50 = vpop.f32.mrf.mxu0  ;;  %v234_v51 = vpop.f32.mrf.mxu1 }
 0x20d   :  { %v160_v52 = vadd.f32 %v339_v48, %v159_v50  ;;  %v235_v53 = vadd.f32 %v345_v49, %v234_v51 }
 0x20e   :  { %v378_v54 = vpop.f32.mrf.mxu0  ;;  %v386_v55 = vpop.f32.mrf.mxu1 }
 0x20f   :  { %v357_v56 = vpack.c.bf16 %v160_v52, %v160_v52  ;;  %v359_v57 = vpack.c.bf16 %v235_v53, %v235_v53 }
 0x210   :  { %v162_v58 = vpop.f32.mrf.mxu0  ;;  %v237_v59 = vpop.f32.mrf.mxu1 }
 0x211   :  { %175 = vst.msk [vmem:[%s555_s9] sm:$0xf] %vm174_vm6, %v357_v56  ;;  %249 = vst.msk [vmem:[%s556_s10] sm:$0xf] %vm174_vm6, %v359_v57  ;;  %v163_v60 = vadd.f32 %v339_v48, %v162_v58  ;;  %v238_v61 = vadd.f32 %v345_v49, %v237_v59 }
 0x212   :  { %v379_v62 = vpop.f32.mrf.mxu0  ;;  %v387_v63 = vpop.f32.mrf.mxu1 }
 0x213   :  { %v358_v1 = vpack.c.bf16 %v163_v60, %v163_v60  ;;  %v360_v2 = vpack.c.bf16 %v238_v61, %v238_v61 }
 0x214   :  { %v308_v3 = vpop.f32.mrf.mxu0 }
 0x215   :  { %176 = vst.msk [vmem:[%s555_s9 + $0x4] sm:$0xf] %vm174_vm6, %v358_v1  ;;  %250 = vst.msk [vmem:[%s556_s10 + $0x4] sm:$0xf] %vm174_vm6, %v360_v2  ;;  %v309_v4 = vadd.f32 %v351_v0, %v308_v3 }
 0x216   :  { %v394_v5 = vpop.f32.mrf.mxu0 }
 0x217   :  { %v361_v6 = vpack.c.bf16 %v309_v4, %v309_v4 }
 0x218   :  { %v311_v7 = vpop.f32.mrf.mxu0 }
 0x219   :  { %323 = vst.msk [vmem:[%s558_s11] sm:$0xf] %vm174_vm6, %v361_v6  ;;  %v312_v8 = vadd.f32 %v351_v0, %v311_v7 }
 0x21a   :  { %v395_v9 = vpop.f32.mrf.mxu0 }
 0x21b   :  { %v362_v10 = vpack.c.bf16 %v312_v8, %v312_v8 }
 0x21d   :  { %324 = vst.msk [vmem:[%s558_s11 + $0x4] sm:$0xf] %vm174_vm6, %v362_v10 }

// kernel: encoder_block_forward.13
= control target key start
LH: loop header
LB: loop body
LE: loop exit
PB: predicated region body
PF: predicated region fallthrough
CT: control target
= control target key end

     0   :  { %s1126_s12 = smov 0   ;;  %s1128_s13 = smov 0   ;;  %s1305_s0 = inlined_call_operand.vmem [shape: bf16[8,8,8], index: 0, kind: input, shape index: {}]   ;;  %s1306_s1 = inlined_call_operand.vmem [shape: bf16[8,8,8], index: 1, kind: input, shape index: {}]   ;;  %s1307_s2 = inlined_call_operand.vmem [shape: bf16[8,8,8], index: 2, kind: input, shape index: {}]   ;;  %s1308_s3 = inlined_call_operand.vmem [shape: bf16[8,8,8], index: 3, kind: output, shape index: {}]  }
   0x1   :  { %s1130_s14 = smov 0  }
   0x2 LB: > { %s25_s15 = sadd.s32 1, %s1096_s13  ;;  %p941_p0 = scmp.ge.s32.totalorder %s1100_s14, 1  ;;  %s1100_s14 = sphi %s1130_s14, %s13_s14   ;;  %s1096_s13 = sphi %s1128_s13, %s1310_s13   ;;  %s1092_s12 = sphi %s1126_s12, %s1309_s12  }
   0x3   : > { %p27_p1 = scmp.ge.s32.totalorder %s25_s15, 2  ;;  %p182_p2 = scmp.lt.s32.totalorder %s1100_s14, 3 }
   0x5   : > { %s1312_s15 = smov (%p27_p1, %s25_s15), 0  ;;  %p183_p3 = pnand %p941_p0, %p182_p2 }
   0x6   : > { %s942_s16 = sshll.u32 (!%p183_p3), %s1092_s12, 2 }
   0x7   : > { %186 = sbr.rel (%p183_p3) target bundleno = 806 (0x326), region = 32  ;;  %p223_p4 = scmp.lt.s32.totalorder (!%p183_p3), %s942_s16, 7 }
   0xc   : > { %vm266_vm0 = vcmask 64512   ;;  %v1102_v0 = vmov 0.0   ;;  %vm1103_vm1 = vmmov 0   ;;  %s1314_s16 = smov (!%p223_p4, %s942_s16), 7  ;;  %vm257_vm2 = vcmask 7168  }
   0xd   : > { %976 = vmatprep.subr.bf16.mxu0 %v1102_v0  ;;  %982 = vmatprep.subr.bf16.mxu1 %v1102_v0  ;;  %267 = vst.msk [vmem:[#allocation4] sm:$0xff] %vm266_vm0, %v1102_v0  ;;  %268 = vst.msk [vmem:[#allocation4 + $0x8] sm:$0xff] %vm266_vm0, %v1102_v0  ;;  %s1158_s17 = sshll.u32 %s1314_s16, 2  ;;  %v1104_v13 = vmov -inf   ;;  %v1105_v38 = vmov 0   ;;  %vm600_vm3 = vcmask 1043456  }
   0xe   : > { %269 = vst.msk [vmem:[#allocation4 + $0x10] sm:$0xff] %vm266_vm0, %v1102_v0  ;;  %270 = vst.msk [vmem:[#allocation4 + $0x18] sm:$0xff] %vm266_vm0, %v1102_v0  ;;  %978 = vmatprep.mubr.msk.bf16.mxu0 %vm1103_vm1, %v1102_v0  ;;  %984 = vmatprep.mubr.msk.bf16.mxu1 %vm1103_vm1, %v1102_v0  ;;  %s235_s20 = scalar_lea.vmem %s1306_s1, %s1158_s17  ;;  %s226_s23 = scalar_lea.vmem %s1305_s0, %s1158_s17  ;;  %vm837_vm4 = vcmask 60416  }
   0xf   : > { %v275_v1 = vld [vmem:[%s235_s20] sm:$0xf]  ;;  %v276_v2 = vld [vmem:[%s235_s20 + $0x4] sm:$0xf]  ;;  %v277_v5 = vld [vmem:[%s235_s20 + $0x8] sm:$0xf]  ;;  %1052 = vset.pattern.permute.xlu0 %v1105_v38  ;;  %1053 = vset.pattern.permute.xlu1 %v1105_v38  ;;  %s244_s26 = scalar_lea.vmem %s1307_s2, %s1158_s17  ;;  %s250_s29 = scalar_lea.vmem %s1308_s3, %s1158_s17 }
  0x10   : > { %v284_v3 = vsel %vm266_vm0, %v275_v1, 0  ;;  %v330_v4 = vsel %vm266_vm0, %v276_v2, 0  ;;  %v278_v6 = vld [vmem:[%s235_s20 + $0xc] sm:$0xf]  ;;  %v271_v7 = vld [vmem:[%s226_s23] sm:$0xf] }
  0x11   : > { %977 = vmatpush3.bf16.xpose.msra.mxu0 %v284_v3  ;;  %983 = vmatpush3.bf16.xpose.msra.mxu1 %v330_v4  ;;  %v272_v8 = vld [vmem:[%s226_s23 + $0x4] sm:$0xf]  ;;  %v376_v9 = vsel %vm266_vm0, %v277_v5, 0  ;;  %v422_v10 = vsel %vm266_vm0, %v278_v6, 0  ;;  %v273_v11 = vld [vmem:[%s226_s23 + $0x8] sm:$0xf] }
  0x12   : > { %988 = vmatprep.subr.bf16.mxu0 %v1102_v0  ;;  %994 = vmatprep.subr.bf16.mxu1 %v1102_v0  ;;  %v274_v12 = vld [vmem:[%s226_s23 + $0xc] sm:$0xf]  ;;  %258 = vst.msk [vmem:[#allocation2] sm:$0xff] %vm257_vm2, %v1104_v13  ;;  %259 = vst.msk [vmem:[#allocation2 + $0x8] sm:$0xff] %vm257_vm2, %v1104_v13  ;;  %v593_v54 = vld [vmem:[%s244_s26] sm:$0xf] }
  0x13   : > { %260 = vst.msk [vmem:[#allocation2 + $0x10] sm:$0xff] %vm257_vm2, %v1104_v13  ;;  %261 = vst.msk [vmem:[#allocation2 + $0x18] sm:$0xff] %vm257_vm2, %v1104_v13  ;;  %v602_v56 = vsel %vm600_vm3, %v593_v54, 0  ;;  %v594_v57 = vld [vmem:[%s244_s26 + $0x4] sm:$0xf] }
  0x14   : > { %262 = vst.msk [vmem:[#allocation3] sm:$0xff] %vm257_vm2, %v1102_v0  ;;  %263 = vst.msk [vmem:[#allocation3 + $0x8] sm:$0xff] %vm257_vm2, %v1102_v0  ;;  %v648_v58 = vsel %vm600_vm3, %v594_v57, 0  ;;  %v595_v59 = vld [vmem:[%s244_s26 + $0x8] sm:$0xf] }
  0x15   : > { %264 = vst.msk [vmem:[#allocation3 + $0x10] sm:$0xff] %vm257_vm2, %v1102_v0  ;;  %265 = vst.msk [vmem:[#allocation3 + $0x18] sm:$0xff] %vm257_vm2, %v1102_v0  ;;  %v694_v60 = vsel %vm600_vm3, %v595_v59, 0  ;;  %v596_v61 = vld [vmem:[%s244_s26 + $0xc] sm:$0xf] }
  0x16   : > { %v740_v62 = vsel %vm600_vm3, %v596_v61, 0 }
  0x18   : > { %979 = vmatmul.mubr.msk.bf16.vlgmr.msra.gmra.mxu0 %vm266_vm0, %v271_v7  ;;  %985 = vmatmul.mubr.msk.bf16.vlgmr.msra.gmra.mxu1 %vm266_vm0, %v272_v8 }
  0x19   : > { %989 = vmatpush3.bf16.xpose.msra.mxu0 %v376_v9  ;;  %995 = vmatpush3.bf16.xpose.msra.mxu1 %v422_v10  ;;  %v1213_v39 = vld [vmem:[#allocation2] sm:$0xff]  ;;  %v1218_v42 = vld [vmem:[#allocation2 + $0x8] sm:$0xff] }
  0x1a   : > { %990 = vmatprep.mubr.msk.bf16.mxu0 %vm1103_vm1, %v1102_v0  ;;  %996 = vmatprep.mubr.msk.bf16.mxu1 %vm1103_vm1, %v1102_v0  ;;  %v1228_v46 = vld [vmem:[#allocation2 + $0x10] sm:$0xff]  ;;  %v1238_v50 = vld [vmem:[#allocation2 + $0x18] sm:$0xff] }
  0x1b   : > { %1000 = vmatprep.subr.bf16.mxu0 %v1102_v0  ;;  %1006 = vmatprep.subr.bf16.mxu1 %v1102_v0 }
  0x1c   : > { %v534_v38 = vld [vmem:[#allocation3 + $0x10] sm:$0xff] }
  0x20   : > { %991 = vmatmul.mubr.msk.bf16.vlgmr.msra.gmra.mxu0 %vm266_vm0, %v273_v11  ;;  %997 = vmatmul.mubr.msk.bf16.vlgmr.msra.gmra.mxu1 %vm266_vm0, %v274_v12 }
  0x21   : > { %1002 = vmatprep.mubr.msk.bf16.mxu0 %vm1103_vm1, %v1102_v0  ;;  %1008 = vmatprep.mubr.msk.bf16.mxu1 %vm1103_vm1, %v1102_v0 }
  0x22   : > { %1001 = vmatpush3.bf16.msra.mxu0 %v602_v56  ;;  %1007 = vmatpush3.bf16.msra.mxu1 %v648_v58  ;;  %v561_v56 = vld [vmem:[#allocation4] sm:$0xff]  ;;  %v562_v58 = vld [vmem:[#allocation4 + $0x8] sm:$0xff] }
  0x23   : > { %1012 = vmatprep.subr.bf16.mxu0 %v1102_v0  ;;  %1018 = vmatprep.subr.bf16.mxu1 %v1102_v0 }
  0xd8   : > { %v320_v14 = vpop.f32.mrf.mxu0  ;;  %v366_v15 = vpop.f32.mrf.mxu1 }
  0xd9   : > { %v1200_v16 = vmul.f32 0.35355338, %v320_v14  ;;  %v1202_v17 = vmul.f32 0.35355338, %v366_v15 }
  0xda   : > { %v980_v18 = vpop.f32.mrf.mxu0  ;;  %v986_v19 = vpop.f32.mrf.mxu1 }
  0xdb   : > { %v472_v20 = vsel %vm266_vm0, %v1200_v16, -inf  ;;  %v475_v23 = vsel %vm266_vm0, %v1202_v17, -inf }
  0xdc   : > { %v369_v21 = vpop.f32.mrf.mxu1  ;;  %473 = vmax.xlane.f32.xlu0 %v472_v20  ;;  %v323_v22 = vpop.f32.mrf.mxu0 }
  0xde   : > { %v981_v24 = vpop.f32.mrf.mxu0  ;;  %v987_v25 = vpop.f32.mrf.mxu1 }
  0xe0   : > { %v458_v26 = vpop.f32.mrf.mxu1  ;;  %476 = vmax.xlane.f32.xlu0 %v475_v23  ;;  %v412_v27 = vpop.f32.mrf.mxu0 }
  0xe1   : > { %v1208_v28 = vmul.f32 0.35355338, %v458_v26  ;;  %v466_v29 = vmul.f32 0.35355338, %v412_v27 }
  0xe2   : > { %v992_v30 = vpop.f32.mrf.mxu0  ;;  %v998_v31 = vpop.f32.mrf.mxu1 }
  0xe3   : > { %v478_v32 = vsel %vm266_vm0, %v466_v29, -inf  ;;  %v481_v35 = vsel %vm266_vm0, %v1208_v28, -inf  ;;  %v532_v31 = vld [vmem:[#allocation3] sm:$0xff] }
  0xe4   : > { %v461_v33 = vpop.f32.mrf.mxu1  ;;  %479 = vmax.xlane.f32.xlu1 %v478_v32  ;;  %v415_v34 = vpop.f32.mrf.mxu0 }
  0xe5   : > { %v533_v34 = vld [vmem:[#allocation3 + $0x8] sm:$0xff] }
  0xe6   : > { %v993_v36 = vpop.f32.mrf.mxu0  ;;  %v999_v37 = vpop.f32.mrf.mxu1 }
  0xe8   : > { %482 = vmax.xlane.f32.xlu1 %v481_v35 }
 0x165   : > { %v474_v40 = vpop.xlane.xlu0 %473 }
 0x166   : > { %v1216_v41 = vmax.f32 %v1213_v39, %v474_v40 }
 0x168   : > { %v488_v43 = vsub.f32 %v1213_v39, %v1216_v41  ;;  %790 = vst.msk [vmem:[#allocation2] sm:$0xff] %vm257_vm2, %v1216_v41  ;;  %502 = vperm.xlu0 %1052, %v1216_v41  }
 0x169   : > { %v477_v44 = vpop.xlane.xlu0 %476 }
 0x16a   : > { %v1226_v45 = vmax.f32 %v1218_v42, %v477_v44  ;;  %v492_v23 = vmul.f32 1.442695, %v488_v43 }
 0x16c   : > { %v489_v47 = vsub.f32 %v1218_v42, %v1226_v45  ;;  %791 = vst.msk [vmem:[#allocation2 + $0x8] sm:$0xff] %vm257_vm2, %v1226_v45  ;;  %507 = vperm.xlu1 %1053, %v1226_v45   ;;  %v535_v42 = vld [vmem:[#allocation3 + $0x18] sm:$0xff] }
 0x16d   : > { %v480_v48 = vpop.xlane.xlu1 %479 }
 0x16e   : > { %v1236_v49 = vmax.f32 %v1228_v46, %v480_v48  ;;  %v494_v21 = vmul.f32 1.442695, %v489_v47 }
 0x170   : > { %v490_v51 = vsub.f32 %v1228_v46, %v1236_v49  ;;  %792 = vst.msk [vmem:[#allocation2 + $0x10] sm:$0xff] %vm257_vm2, %v1236_v49  ;;  %512 = vperm.xlu1 %1053, %v1236_v49  }
 0x171   : > { %v483_v52 = vpop.xlane.xlu1 %482 }
 0x172   : > { %v1246_v53 = vmax.f32 %v1238_v50, %v483_v52 }
 0x174   : > { %v491_v55 = vsub.f32 %v1238_v50, %v1246_v53  ;;  %793 = vst.msk [vmem:[#allocation2 + $0x18] sm:$0xff] %vm257_vm2, %v1246_v53  ;;  %517 = vperm.xlu1 %1053, %v1246_v53  }
 0x176   : > { %v498_v26 = vmul.f32 1.442695, %v491_v55 }
 0x1e3   : > { %v503_v63 = vpop.permute.xlu0 %502 }
 0x1e4   : > { %v520_v1 = vsub.f32 %v1200_v16, %v503_v63 }
 0x1e6   : > { %v524_v2 = vmul.f32 1.442695, %v520_v1 }
 0x1e7   : > { %v508_v3 = vpop.permute.xlu1 %507 }
 0x1e8   : > { %1054 = vpow2.f32 %v524_v2  ;;  %v521_v4 = vsub.f32 %v1202_v17, %v508_v3  ;;  %v563_v2 = vld [vmem:[#allocation4 + $0x10] sm:$0xff] }
 0x1ea   : > { %v526_v5 = vmul.f32 1.442695, %v521_v4 }
 0x1eb   : > { %v513_v6 = vpop.permute.xlu1 %512 }
 0x1ec   : > { %1056 = vpow2.f32 %v526_v5  ;;  %v522_v7 = vsub.f32 %v466_v29, %v513_v6 }
 0x1ee   : > { %v528_v8 = vmul.f32 1.442695, %v522_v7 }
 0x1ef   : > { %v518_v9 = vpop.permute.xlu1 %517 }
 0x1f0   : > { %1058 = vpow2.f32 %v528_v8  ;;  %v523_v10 = vsub.f32 %v1208_v28, %v518_v9 }
 0x1f2   : > { %v530_v11 = vmul.f32 1.442695, %v523_v10  ;;  %v564_v10 = vld [vmem:[#allocation4 + $0x18] sm:$0xff] }
 0x1f4   : > { %1060 = vpow2.f32 %v530_v11 }
 0x1f5   : > { %v1055_v12 = vpop.eup %1054  ;;  %1062 = vpow2.f32 %v494_v21 }
 0x1f6   : > { %v540_v13 = vsel %vm266_vm0, %v1055_v12, 0.0  ;;  %v589_v14 = vpack.c.bf16 %v1055_v12, %v1055_v12  ;;  %1064 = vpow2.f32 %v492_v23 }
 0x1f7   : > { %541 = vadd.xlane.f32.xlu1 %v540_v13 }
 0x1f8   : > { %1003 = vmatmul.mubr.msk.bf16.vlgmr.msra.gmra.mxu0 %vm266_vm0, %v589_v14 }
 0x1f9   : > { %v1057_v15 = vpop.eup %1056  ;;  %1013 = vmatpush3.bf16.msra.mxu0 %v694_v60  ;;  %1014 = vmatprep.mubr.msk.bf16.mxu0 %vm1103_vm1, %v1102_v0 }
 0x1fa   : > { %v543_v16 = vsel %vm266_vm0, %v1057_v15, 0.0  ;;  %v590_v17 = vpack.c.bf16 %v1057_v15, %v1057_v15 }
 0x1fb   : > { %544 = vadd.xlane.f32.xlu0 %v543_v16 }
 0x1fc   : > { %1009 = vmatmul.mubr.msk.bf16.vlgmr.msra.gmra.mxu1 %vm266_vm0, %v590_v17 }
 0x1fd   : > { %v1059_v18 = vpop.eup %1058  ;;  %1019 = vmatpush3.bf16.msra.mxu1 %v740_v62  ;;  %1020 = vmatprep.mubr.msk.bf16.mxu1 %vm1103_vm1, %v1102_v0  ;;  %v496_v0 = vmul.f32 1.442695, %v490_v51 }
 0x1fe   : > { %v546_v19 = vsel %vm266_vm0, %v1059_v18, 0.0  ;;  %v591_v20 = vpack.c.bf16 %v1059_v18, %v1059_v18 }
 0x1ff   : > { %547 = vadd.xlane.f32.xlu1 %v546_v19  ;;  %1066 = vpow2.f32 %v496_v0 }
 0x200   : > { %1015 = vmatmul.mubr.msk.bf16.vlgmr.msra.gmra.mxu0 %vm266_vm0, %v591_v20  ;;  %1068 = vpow2.f32 %v498_v26 }
 0x201   : > { %v1061_v22 = vpop.eup %1060 }
 0x202   : > { %v549_v24 = vsel %vm266_vm0, %v1061_v22, 0.0  ;;  %v592_v25 = vpack.c.bf16 %v1061_v22, %v1061_v22  ;;  %v1063_v27 = vpop.eup %1062 }
 0x203   : > { %550 = vadd.xlane.f32.xlu1 %v549_v24  ;;  %v1065_v28 = vpop.eup %1064  ;;  %v537_v36 = vmul.f32 %v1063_v27, %v533_v34 }
 0x204   : > { %1021 = vmatmul.mubr.msk.bf16.vlgmr.msra.gmra.mxu1 %vm266_vm0, %v592_v25  ;;  %v536_v32 = vmul.f32 %v1065_v28, %v532_v31 }
 0x20c   : > { %v1067_v29 = vpop.eup %1066 }
 0x20d   : > { %v1069_v30 = vpop.eup %1068  ;;  %v538_v40 = vmul.f32 %v1067_v29, %v534_v38 }
 0x20e   : > { %v539_v45 = vmul.f32 %v1069_v30, %v535_v42 }
 0x211   : > { %572 = vperm.xlu0 %1052, %v1063_v27  }
 0x214   : > { %567 = vperm.xlu1 %1053, %v1065_v28  }
 0x218   : > { %577 = vperm.xlu1 %1053, %v1067_v29  }
 0x21c   : > { %582 = vperm.xlu1 %1053, %v1069_v30  }
 0x280   : > { %v542_v33 = vpop.xlane.xlu1 %541 }
 0x281   : > { %v552_v35 = vadd.f32 %v542_v33, %v536_v32 }
 0x283   : > { %557 = vst.msk [vmem:[#allocation3] sm:$0xff] %vm257_vm2, %v552_v35 }
 0x284   : > { %v545_v37 = vpop.xlane.xlu0 %544 }
 0x285   : > { %v553_v39 = vadd.f32 %v545_v37, %v537_v36 }
 0x287   : > { %558 = vst.msk [vmem:[#allocation3 + $0x8] sm:$0xff] %vm257_vm2, %v553_v39 }
 0x288   : > { %v548_v41 = vpop.xlane.xlu1 %547 }
 0x289   : > { %v554_v43 = vadd.f32 %v548_v41, %v538_v40 }
 0x28a   : > { %v801_v44 = vld [vmem:[#allocation3] sm:$0xff] }
 0x28b   : > { %559 = vst.msk [vmem:[#allocation3 + $0x10] sm:$0xff] %vm257_vm2, %v554_v43  ;;  %1070 = vrcp.f32 %v801_v44 }
 0x28c   : > { %v551_v46 = vpop.xlane.xlu1 %550  ;;  %v573_v59 = vpop.permute.xlu0 %572 }
 0x28d   : > { %v555_v47 = vadd.f32 %v551_v46, %v539_v45  ;;  %v586_v1 = vmul.f32 %v573_v59, %v562_v58 }
 0x28e   : > { %v802_v48 = vld [vmem:[#allocation3 + $0x8] sm:$0xff] }
 0x28f   : > { %560 = vst.msk [vmem:[#allocation3 + $0x18] sm:$0xff] %vm257_vm2, %v555_v47  ;;  %1072 = vrcp.f32 %v802_v48 }
 0x290   : > { %v568_v55 = vpop.permute.xlu1 %567 }
 0x291   : > { %v585_v57 = vmul.f32 %v568_v55, %v561_v56 }
 0x292   : > { %v803_v49 = vld [vmem:[#allocation3 + $0x10] sm:$0xff] }
 0x293   : > { %1074 = vrcp.f32 %v803_v49 }
 0x294   : > { %v578_v61 = vpop.permute.xlu1 %577 }
 0x295   : > { %v587_v8 = vmul.f32 %v578_v61, %v563_v2 }
 0x296   : > { %v804_v50 = vld [vmem:[#allocation3 + $0x18] sm:$0xff] }
 0x297   : > { %1076 = vrcp.f32 %v804_v50 }
 0x298   : > { %v1071_v51 = vpop.eup %1070  ;;  %v583_v9 = vpop.permute.xlu1 %582 }
 0x299   : > { %811 = vperm.xlu1 %1053, %v1071_v51   ;;  %v588_v16 = vmul.f32 %v583_v9, %v564_v10 }
 0x29c   : > { %v1073_v52 = vpop.eup %1072 }
 0x29d   : > { %816 = vperm.xlu0 %1052, %v1073_v52  }
 0x2a0   : > { %v1075_v53 = vpop.eup %1074 }
 0x2a1   : > { %821 = vperm.xlu1 %1053, %v1075_v53  }
 0x2a4   : > { %v1077_v54 = vpop.eup %1076 }
 0x2a5   : > { %826 = vperm.xlu0 %1052, %v1077_v54  }
 0x2b8   : > { %v638_v60 = vpop.f32.mrf.mxu0 }
 0x2b9   : > { %v782_v62 = vadd.f32 %v638_v60, %v585_v57 }
 0x2ba   : > { %v1004_v63 = vpop.f32.mrf.mxu0 }
 0x2bb   : > { %786 = vst.msk [vmem:[#allocation4] sm:$0xff] %vm266_vm0, %v782_v62 }
 0x2bc   : > { %v641_v3 = vpop.f32.mrf.mxu0  ;;  %v684_v4 = vpop.f32.mrf.mxu1 }
 0x2bd   : > { %v783_v5 = vadd.f32 %v684_v4, %v586_v1 }
 0x2be   : > { %v1005_v6 = vpop.f32.mrf.mxu0  ;;  %v1010_v7 = vpop.f32.mrf.mxu1 }
 0x2bf   : > { %787 = vst.msk [vmem:[#allocation4 + $0x8] sm:$0xff] %vm266_vm0, %v783_v5 }
 0x2c0   : > { %v687_v11 = vpop.f32.mrf.mxu1  ;;  %v730_v12 = vpop.f32.mrf.mxu0 }
 0x2c1   : > { %v784_v13 = vadd.f32 %v730_v12, %v587_v8 }
 0x2c2   : > { %v1011_v14 = vpop.f32.mrf.mxu1  ;;  %v1016_v15 = vpop.f32.mrf.mxu0  ;;  %v797_v25 = vld [vmem:[#allocation4] sm:$0xff] }
 0x2c3   : > { %788 = vst.msk [vmem:[#allocation4 + $0x10] sm:$0xff] %vm266_vm0, %v784_v13 }
 0x2c4   : > { %v733_v17 = vpop.f32.mrf.mxu0  ;;  %v776_v18 = vpop.f32.mrf.mxu1 }
 0x2c5   : > { %v785_v19 = vadd.f32 %v776_v18, %v588_v16 }
 0x2c6   : > { %v1017_v20 = vpop.f32.mrf.mxu0  ;;  %v1022_v21 = vpop.f32.mrf.mxu1  ;;  %v798_v27 = vld [vmem:[#allocation4 + $0x8] sm:$0xff] }
 0x2c7   : > { %789 = vst.msk [vmem:[#allocation4 + $0x18] sm:$0xff] %vm266_vm0, %v785_v19 }
 0x2c8   : > { %v779_v22 = vpop.f32.mrf.mxu1 }
 0x2ca   : > { %v1023_v23 = vpop.f32.mrf.mxu1  ;;  %v799_v32 = vld [vmem:[#allocation4 + $0x10] sm:$0xff] }
 0x2ce   : > { %v800_v36 = vld [vmem:[#allocation4 + $0x18] sm:$0xff] }
 0x314   : > { %v812_v24 = vpop.permute.xlu1 %811 }
 0x315   : > { %v829_v0 = vmul.f32 %v812_v24, %v797_v25 }
 0x317   : > { %v833_v26 = vpack.c.bf16 %v829_v0, %v829_v0 }
 0x318   : > { %v817_v28 = vpop.permute.xlu0 %816 }
 0x319   : > { %838 = vst.msk [vmem:[%s250_s29] sm:$0xf] %vm837_vm4, %v833_v26  ;;  %v830_v29 = vmul.f32 %v817_v28, %v798_v27 }
 0x31b   : > { %v834_v30 = vpack.c.bf16 %v830_v29, %v830_v29 }
 0x31c   : > { %v822_v31 = vpop.permute.xlu1 %821 }
 0x31d   : > { %839 = vst.msk [vmem:[%s250_s29 + $0x4] sm:$0xf] %vm837_vm4, %v834_v30  ;;  %v831_v33 = vmul.f32 %v822_v31, %v799_v32 }
 0x31f   : > { %v835_v34 = vpack.c.bf16 %v831_v33, %v831_v33 }
 0x320   : > { %v827_v35 = vpop.permute.xlu0 %826 }
 0x321   : > { %840 = vst.msk [vmem:[%s250_s29 + $0x8] sm:$0xf] %vm837_vm4, %v835_v34  ;;  %v832_v37 = vmul.f32 %v827_v35, %v800_v36 }
 0x323   : > { %v836_v38 = vpack.c.bf16 %v832_v37, %v832_v37 }
 0x325   : > { %841 = vst.msk [vmem:[%s250_s29 + $0xc] sm:$0xf] %vm837_vm4, %v836_v38 }
 0x326 PF: > { %s13_s14 = sadd.s32 1, %s1100_s14   ;;  %s1309_s12 = smov %s1096_s13 }
 0x327   : > { %p10_p5 = scmp.ge.s32.totalorder %s13_s14, 4   ;;  %s1310_s13 = smov %s1312_s15 }
 0x329   :  { %12 = sbr.rel (!%p10_p5) target bundleno = 2 (0x2), region = 76 }

// kernel: encoder_block_forward.14
= control target key start
LH: loop header
LB: loop body
LE: loop exit
PB: predicated region body
PF: predicated region fallthrough
CT: control target
= control target key end

     0   :  { %vm70_vm0 = vcmask 261120   ;;  %v459_v0 = vmov 0.0   ;;  %vm460_vm1 = vmmov 0   ;;  %vm188_vm6 = vcmask 257024   ;;  %s597_s2 = inlined_call_operand.vmem [shape: bf16[32,32], index: 2, kind: input, shape index: {}]   ;;  %s598_s0 = inlined_call_operand.vmem [shape: bf16[16,32], index: 0, kind: input, shape index: {}]   ;;  %s599_s3 = inlined_call_operand.vmem [shape: f32[1,32], index: 3, kind: input, shape index: {}]   ;;  %s600_s1 = inlined_call_operand.vmem [shape: f32[16,32], index: 1, kind: input, shape index: {}]   ;;  %s601_s6 = inlined_call_operand.vmem [shape: bf16[32,64], index: 6, kind: input, shape index: {}]   ;;  %s602_s8 = inlined_call_operand.vmem [shape: bf16[64,32], index: 8, kind: input, shape index: {}]   ;;  %s603_s4 = inlined_call_operand.vmem [shape: f32[1,32], index: 4, kind: input, shape index: {}]   ;;  %s604_s5 = inlined_call_operand.vmem [shape: f32[1,32], index: 5, kind: input, shape index: {}]   ;;  %s605_s7 = inlined_call_operand.vmem [shape: f32[1,64], index: 7, kind: input, shape index: {}]   ;;  %s606_s9 = inlined_call_operand.vmem [shape: f32[1,32], index: 9, kind: input, shape index: {}]   ;;  %s607_s10 = inlined_call_operand.vmem [shape: f32[16,32], index: 10, kind: output, shape index: {}]  }
   0x1   :  { %411 = vmatprep.subr.bf16.mxu1 %v459_v0  ;;  %v441_v1 = vld [vmem:[%s597_s2 + $0x8] sm:$0xff]   ;;  %415 = vmatprep.mubr.msk.bf16.mxu1 %vm460_vm1, %v459_v0  ;;  %191 = vst.msk [vmem:[#allocation4] sm:$0xff] %vm70_vm0, %v459_v0  ;;  %192 = vst.msk [vmem:[#allocation4 + $0x8] sm:$0xff] %vm70_vm0, %v459_v0  ;;  %v442_v2 = vld [vmem:[%s597_s2] sm:$0xff]   ;;  %vm305_vm7 = vcmask 523264  }
   0x2   :  { %427 = vmatprep.subr.bf16.mxu0 %v459_v0  ;;  %435 = vmatprep.mubr.msk.bf16.mxu0 %vm460_vm1, %v459_v0  ;;  %v443_v3 = vld [vmem:[%s598_s0] sm:$0xff]   ;;  %v116_v11 = vld [vmem:[%s600_s1 + $0x8] sm:$0xff]  ;;  %v447_v29 = vld [vmem:[%s602_s8 + $0x18] sm:$0xff]  }
   0x3   :  { %412 = vmatpush3.bf16.msra.mxu1 %v441_v1  ;;  %v378_v4 = vld [vmem:[%s599_s3] ss:$0 sm:$0xff]  ;;  %v444_v27 = vld [vmem:[%s601_s6 + $0x8] sm:$0xff]   ;;  %428 = vmatpush3.bf16.msra.mxu0 %v447_v29  ;;  %v448_v59 = vld [vmem:[%s602_s8 + $0x10] sm:$0xff]  }
   0x4   :  { %413 = vmatprep.subr.bf16.mxu1 %v459_v0  ;;  %v115_v6 = vld [vmem:[%s600_s1] sm:$0xff]  ;;  %429 = vmatprep.subr.bf16.mxu0 %v459_v0  ;;  %v449_v60 = vld [vmem:[%s602_s8 + $0x8] sm:$0xff]  }
   0x5   :  { %v445_v28 = vld [vmem:[%s601_s6] sm:$0xff]  }
   0x6   :  { %v383_v46 = vld [vmem:[%s603_s4] ss:$0 sm:$0xff] }
   0x7   :  { %414 = vmatpush3.bf16.msra.mxu1 %v442_v2  ;;  %v384_v49 = vld [vmem:[%s604_s5] ss:$0 sm:$0xff]  ;;  %430 = vmatpush3.bf16.msra.mxu0 %v448_v59 }
   0x8   :  { %419 = vmatprep.subr.bf16.mxu1 %v459_v0  ;;  %431 = vmatprep.subr.bf16.mxu0 %v459_v0  ;;  %v450_v61 = vld [vmem:[%s602_s8] sm:$0xff]  }
   0x9   :  { %v387_v62 = vld [vmem:[%s605_s7] ss:$0 sm:$0xff] }
   0xa   :  { %416 = vmatmul.mubr.msk.bf16.vlgmr.msra.gmra.mxu1 %vm70_vm0, %v443_v3 }
   0xb   :  { %423 = vmatprep.mubr.msk.bf16.mxu1 %vm460_vm1, %v459_v0  ;;  %420 = vmatpush3.bf16.msra.mxu1 %v444_v27 }
   0xc   :  { %421 = vmatprep.subr.bf16.mxu1 %v459_v0  ;;  %432 = vmatpush3.bf16.msra.mxu0 %v449_v60 }
   0xd   :  { %433 = vmatprep.subr.bf16.mxu0 %v459_v0  ;;  %v270_v0 = vld [vmem:[#allocation4] sm:$0xff] }
   0xf   :  { %422 = vmatpush3.bf16.msra.mxu1 %v445_v28 }
  0x10   :  { %434 = vmatpush3.bf16.msra.mxu0 %v450_v61 }
  0xca   :  { %v108_v5 = vpop.f32.mrf.mxu1 }
  0xcb   :  { %v109_v7 = vadd.f32 %v378_v4, %v108_v5 }
  0xcc   :  { %v417_v8 = vpop.f32.mrf.mxu1 }
  0xcd   :  { %v117_v9 = vadd.f32 %v115_v6, %v109_v7 }
  0xce   :  { %v111_v10 = vpop.f32.mrf.mxu1 }
  0xcf   :  { %119 = vst.msk [vmem:[#allocation2] sm:$0xff] %vm70_vm0, %v117_v9  ;;  %v112_v12 = vadd.f32 %v378_v4, %v111_v10  ;;  %v123_v13 = vsel %vm70_vm0, %v117_v9, 0.0 }
  0xd0   :  { %124 = vadd.xlane.f32.xlu0 %v123_v13  ;;  %v418_v14 = vpop.f32.mrf.mxu1 }
  0xd1   :  { %v118_v15 = vadd.f32 %v116_v11, %v112_v12  ;;  %v271_v12 = vld [vmem:[#allocation4 + $0x8] sm:$0xff] }
  0xd3   :  { %120 = vst.msk [vmem:[#allocation2 + $0x8] sm:$0xff] %vm70_vm0, %v118_v15  ;;  %v126_v16 = vsel %vm70_vm0, %v118_v15, 0.0 }
  0xd4   :  { %127 = vadd.xlane.f32.xlu0 %v126_v16 }
  0xd6   :  { %v357_v16 = vld [vmem:[#allocation2] sm:$0xff] }
 0x159   :  { %v125_v17 = vpop.xlane.xlu0 %124 }
 0x15a   :  { %v130_v18 = vmul.f32 0.03125, %v125_v17 }
 0x15c   :  { %v132_v19 = vsub.f32 %v117_v9, %v130_v18  ;;  %v397_v18 = vld [vmem:[%s606_s9] ss:$0 sm:$0xff] }
 0x15d   :  { %v128_v20 = vpop.xlane.xlu0 %127 }
 0x15e   :  { %v131_v21 = vmul.f32 0.03125, %v128_v20  ;;  %v134_v22 = vmul.f32 %v132_v19, %v132_v19  ;;  %v164_v47 = vmul.f32 %v383_v46, %v132_v19 }
 0x160   :  { %v133_v23 = vsub.f32 %v118_v15, %v131_v21  ;;  %v136_v24 = vsel %vm70_vm0, %v134_v22, 0.0  ;;  %v358_v21 = vld [vmem:[#allocation2 + $0x8] sm:$0xff] }
 0x161   :  { %137 = vadd.xlane.f32.xlu1 %v136_v24 }
 0x162   :  { %v135_v25 = vmul.f32 %v133_v23, %v133_v23  ;;  %v165_v51 = vmul.f32 %v383_v46, %v133_v23 }
 0x164   :  { %v139_v26 = vsel %vm70_vm0, %v135_v25, 0.0 }
 0x165   :  { %140 = vadd.xlane.f32.xlu1 %v139_v26 }
 0x1ea   :  { %v138_v30 = vpop.xlane.xlu1 %137 }
 0x1eb   :  { %v142_v31 = vmul.f32 0.032258064, %v138_v30 }
 0x1ed   :  { %451 = vrsqrt.f32 %v142_v31  ;;  %vm146_vm2 = vcmp.eq.f32.partialorder %v142_v31, inf  ;;  %v149_v36 = vand.u32 2147483648, %v142_v31  ;;  %vm148_vm3 = vcmp.eq.f32.partialorder %v142_v31, 0.0 }
 0x1ee   :  { %v141_v32 = vpop.xlane.xlu1 %140 }
 0x1ef   :  { %v143_v33 = vmul.f32 0.032258064, %v141_v32 }
 0x1f1   :  { %453 = vrsqrt.f32 %v143_v33  ;;  %vm153_vm4 = vcmp.eq.f32.partialorder %v143_v33, inf  ;;  %v156_v42 = vand.u32 2147483648, %v143_v33  ;;  %vm155_vm5 = vcmp.eq.f32.partialorder %v143_v33, 0.0 }
 0x1fa   :  { %v452_v34 = vpop.eup %451 }
 0x1fb   :  { %v145_v35 = vmul.f32 %v452_v34, %v142_v31 }
 0x1fd   :  { %v147_v37 = vsel %vm146_vm2, %v142_v31, %v145_v35 }
 0x1fe   :  { %v454_v38 = vpop.eup %453  ;;  %v150_v39 = vsel %vm148_vm3, %v149_v36, %v147_v37 }
 0x1ff   :  { %v166_v40 = vadd.f32 1e-07, %v150_v39  ;;  %v152_v41 = vmul.f32 %v454_v38, %v143_v33 }
 0x201   :  { %455 = vrcp.f32 %v166_v40  ;;  %v154_v43 = vsel %vm153_vm4, %v143_v33, %v152_v41 }
 0x202   :  { %v157_v44 = vsel %vm155_vm5, %v156_v42, %v154_v43 }
 0x203   :  { %v167_v45 = vadd.f32 1e-07, %v157_v44 }
 0x205   :  { %457 = vrcp.f32 %v167_v45 }
 0x20e   :  { %v456_v48 = vpop.eup %455 }
 0x20f   :  { %v170_v50 = vmul.f32 %v456_v48, %v164_v47 }
 0x211   :  { %v178_v52 = vadd.f32 %v384_v49, %v170_v50 }
 0x212   :  { %v458_v53 = vpop.eup %457 }
 0x213   :  { %v398_v54 = vpack.c.bf16 %v178_v52, %v178_v52  ;;  %v171_v55 = vmul.f32 %v458_v53, %v165_v51 }
 0x215   :  { %189 = vst.msk [vmem:[#allocation3] sm:$0xf] %vm188_vm6, %v398_v54  ;;  %v179_v56 = vadd.f32 %v384_v49, %v171_v55 }
 0x217   :  { %v399_v57 = vpack.c.bf16 %v179_v56, %v179_v56 }
 0x219   :  { %190 = vst.msk [vmem:[#allocation3 + $0x4] sm:$0xf] %vm188_vm6, %v399_v57 }
 0x220   :  { %v446_v58 = vld [vmem:[#allocation3] sm:$0xff]  }
 0x221   :  { %424 = vmatmul.mubr.msk.bf16.vlgmr.msra.gmra.mxu1 %vm70_vm0, %v446_v58 }
 0x2e1   :  { %v261_v63 = vpop.f32.mrf.mxu1 }
 0x2e2   :  { %v262_v2 = vadd.f32 %v387_v62, %v261_v63 }
 0x2e3   :  { %v425_v1 = vpop.f32.mrf.mxu1 }
 0x2e4   :  { %v268_v6 = vmax.f32 %v262_v2, 0.0 }
 0x2e5   :  { %v264_v3 = vpop.f32.mrf.mxu1 }
 0x2e6   :  { %v265_v4 = vadd.f32 %v387_v62, %v264_v3 }
 0x2e7   :  { %v426_v5 = vpop.f32.mrf.mxu1 }
 0x2e8   :  { %v269_v7 = vmax.f32 %v265_v4, 0.0 }
 0x2ea   :  { %v272_v8 = vpack.c.bf16 %v269_v7, %v268_v6 }
 0x2ec   :  { %436 = vmatmul.mubr.msk.bf16.vlgmr.msra.gmra.mxu0 %vm305_vm7, %v272_v8 }
 0x3ac   :  { %v343_v9 = vpop.f32.mrf.mxu0 }
 0x3ad   :  { %v350_v10 = vadd.f32 %v343_v9, %v270_v0 }
 0x3ae   :  { %v437_v11 = vpop.f32.mrf.mxu0 }
 0x3af   :  { %352 = vst.msk [vmem:[#allocation4] sm:$0xff] %vm70_vm0, %v350_v10 }
 0x3b0   :  { %v346_v13 = vpop.f32.mrf.mxu0 }
 0x3b1   :  { %v351_v14 = vadd.f32 %v346_v13, %v271_v12 }
 0x3b2   :  { %v438_v15 = vpop.f32.mrf.mxu0 }
 0x3b3   :  { %353 = vst.msk [vmem:[#allocation4 + $0x8] sm:$0xff] %vm70_vm0, %v351_v14 }
 0x3b6   :  { %v359_v17 = vld [vmem:[#allocation4] sm:$0xff] }
 0x3b7   :  { %v361_v19 = vadd.f32 %v359_v17, %v357_v16 }
 0x3b9   :  { %v370_v20 = vadd.f32 %v397_v18, %v361_v19 }
 0x3ba   :  { %v360_v22 = vld [vmem:[#allocation4 + $0x8] sm:$0xff] }
 0x3bb   :  { %372 = vst.msk [vmem:[%s607_s10] sm:$0xff] %vm70_vm0, %v370_v20  ;;  %v362_v23 = vadd.f32 %v360_v22, %v358_v21 }
 0x3bd   :  { %v371_v24 = vadd.f32 %v397_v18, %v362_v23 }
 0x3bf   :  { %373 = vst.msk [vmem:[%s607_s10 + $0x8] sm:$0xff] %vm70_vm0, %v371_v24 }

// kernel: encoder_block_forward.17
= control target key start
LH: loop header
LB: loop body
LE: loop exit
PB: predicated region body
PF: predicated region fallthrough
CT: control target
= control target key end

     0   :  { %v572_v1 = vmov 0.0   ;;  %vm573_vm0 = vmmov 0   ;;  %vm77_vm1 = vcmask 261120   ;;  %s730_s0 = inlined_call_operand.vmem [shape: bf16[16,32], index: 0, kind: input, shape index: {}]   ;;  %s731_s1 = inlined_call_operand.vmem [shape: f32[16,32], index: 1, kind: input, shape index: {}]   ;;  %s732_s2 = inlined_call_operand.vmem [shape: bf16[32,32], index: 2, kind: input, shape index: {}]   ;;  %s733_s3 = inlined_call_operand.vmem [shape: f32[1,32], index: 3, kind: input, shape index: {}]   ;;  %s734_s4 = inlined_call_operand.vmem [shape: f32[1,32], index: 4, kind: input, shape index: {}]   ;;  %s735_s5 = inlined_call_operand.vmem [shape: f32[1,32], index: 5, kind: input, shape index: {}]   ;;  %s736_s6 = inlined_call_operand.vmem [shape: bf16[32,64], index: 6, kind: input, shape index: {}]   ;;  %s737_s7 = inlined_call_operand.vmem [shape: f32[1,64], index: 7, kind: input, shape index: {}]   ;;  %s738_s8 = inlined_call_operand.vmem [shape: bf16[64,32], index: 8, kind: input, shape index: {}]   ;;  %s739_s9 = inlined_call_operand.vmem [shape: f32[1,32], index: 9, kind: input, shape index: {}]   ;;  %s740_s10 = inlined_call_operand.vmem [shape: f32[1,32], index: 10, kind: input, shape index: {}]   ;;  %s741_s11 = inlined_call_operand.vmem [shape: f32[1,32], index: 11, kind: input, shape index: {}]   ;;  %s742_s12 = inlined_call_operand.hbm [shape: f32[16,32], index: 12, kind: output, shape index: {}]  }
   0x1   :  { %v524_v0 = vld [vmem:[%s732_s2 + $0x8] sm:$0xff]   ;;  %491 = vmatprep.subr.bf16.mxu1 %v572_v1  ;;  %507 = vmatprep.subr.bf16.mxu0 %v572_v1  ;;  %v525_v2 = vld [vmem:[%s732_s2] sm:$0xff]   ;;  %198 = vst.msk [vmem:[#allocation4] sm:$0xff] %vm77_vm1, %v572_v1  ;;  %199 = vst.msk [vmem:[#allocation4 + $0x8] sm:$0xff] %vm77_vm1, %v572_v1 }
   0x2   :  { %492 = vmatpush3.bf16.msra.mxu1 %v524_v0  ;;  %495 = vmatprep.mubr.msk.bf16.mxu1 %vm573_vm0, %v572_v1  ;;  %v526_v3 = vld [vmem:[%s730_s0] sm:$0xff]  }
   0x3   :  { %493 = vmatprep.subr.bf16.mxu1 %v572_v1  ;;  %515 = vmatprep.mubr.msk.bf16.mxu0 %vm573_vm0, %v572_v1 }
   0x6   :  { %494 = vmatpush3.bf16.msra.mxu1 %v525_v2 }
   0x7   :  { %499 = vmatprep.subr.bf16.mxu1 %v572_v1 }
   0x8   :  { %17 = vsyncpa [#allocation6], 0  ;;  %v456_v4 = vld [vmem:[%s733_s3] ss:$0 sm:$0xff]  ;;  %v123_v11 = vld [vmem:[%s731_s1 + $0x8] sm:$0xff]  ;;  %vm195_vm6 = vcmask 257024  }
   0x9   :  { %496 = vmatmul.mubr.msk.bf16.vlgmr.msra.gmra.mxu1 %vm77_vm1, %v526_v3  ;;  %v122_v6 = vld [vmem:[%s731_s1] sm:$0xff]  ;;  %v527_v27 = vld [vmem:[%s736_s6 + $0x8] sm:$0xff]   ;;  %v530_v29 = vld [vmem:[%s738_s8 + $0x18] sm:$0xff]   ;;  %vm312_vm7 = vcmask 523264   ;;  %s574_s0 = smov [#allocation5]  }
   0xa   :  { %503 = vmatprep.mubr.msk.bf16.mxu1 %vm573_vm0, %v572_v1  ;;  %500 = vmatpush3.bf16.msra.mxu1 %v527_v27  ;;  %v528_v28 = vld [vmem:[%s736_s6] sm:$0xff]   ;;  %v531_v59 = vld [vmem:[%s738_s8 + $0x10] sm:$0xff]   ;;  %v532_v60 = vld [vmem:[%s738_s8 + $0x8] sm:$0xff]   ;;  %s445_s28 = sshll.u32 %s574_s0, 4  ;;  %s446_s28 = int_to_ptr.vmem [resolvable:$true] %s445_s28 }
   0xb   :  { %501 = vmatprep.subr.bf16.mxu1 %v572_v1  ;;  %508 = vmatpush3.bf16.msra.mxu0 %v530_v29  ;;  %v461_v46 = vld [vmem:[%s734_s4] ss:$0 sm:$0xff]  ;;  %p555_p1 = scmp.lt.s32.totalorder %s446_s28, %s446_s28 }
   0xc   :  { %509 = vmatprep.subr.bf16.mxu0 %v572_v1  ;;  %v462_v49 = vld [vmem:[%s735_s5] ss:$0 sm:$0xff] }
   0xd   :  { %v533_v61 = vld [vmem:[%s738_s8] sm:$0xff]  }
   0xe   :  { %502 = vmatpush3.bf16.msra.mxu1 %v528_v28  ;;  %v465_v62 = vld [vmem:[%s737_s7] ss:$0 sm:$0xff] }
   0xf   :  { %510 = vmatpush3.bf16.msra.mxu0 %v531_v59 }
  0x10   :  { %511 = vmatprep.subr.bf16.mxu0 %v572_v1 }
  0x13   :  { %512 = vmatpush3.bf16.msra.mxu0 %v532_v60 }
  0x14   :  { %513 = vmatprep.subr.bf16.mxu0 %v572_v1  ;;  %v277_v1 = vld [vmem:[#allocation4] sm:$0xff] }
  0x17   :  { %514 = vmatpush3.bf16.msra.mxu0 %v533_v61 }
  0xc9   :  { %v115_v5 = vpop.f32.mrf.mxu1 }
  0xca   :  { %v116_v7 = vadd.f32 %v456_v4, %v115_v5 }
  0xcb   :  { %v497_v8 = vpop.f32.mrf.mxu1 }
  0xcc   :  { %v124_v9 = vadd.f32 %v122_v6, %v116_v7 }
  0xcd   :  { %v118_v10 = vpop.f32.mrf.mxu1 }
  0xce   :  { %126 = vst.msk [vmem:[#allocation2] sm:$0xff] %vm77_vm1, %v124_v9  ;;  %v119_v12 = vadd.f32 %v456_v4, %v118_v10  ;;  %v130_v13 = vsel %vm77_vm1, %v124_v9, 0.0 }
  0xcf   :  { %131 = vadd.xlane.f32.xlu0 %v130_v13  ;;  %v498_v14 = vpop.f32.mrf.mxu1 }
  0xd0   :  { %v125_v15 = vadd.f32 %v123_v11, %v119_v12  ;;  %v278_v12 = vld [vmem:[#allocation4 + $0x8] sm:$0xff] }
  0xd2   :  { %127 = vst.msk [vmem:[#allocation2 + $0x8] sm:$0xff] %vm77_vm1, %v125_v15  ;;  %v133_v16 = vsel %vm77_vm1, %v125_v15, 0.0 }
  0xd3   :  { %134 = vadd.xlane.f32.xlu0 %v133_v16 }
  0xd5   :  { %v364_v16 = vld [vmem:[#allocation2] sm:$0xff] }
 0x158   :  { %v132_v17 = vpop.xlane.xlu0 %131 }
 0x159   :  { %v137_v18 = vmul.f32 0.03125, %v132_v17 }
 0x15b   :  { %v139_v19 = vsub.f32 %v124_v9, %v137_v18  ;;  %v475_v18 = vld [vmem:[%s739_s9] ss:$0 sm:$0xff] }
 0x15c   :  { %v135_v20 = vpop.xlane.xlu0 %134 }
 0x15d   :  { %v138_v21 = vmul.f32 0.03125, %v135_v20  ;;  %v141_v22 = vmul.f32 %v139_v19, %v139_v19  ;;  %v171_v47 = vmul.f32 %v461_v46, %v139_v19 }
 0x15f   :  { %v140_v23 = vsub.f32 %v125_v15, %v138_v21  ;;  %v143_v24 = vsel %vm77_vm1, %v141_v22, 0.0  ;;  %v365_v21 = vld [vmem:[#allocation2 + $0x8] sm:$0xff] }
 0x160   :  { %144 = vadd.xlane.f32.xlu1 %v143_v24 }
 0x161   :  { %v142_v25 = vmul.f32 %v140_v23, %v140_v23  ;;  %v172_v51 = vmul.f32 %v461_v46, %v140_v23 }
 0x163   :  { %v146_v26 = vsel %vm77_vm1, %v142_v25, 0.0 }
 0x164   :  { %147 = vadd.xlane.f32.xlu1 %v146_v26 }
 0x1e9   :  { %v145_v30 = vpop.xlane.xlu1 %144 }
 0x1ea   :  { %v149_v31 = vmul.f32 0.032258064, %v145_v30 }
 0x1ec   :  { %534 = vrsqrt.f32 %v149_v31  ;;  %vm153_vm2 = vcmp.eq.f32.partialorder %v149_v31, inf  ;;  %v156_v36 = vand.u32 2147483648, %v149_v31  ;;  %vm155_vm3 = vcmp.eq.f32.partialorder %v149_v31, 0.0 }
 0x1ed   :  { %v148_v32 = vpop.xlane.xlu1 %147 }
 0x1ee   :  { %v150_v33 = vmul.f32 0.032258064, %v148_v32 }
 0x1f0   :  { %536 = vrsqrt.f32 %v150_v33  ;;  %vm160_vm4 = vcmp.eq.f32.partialorder %v150_v33, inf  ;;  %v163_v42 = vand.u32 2147483648, %v150_v33  ;;  %vm162_vm5 = vcmp.eq.f32.partialorder %v150_v33, 0.0 }
 0x1f9   :  { %v535_v34 = vpop.eup %534 }
 0x1fa   :  { %v152_v35 = vmul.f32 %v535_v34, %v149_v31 }
 0x1fc   :  { %v154_v37 = vsel %vm153_vm2, %v149_v31, %v152_v35 }
 0x1fd   :  { %v537_v38 = vpop.eup %536  ;;  %v157_v39 = vsel %vm155_vm3, %v156_v36, %v154_v37 }
 0x1fe   :  { %v173_v40 = vadd.f32 1e-07, %v157_v39  ;;  %v159_v41 = vmul.f32 %v537_v38, %v150_v33 }
 0x200   :  { %538 = vrcp.f32 %v173_v40  ;;  %v161_v43 = vsel %vm160_vm4, %v150_v33, %v159_v41 }
 0x201   :  { %v164_v44 = vsel %vm162_vm5, %v163_v42, %v161_v43 }
 0x202   :  { %v174_v45 = vadd.f32 1e-07, %v164_v44 }
 0x204   :  { %540 = vrcp.f32 %v174_v45 }
 0x20d   :  { %v539_v48 = vpop.eup %538 }
 0x20e   :  { %v177_v50 = vmul.f32 %v539_v48, %v171_v47 }
 0x210   :  { %v185_v52 = vadd.f32 %v462_v49, %v177_v50 }
 0x211   :  { %v541_v53 = vpop.eup %540 }
 0x212   :  { %v478_v54 = vpack.c.bf16 %v185_v52, %v185_v52  ;;  %v178_v55 = vmul.f32 %v541_v53, %v172_v51  ;;  %v476_v53 = vld [vmem:[%s740_s10] ss:$0 sm:$0xff]  ;;  %s550_s10 = scalar_lea.vmem %s446_s28, 256 }
 0x213   :  { %p551_p0 = scmp.ne.s32.totalorder %s446_s28, %s550_s10  ;;  %p556_p2 = scmp.lt.s32.totalorder %s550_s10, %s550_s10 }
 0x214   :  { %196 = vst.msk [vmem:[#allocation3] sm:$0xf] %vm195_vm6, %v478_v54  ;;  %v186_v56 = vadd.f32 %v462_v49, %v178_v55 }
 0x215   :  { %p557_p3 = por %p556_p2, %p555_p1 }
 0x216   :  { %v479_v57 = vpack.c.bf16 %v186_v56, %v186_v56  ;;  %v477_v56 = vld [vmem:[%s741_s11] ss:$0 sm:$0xff] }
 0x217   :  { %p558_p4 = pnand %p557_p3, %p551_p0 }
 0x218   :  { %197 = vst.msk [vmem:[#allocation3 + $0x4] sm:$0xf] %vm195_vm6, %v479_v57 }
 0x21f   :  { %v529_v58 = vld [vmem:[#allocation3] sm:$0xff]  }
 0x220   :  { %504 = vmatmul.mubr.msk.bf16.vlgmr.msra.gmra.mxu1 %vm77_vm1, %v529_v58 }
 0x2e0   :  { %v268_v63 = vpop.f32.mrf.mxu1 }
 0x2e1   :  { %v269_v2 = vadd.f32 %v465_v62, %v268_v63 }
 0x2e2   :  { %v505_v0 = vpop.f32.mrf.mxu1 }
 0x2e3   :  { %v275_v6 = vmax.f32 %v269_v2, 0.0 }
 0x2e4   :  { %v271_v3 = vpop.f32.mrf.mxu1 }
 0x2e5   :  { %v272_v4 = vadd.f32 %v465_v62, %v271_v3 }
 0x2e6   :  { %v506_v5 = vpop.f32.mrf.mxu1 }
 0x2e7   :  { %v276_v7 = vmax.f32 %v272_v4, 0.0 }
 0x2e9   :  { %v279_v8 = vpack.c.bf16 %v276_v7, %v275_v6 }
 0x2eb   :  { %516 = vmatmul.mubr.msk.bf16.vlgmr.msra.gmra.mxu0 %vm312_vm7, %v279_v8 }
 0x3ab   :  { %v350_v9 = vpop.f32.mrf.mxu0 }
 0x3ac   :  { %v357_v10 = vadd.f32 %v350_v9, %v277_v1 }
 0x3ad   :  { %v517_v11 = vpop.f32.mrf.mxu0 }
 0x3ae   :  { %359 = vst.msk [vmem:[#allocation4] sm:$0xff] %vm77_vm1, %v357_v10 }
 0x3af   :  { %v353_v13 = vpop.f32.mrf.mxu0 }
 0x3b0   :  { %v358_v14 = vadd.f32 %v353_v13, %v278_v12 }
 0x3b1   :  { %v518_v15 = vpop.f32.mrf.mxu0 }
 0x3b2   :  { %360 = vst.msk [vmem:[#allocation4 + $0x8] sm:$0xff] %vm77_vm1, %v358_v14 }
 0x3b5   :  { %v366_v17 = vld [vmem:[#allocation4] sm:$0xff] }
 0x3b6   :  { %v368_v19 = vadd.f32 %v366_v17, %v364_v16 }
 0x3b8   :  { %v377_v20 = vadd.f32 %v475_v18, %v368_v19 }
 0x3b9   :  { %v367_v22 = vld [vmem:[#allocation4 + $0x8] sm:$0xff] }
 0x3ba   :  { %v381_v23 = vsel %vm77_vm1, %v377_v20, 0.0  ;;  %v369_v24 = vadd.f32 %v367_v22, %v365_v21 }
 0x3bb   :  { %382 = vadd.xlane.f32.xlu0 %v381_v23 }
 0x3bc   :  { %v378_v25 = vadd.f32 %v475_v18, %v369_v24 }
 0x3be   :  { %v384_v26 = vsel %vm77_vm1, %v378_v25, 0.0 }
 0x3bf   :  { %385 = vadd.xlane.f32.xlu1 %v384_v26 }
 0x444   :  { %v383_v27 = vpop.xlane.xlu0 %382 }
 0x445   :  { %v388_v28 = vmul.f32 0.03125, %v383_v27 }
 0x447   :  { %v390_v29 = vsub.f32 %v377_v20, %v388_v28 }
 0x448   :  { %v386_v30 = vpop.xlane.xlu1 %385 }
 0x449   :  { %v389_v31 = vmul.f32 0.03125, %v386_v30  ;;  %v392_v32 = vmul.f32 %v390_v29, %v390_v29  ;;  %v422_v54 = vmul.f32 %v476_v53, %v390_v29 }
 0x44b   :  { %v391_v33 = vsub.f32 %v378_v25, %v389_v31  ;;  %v394_v34 = vsel %vm77_vm1, %v392_v32, 0.0 }
 0x44c   :  { %395 = vadd.xlane.f32.xlu0 %v394_v34 }
 0x44d   :  { %v393_v35 = vmul.f32 %v391_v33, %v391_v33  ;;  %v423_v58 = vmul.f32 %v476_v53, %v391_v33 }
 0x44f   :  { %v397_v36 = vsel %vm77_vm1, %v393_v35, 0.0 }
 0x450   :  { %398 = vadd.xlane.f32.xlu1 %v397_v36 }
 0x4d5   :  { %v396_v37 = vpop.xlane.xlu0 %395 }
 0x4d6   :  { %v400_v38 = vmul.f32 0.032258064, %v396_v37 }
 0x4d8   :  { %542 = vrsqrt.f32 %v400_v38  ;;  %vm404_vm8 = vcmp.eq.f32.partialorder %v400_v38, inf  ;;  %v407_v43 = vand.u32 2147483648, %v400_v38  ;;  %vm406_vm9 = vcmp.eq.f32.partialorder %v400_v38, 0.0 }
 0x4d9   :  { %v399_v39 = vpop.xlane.xlu1 %398 }
 0x4da   :  { %v401_v40 = vmul.f32 0.032258064, %v399_v39 }
 0x4dc   :  { %544 = vrsqrt.f32 %v401_v40  ;;  %vm411_vm10 = vcmp.eq.f32.partialorder %v401_v40, inf  ;;  %v414_v49 = vand.u32 2147483648, %v401_v40  ;;  %vm413_vm11 = vcmp.eq.f32.partialorder %v401_v40, 0.0 }
 0x4e5   :  { %v543_v41 = vpop.eup %542 }
 0x4e6   :  { %v403_v42 = vmul.f32 %v543_v41, %v400_v38 }
 0x4e8   :  { %v405_v44 = vsel %vm404_vm8, %v400_v38, %v403_v42 }
 0x4e9   :  { %v545_v45 = vpop.eup %544  ;;  %v408_v46 = vsel %vm406_vm9, %v407_v43, %v405_v44 }
 0x4ea   :  { %v424_v47 = vadd.f32 1e-07, %v408_v46  ;;  %v410_v48 = vmul.f32 %v545_v45, %v401_v40 }
 0x4ec   :  { %546 = vrcp.f32 %v424_v47  ;;  %v412_v50 = vsel %vm411_vm10, %v401_v40, %v410_v48 }
 0x4ed   :  { %v415_v51 = vsel %vm413_vm11, %v414_v49, %v412_v50 }
 0x4ee   :  { %v425_v52 = vadd.f32 1e-07, %v415_v51 }
 0x4f0   :  { %548 = vrcp.f32 %v425_v52 }
 0x4f9   :  { %v547_v55 = vpop.eup %546 }
 0x4fa   :  { %v428_v57 = vmul.f32 %v547_v55, %v422_v54 }
 0x4fc   :  { %v436_v59 = vadd.f32 %v477_v56, %v428_v57 }
 0x4fd   :  { %v549_v60 = vpop.eup %548 }
 0x4fe   :  { %v429_v61 = vmul.f32 %v549_v60, %v423_v58  ;;  %438 = vst.msk [vmem:[#allocation5] sm:$0xff] %vm77_vm1, %v436_v59 }
 0x500   :  { %v437_v62 = vadd.f32 %v477_v56, %v429_v61 }
 0x502   :  { %439 = vst.msk [vmem:[#allocation5 + $0x8] sm:$0xff] %vm77_vm1, %v437_v62 }
 0x503   :  { %561 = shalt.err (!%p558_p4)
}
 0x504   :  { %s575_s11 = smov 128   ;;  %s576_s29 = smov 8  }
 0x505   :  { %451 = dma.vmem_to_hbm [thread:$0]  %s446_s28, 256, %s742_s12, [#allocation6], %s575_s11, %s575_s11, %s576_s29  }
 0x506   :  { %570 = dma.done.wait [#allocation6], 256  }
 0x507   :  { %571 = vsyncadd [#allocation6], 4294967040 }
 0x508   :  { %455 = vsyncpa [#allocation6], 1 }

</bundles_post_ra>
